<compile_context>
chip_gen: v6e
topology: v6e:2x2x1
jax: 0.10.0
libtpu: 0.0.40
codegen_flags: <defaults>
</compile_context>

<pallas_src>
import functools
import math

import jax
import jax.numpy as jnp
from jax.experimental import pallas as pl
from jax.experimental.pallas import tpu as pltpu

VMEM_LIMIT = 32 * 1024 * 1024  # safe scoped-VMEM budget on v5e/v6e/v7x


def _tile(dim, target, align):
    """Largest `align`-multiple divisor of `dim` that is <= target (or `dim` itself)."""
    if dim <= target:
        return dim
    t = (min(target, dim) // align) * align
    while t >= align:
        if dim % t == 0:
            return t
        t -= align
    return dim


def _cparams(sems):
    return pltpu.CompilerParams(dimension_semantics=sems, vmem_limit_bytes=VMEM_LIMIT)


# ----------------------------- tiled linear (bias) kernel -----------------------------

def _linear_kernel(x_ref, w_ref, b_ref, o_ref, acc_ref):
    k = pl.program_id(2)

    @pl.when(k == 0)
    def _():
        acc_ref[...] = jnp.zeros_like(acc_ref)

    acc_ref[...] += jnp.dot(x_ref[...].astype(jnp.bfloat16), w_ref[...],
                            preferred_element_type=jnp.float32)

    @pl.when(k == pl.num_programs(2) - 1)
    def _():
        o_ref[...] = (acc_ref[...] + b_ref[...]).astype(o_ref.dtype)


def linear(x2d, w, b, *, out_dtype=jnp.float32,
           tm_target=256, tn_target=256, tk_target=512):
    M, K = x2d.shape
    Kw, N = w.shape
    assert K == Kw
    tm = _tile(M, tm_target, 8)
    tn = _tile(N, tn_target, 128)
    tk = _tile(K, tk_target, 128)
    grid = (M // tm, N // tn, K // tk)
    return pl.pallas_call(
        _linear_kernel,
        grid=grid,
        in_specs=[
            pl.BlockSpec((tm, tk), lambda i, j, k: (i, k)),
            pl.BlockSpec((tk, tn), lambda i, j, k: (k, j)),
            pl.BlockSpec((1, tn), lambda i, j, k: (0, j)),
        ],
        out_specs=pl.BlockSpec((tm, tn), lambda i, j, k: (i, j)),
        out_shape=jax.ShapeDtypeStruct((M, N), out_dtype),
        scratch_shapes=[pltpu.VMEM((tm, tn), jnp.float32)],
        compiler_params=_cparams(("parallel", "parallel", "arbitrary")),
    )(x2d, w.astype(jnp.bfloat16), b.reshape(1, N).astype(jnp.float32))


# -------------------- fused FFN (+ residual + LayerNorm) kernel --------------------

def _ffn_add_ln_kernel(x_ref, w1_ref, b1_ref, w2_ref, b2_ref, g_ref, beta_ref,
                       o_ref, acc_ref):
    j = pl.program_id(1)

    @pl.when(j == 0)
    def _():
        acc_ref[...] = jnp.zeros_like(acc_ref)

    x = x_ref[...]
    h = jnp.dot(x.astype(jnp.bfloat16), w1_ref[...],
                preferred_element_type=jnp.float32) + b1_ref[...]
    h = jnp.maximum(h, 0.0)
    acc_ref[...] += jnp.dot(h.astype(jnp.bfloat16), w2_ref[...],
                            preferred_element_type=jnp.float32)

    @pl.when(j == pl.num_programs(1) - 1)
    def _():
        z = x + acc_ref[...] + b2_ref[...]
        mean = jnp.mean(z, axis=-1, keepdims=True)
        var = jnp.mean((z - mean) ** 2, axis=-1, keepdims=True)
        o_ref[...] = (z - mean) * jax.lax.rsqrt(var + 1e-5) * g_ref[...] + beta_ref[...]


def ffn_add_ln(x, p, gamma, beta, *, tm_target=256, tf_target=512):
    B, S, D = x.shape
    d_ff = p["w1"].shape[1]
    M = B * S
    tm = _tile(M, tm_target, 8)
    tf = _tile(d_ff, tf_target, 128)
    grid = (M // tm, d_ff // tf)
    out = pl.pallas_call(
        _ffn_add_ln_kernel,
        grid=grid,
        in_specs=[
            pl.BlockSpec((tm, D), lambda i, j: (i, 0)),
            pl.BlockSpec((D, tf), lambda i, j: (0, j)),
            pl.BlockSpec((1, tf), lambda i, j: (0, j)),
            pl.BlockSpec((tf, D), lambda i, j: (j, 0)),
            pl.BlockSpec((1, D), lambda i, j: (0, 0)),
            pl.BlockSpec((1, D), lambda i, j: (0, 0)),
            pl.BlockSpec((1, D), lambda i, j: (0, 0)),
        ],
        out_specs=pl.BlockSpec((tm, D), lambda i, j: (i, 0)),
        out_shape=jax.ShapeDtypeStruct((M, D), jnp.float32),
        scratch_shapes=[pltpu.VMEM((tm, D), jnp.float32)],
        compiler_params=_cparams(("parallel", "arbitrary")),
    )(x.reshape(M, D).astype(jnp.float32),
      p["w1"], p["b1"].reshape(1, d_ff).astype(jnp.float32),
      p["w2"], p["b2"].reshape(1, D).astype(jnp.float32),
      gamma.reshape(1, D), beta.reshape(1, D))
    return out.reshape(B, S, D)


# ----- fused attention (+ output proj + residual + LayerNorm) kernel -----

def _make_mha_kernel(*, num_heads, scale, causal, return_attn):
    def kernel(q_ref, k_ref, v_ref, pad_ref, wo_ref, bo_ref, res_ref, g_ref, beta_ref,
               o_ref, *rest):
        if return_attn:
            attn_ref, ctx_ref = rest
        else:
            attn_ref = None
            (ctx_ref,) = rest

        _, tq, D = q_ref.shape
        Sk = k_ref.shape[1]
        dk = D // num_heads

        # mask (shared by every head): padding (+ causal rebuilt in-kernel)
        mask = jnp.broadcast_to(pad_ref[0], (tq, Sk))
        if causal:
            qi = pl.program_id(1)
            row = jax.lax.broadcasted_iota(jnp.int32, (tq, Sk), 0) + qi * tq
            col = jax.lax.broadcasted_iota(jnp.int32, (tq, Sk), 1)
            mask = jnp.maximum(mask, (col > row).astype(jnp.float32))
        mask_neg = mask * (-1e9)

        for h in range(num_heads):
            lo, hi = h * dk, (h + 1) * dk
            qh = q_ref[0, :, lo:hi].astype(jnp.bfloat16)   # [tq, dk]
            kh = k_ref[0, :, lo:hi].astype(jnp.bfloat16)   # [Sk, dk]
            vh = v_ref[0, :, lo:hi].astype(jnp.bfloat16)   # [Sk, dk]
            s = jax.lax.dot_general(qh, kh, (((1,), (1,)), ((), ())),
                                    preferred_element_type=jnp.float32) * scale
            s = s + mask_neg
            s = s - jnp.max(s, axis=-1, keepdims=True)
            e = jnp.exp(s)
            p = e * pl.reciprocal(jnp.sum(e, axis=-1, keepdims=True), approx=True)
            if return_attn:
                attn_ref[0, h, :, :] = p
            ctx_ref[:, lo:hi] = jnp.dot(p.astype(jnp.bfloat16), vh,
                                        preferred_element_type=jnp.float32)

        # output projection + residual + LayerNorm, all on the resident tile
        proj = jnp.dot(ctx_ref[...].astype(jnp.bfloat16), wo_ref[...],
                       preferred_element_type=jnp.float32) + bo_ref[...]
        z = res_ref[0] + proj
        mean = jnp.mean(z, axis=-1, keepdims=True)
        var = jnp.mean((z - mean) ** 2, axis=-1, keepdims=True)
        o_ref[0] = (z - mean) * jax.lax.rsqrt(var + 1e-5) * g_ref[...] + beta_ref[...]

    return kernel


def mha_fused(q, k, v, pad, wo, bo, res, gamma, beta, *, num_heads, causal,
              return_attn=True, tq_target=256):
    B, Sq, D = q.shape
    Sk = k.shape[1]
    assert D % num_heads == 0
    dk = D // num_heads
    tq = _tile(Sq, tq_target, 8)
    scale = 1.0 / math.sqrt(dk)

    kernel = _make_mha_kernel(num_heads=num_heads, scale=scale,
                              causal=causal, return_attn=return_attn)

    out_shape = [jax.ShapeDtypeStruct((B, Sq, D), jnp.float32)]
    out_specs = [pl.BlockSpec((1, tq, D), lambda b, qi: (b, qi, 0))]
    if return_attn:
        out_shape.append(jax.ShapeDtypeStruct((B, num_heads, Sq, Sk), jnp.float32))
        out_specs.append(pl.BlockSpec((1, num_heads, tq, Sk),
                                      lambda b, qi: (b, 0, qi, 0)))

    outs = pl.pallas_call(
        kernel,
        grid=(B, Sq // tq),
        in_specs=[
            pl.BlockSpec((1, tq, D), lambda b, qi: (b, qi, 0)),   # q
            pl.BlockSpec((1, Sk, D), lambda b, qi: (b, 0, 0)),    # k (full keys)
            pl.BlockSpec((1, Sk, D), lambda b, qi: (b, 0, 0)),    # v
            pl.BlockSpec((1, 1, Sk), lambda b, qi: (b, 0, 0)),    # padding mask (per batch)
            pl.BlockSpec((D, D), lambda b, qi: (0, 0)),           # wo
            pl.BlockSpec((1, D), lambda b, qi: (0, 0)),           # bo
            pl.BlockSpec((1, tq, D), lambda b, qi: (b, qi, 0)),   # residual
            pl.BlockSpec((1, D), lambda b, qi: (0, 0)),           # ln gamma
            pl.BlockSpec((1, D), lambda b, qi: (0, 0)),           # ln beta
        ],
        out_specs=out_specs,
        out_shape=out_shape,
        scratch_shapes=[pltpu.VMEM((tq, D), jnp.float32)],
        compiler_params=_cparams(("parallel", "parallel")),
    )(q.astype(jnp.bfloat16), k.astype(jnp.bfloat16), v.astype(jnp.bfloat16),
      pad.astype(jnp.float32), wo.astype(jnp.bfloat16),
      bo.reshape(1, D).astype(jnp.float32), res.astype(jnp.float32),
      gamma.reshape(1, D), beta.reshape(1, D))

    if return_attn:
        return outs[0], outs[1]
    return outs[0], None


# ----------------------------- model (glue) -----------------------------

def positional_encoding(max_len, d_model):
    pos = jnp.arange(max_len)[:, None].astype(jnp.float32)
    i = jnp.arange(d_model)[None, :]
    angle_rates = 1.0 / jnp.power(
        10000.0, (2 * (i // 2)).astype(jnp.float32) / d_model)
    angles = pos * angle_rates
    return jnp.where(i % 2 == 0, jnp.sin(angles), jnp.cos(angles)).astype(jnp.float32)


def create_padding_mask(seq):
    # (B, S) -> (B, 1, S): 1.0 at padding tokens (id 0).  The causal ("look-ahead")
    # part of the decoder mask is rebuilt inside the attention kernel with iota.
    return (seq == 0).astype(jnp.float32)[:, None, :]


def encoder_forward(p, src, src_pad, num_heads):
    B, S = src.shape
    D = p["embedding"].shape[1]
    x = p["embedding"][src] * math.sqrt(D) + p["pos_enc"][:S][None]
    attn_weights = {}
    for li, layer in enumerate(p["layers"]):
        m = layer["mha"]
        qkv = linear(x.reshape(B * S, D), m["w_qkv"], m["b_qkv"],
                     out_dtype=jnp.bfloat16).reshape(B, S, 3 * D)
        q, k, v = qkv[..., :D], qkv[..., D:2 * D], qkv[..., 2 * D:]
        x, w = mha_fused(q, k, v, src_pad, m["wo"], m["bo"], x,
                         layer["ln1_g"], layer["ln1_b"],
                         num_heads=num_heads, causal=False)
        x = ffn_add_ln(x, layer["ffn"], layer["ln2_g"], layer["ln2_b"])
        attn_weights[f"encoder_layer{li + 1}"] = w
    return x, attn_weights


def decoder_forward(p, tgt, enc_out, tgt_pad, src_pad, num_heads):
    B, S = tgt.shape
    Ss = enc_out.shape[1]
    D = p["embedding"].shape[1]
    x = p["embedding"][tgt] * math.sqrt(D) + p["pos_enc"][:S][None]
    enc2d = enc_out.reshape(B * Ss, D)
    attn_weights = {}
    for li, layer in enumerate(p["layers"]):
        # masked self-attention (padding mask + in-kernel causal mask)
        m1 = layer["mha1"]
        qkv = linear(x.reshape(B * S, D), m1["w_qkv"], m1["b_qkv"],
                     out_dtype=jnp.bfloat16).reshape(B, S, 3 * D)
        q, k, v = qkv[..., :D], qkv[..., D:2 * D], qkv[..., 2 * D:]
        x, w1 = mha_fused(q, k, v, tgt_pad, m1["wo"], m1["bo"], x,
                          layer["ln1_g"], layer["ln1_b"],
                          num_heads=num_heads, causal=True)
        # cross-attention on the encoder output (src padding mask)
        m2 = layer["mha2"]
        q2 = linear(x.reshape(B * S, D), m2["wq"], m2["bq"],
                    out_dtype=jnp.bfloat16).reshape(B, S, D)
        kv = linear(enc2d, m2["w_kv"], m2["b_kv"],
                    out_dtype=jnp.bfloat16).reshape(B, Ss, 2 * D)
        k2, v2 = kv[..., :D], kv[..., D:]
        x, w2 = mha_fused(q2, k2, v2, src_pad, m2["wo"], m2["bo"], x,
                          layer["ln2_g"], layer["ln2_b"],
                          num_heads=num_heads, causal=False)
        x = ffn_add_ln(x, layer["ffn"], layer["ln3_g"], layer["ln3_b"])
        attn_weights[f"decoder_layer{li + 1}_block1"] = w1
        attn_weights[f"decoder_layer{li + 1}_block2"] = w2
    logits = linear(x.reshape(B * S, D), p["final_w"], p["final_b"],
                    out_dtype=jnp.float32, tn_target=512)
    return logits.reshape(B, S, -1), attn_weights


def transformer_forward(params, src, tgt, num_heads):
    src_pad = create_padding_mask(src)   # encoder self-attn and decoder cross-attn
    tgt_pad = create_padding_mask(tgt)   # decoder self-attn (causal added in-kernel)
    enc_out, enc_w = encoder_forward(params["encoder"], src, src_pad, num_heads)
    dec_out, dec_w = decoder_forward(params["decoder"], tgt, enc_out,
                                     tgt_pad, src_pad, num_heads)
    return dec_out, {**enc_w, **dec_w}


# ----------------------------- param init -----------------------------

def init_params(key, vocab_size, d_model, num_heads, d_ff,
                num_encoder_layers, num_decoder_layers, max_seq_length):
    keys = iter(jax.random.split(key, 512))

    def w(shape):
        return jax.random.normal(next(keys), shape, jnp.float32) * 0.02

    def wbf(shape):
        return w(shape).astype(jnp.bfloat16)

    def self_mha():
        # fused QKV weight [D, 3D] (columns: q | k | v)
        return {"w_qkv": jnp.concatenate(
                    [w((d_model, d_model)) for _ in range(3)], axis=1
                ).astype(jnp.bfloat16),
                "b_qkv": jnp.zeros((3 * d_model,), jnp.float32),
                "wo": wbf((d_model, d_model)),
                "bo": jnp.zeros((d_model,), jnp.float32)}

    def cross_mha():
        return {"wq": wbf((d_model, d_model)),
                "bq": jnp.zeros((d_model,), jnp.float32),
                "w_kv": jnp.concatenate(
                    [w((d_model, d_model)) for _ in range(2)], axis=1
                ).astype(jnp.bfloat16),
                "b_kv": jnp.zeros((2 * d_model,), jnp.float32),
                "wo": wbf((d_model, d_model)),
                "bo": jnp.zeros((d_model,), jnp.float32)}

    def ffn_p():
        return {"w1": wbf((d_model, d_ff)), "b1": jnp.zeros((d_ff,), jnp.float32),
                "w2": wbf((d_ff, d_model)), "b2": jnp.zeros((d_model,), jnp.float32)}

    def ln():
        return jnp.ones((d_model,), jnp.float32), jnp.zeros((d_model,), jnp.float32)

    pe = positional_encoding(max_seq_length, d_model)

    enc_layers = []
    for _ in range(num_encoder_layers):
        g1, b1 = ln(); g2, b2 = ln()
        enc_layers.append({"mha": self_mha(), "ffn": ffn_p(),
                           "ln1_g": g1, "ln1_b": b1, "ln2_g": g2, "ln2_b": b2})

    dec_layers = []
    for _ in range(num_decoder_layers):
        g1, b1 = ln(); g2, b2 = ln(); g3, b3 = ln()
        dec_layers.append({"mha1": self_mha(), "mha2": cross_mha(), "ffn": ffn_p(),
                           "ln1_g": g1, "ln1_b": b1,
                           "ln2_g": g2, "ln2_b": b2,
                           "ln3_g": g3, "ln3_b": b3})

    return {
        "encoder": {"embedding": w((vocab_size, d_model)), "pos_enc": pe,
                    "layers": enc_layers},
        "decoder": {"embedding": w((vocab_size, d_model)), "pos_enc": pe,
                    "layers": dec_layers,
                    "final_w": wbf((d_model, vocab_size)),
                    "final_b": jnp.zeros((vocab_size,), jnp.float32)},
    }


# ----------------------------- main -----------------------------

if __name__ == "__main__":
    # small config consistent with the module's forward
    vocab_size = 64
    d_model = 32
    num_heads = 4
    d_ff = 64
    num_encoder_layers = 2
    num_decoder_layers = 2
    max_seq_length = 16
    batch = 2
    src_len = 8
    tgt_len = 8

    key = jax.random.PRNGKey(0)
    k_params, k_src, k_tgt = jax.random.split(key, 3)

    params = init_params(k_params, vocab_size, d_model, num_heads, d_ff,
                         num_encoder_layers, num_decoder_layers, max_seq_length)

    src = jax.random.randint(k_src, (batch, src_len), 1, vocab_size, dtype=jnp.int32)
    tgt = jax.random.randint(k_tgt, (batch, tgt_len), 1, vocab_size, dtype=jnp.int32)
    # introduce padding (token id 0) to exercise the padding masks
    src = src.at[:, -2:].set(0)
    tgt = tgt.at[:, -1:].set(0)

    fwd = jax.jit(functools.partial(transformer_forward, num_heads=num_heads))
    logits, attn_weights = fwd(params, src, tgt)
    jax.block_until_ready(logits)
    jax.block_until_ready(attn_weights)

    assert logits.shape == (batch, tgt_len, vocab_size)
    assert attn_weights["encoder_layer1"].shape == (batch, num_heads, src_len, src_len)
    assert attn_weights["decoder_layer1_block1"].shape == (batch, num_heads, tgt_len, tgt_len)
    assert attn_weights["decoder_layer1_block2"].shape == (batch, num_heads, tgt_len, src_len)
    assert bool(jnp.all(jnp.isfinite(logits)))

    # TODO(synk): tile sizes fall back to full-extent blocks for dims not divisible by
    # 128 (e.g. odd vocab sizes); pad such dims upstream for peak-bandwidth tiling.
    print("KERNEL_OK")
</pallas_src>

<mosaic_0001>
module attributes {stable_mosaic.version = 11 : i64} {
  func.func @_linear_kernel(%arg0: i32, %arg1: i32, %arg2: i32, %arg3: memref<16x32xf32, #tpu.memory_space<vmem>>, %arg4: memref<32x96xbf16, #tpu.memory_space<vmem>>, %arg5: memref<1x96xf32, #tpu.memory_space<vmem>>, %arg6: memref<16x96xbf16, #tpu.memory_space<vmem>>, %arg7: memref<16x96xf32, #tpu.memory_space<vmem>>) attributes {dimension_semantics = [#tpu.dimension_semantics<parallel>, #tpu.dimension_semantics<parallel>, #tpu.dimension_semantics<arbitrary>], iteration_bounds = array<i64: 1, 1, 1>, scalar_prefetch = 0 : i64, scratch_operands = 1 : i64, tpu.core_type = #tpu.core_type<tc>, window_params = [{transform_indices = @transform_0, window_bounds = array<i64: 16, 32>}, {transform_indices = @transform_1, window_bounds = array<i64: 32, 96>}, {transform_indices = @transform_2, window_bounds = array<i64: 1, 96>}, {transform_indices = @transform_3, window_bounds = array<i64: 16, 96>}]} {
    %c0_i32 = arith.constant 0 : i32
    %0 = arith.cmpi eq, %arg2, %c0_i32 : i32
    %1 = arith.extui %0 : i1 to i32
    %c0_i32_0 = arith.constant 0 : i32
    %2 = arith.cmpi ne, %1, %c0_i32_0 : i32
    scf.if %2 {
      %cst_10 = arith.constant 0.000000e+00 : f32
      %13 = vector.broadcast %cst_10 : f32 to vector<16x96xf32>
      %c0_11 = arith.constant 0 : index
      %c0_12 = arith.constant 0 : index
      %14 = vector.load %arg7[%c0_11, %c0_12] : memref<16x96xf32, #tpu.memory_space<vmem>>, vector<16x96xf32>
      tpu.vector_store %arg7[%c0_11, %c0_12], %13 {strides = array<i32>} : memref<16x96xf32, #tpu.memory_space<vmem>>, vector<16x96xf32>,
    } else {
    }
    %c0 = arith.constant 0 : index
    %c0_1 = arith.constant 0 : index
    %3 = vector.load %arg7[%c0, %c0_1] : memref<16x96xf32, #tpu.memory_space<vmem>>, vector<16x96xf32>
    %c0_2 = arith.constant 0 : index
    %c0_3 = arith.constant 0 : index
    %4 = vector.load %arg3[%c0_2, %c0_3] : memref<16x32xf32, #tpu.memory_space<vmem>>, vector<16x32xf32>
    %5 = arith.truncf %4 : vector<16x32xf32> to vector<16x32xbf16>
    %c0_4 = arith.constant 0 : index
    %c0_5 = arith.constant 0 : index
    %6 = vector.load %arg4[%c0_4, %c0_5] : memref<32x96xbf16, #tpu.memory_space<vmem>>, vector<32x96xbf16>
    %cst = arith.constant dense<0.000000e+00> : vector<16x96xf32>
    %7 = tpu.matmul %5, %6, %cst {dimension_numbers = #tpu.dot_dimension_numbers<[1], [0], [0], [1], [0, 0, 1, 1], [], []>} : vector<16x32xbf16>, vector<32x96xbf16>, vector<16x96xf32> -> vector<16x96xf32>
    %8 = arith.addf %3, %7 : vector<16x96xf32>
    %c0_6 = arith.constant 0 : index
    %c0_7 = arith.constant 0 : index
    %9 = vector.load %arg7[%c0_6, %c0_7] : memref<16x96xf32, #tpu.memory_space<vmem>>, vector<16x96xf32>
    tpu.vector_store %arg7[%c0_6, %c0_7], %8 {strides = array<i32>} : memref<16x96xf32, #tpu.memory_space<vmem>>, vector<16x96xf32>,
    %c0_i32_8 = arith.constant 0 : i32
    %10 = arith.cmpi eq, %arg2, %c0_i32_8 : i32
    %11 = arith.extui %10 : i1 to i32
    %c0_i32_9 = arith.constant 0 : i32
    %12 = arith.cmpi ne, %11, %c0_i32_9 : i32
    scf.if %12 {
      %c0_10 = arith.constant 0 : index
      %c0_11 = arith.constant 0 : index
      %13 = vector.load %arg7[%c0_10, %c0_11] : memref<16x96xf32, #tpu.memory_space<vmem>>, vector<16x96xf32>
      %c0_12 = arith.constant 0 : index
      %c0_13 = arith.constant 0 : index
      %14 = vector.load %arg5[%c0_12, %c0_13] : memref<1x96xf32, #tpu.memory_space<vmem>>, vector<1x96xf32>
      %15 = vector.broadcast %14 : vector<1x96xf32> to vector<16x96xf32>
      %16 = arith.addf %13, %15 : vector<16x96xf32>
      %17 = arith.truncf %16 : vector<16x96xf32> to vector<16x96xbf16>
      %c0_14 = arith.constant 0 : index
      %c0_15 = arith.constant 0 : index
      %18 = vector.load %arg6[%c0_14, %c0_15] : memref<16x96xbf16, #tpu.memory_space<vmem>>, vector<16x96xbf16>
      tpu.vector_store %arg6[%c0_14, %c0_15], %17 {strides = array<i32>} : memref<16x96xbf16, #tpu.memory_space<vmem>>, vector<16x96xbf16>,
    } else {
    }
    return
  }
  func.func @transform_0(%arg0: i32, %arg1: i32, %arg2: i32) -> (i32, i32) {
    %c0_i32 = arith.constant 0 : i32
    return %arg0, %arg2 : i32, i32
  }
  func.func @transform_1(%arg0: i32, %arg1: i32, %arg2: i32) -> (i32, i32) {
    %c0_i32 = arith.constant 0 : i32
    return %arg2, %arg1 : i32, i32
  }
  func.func @transform_2(%arg0: i32, %arg1: i32, %arg2: i32) -> (i32, i32) {
    %c0_i32 = arith.constant 0 : i32
    %c0_i32_0 = arith.constant 0 : i32
    return %c0_i32, %arg1 : i32, i32
  }
  func.func @transform_3(%arg0: i32, %arg1: i32, %arg2: i32) -> (i32, i32) {
    %c0_i32 = arith.constant 0 : i32
    return %arg0, %arg1 : i32, i32
  }
}

module attributes {stable_mosaic.version = 11 : i64} {
  func.func @kernel(%arg0: i32, %arg1: i32, %arg2: memref<1x8x32xbf16, #tpu.memory_space<vmem>>, %arg3: memref<1x8x32xbf16, #tpu.memory_space<vmem>>, %arg4: memref<1x8x32xbf16, #tpu.memory_space<vmem>>, %arg5: memref<1x1x8xf32, #tpu.memory_space<vmem>>, %arg6: memref<32x32xbf16, #tpu.memory_space<vmem>>, %arg7: memref<1x32xf32, #tpu.memory_space<vmem>>, %arg8: memref<1x8x32xf32, #tpu.memory_space<vmem>>, %arg9: memref<1x32xf32, #tpu.memory_space<vmem>>, %arg10: memref<1x32xf32, #tpu.memory_space<vmem>>, %arg11: memref<1x8x32xf32, #tpu.memory_space<vmem>>, %arg12: memref<1x4x8x8xf32, #tpu.memory_space<vmem>>, %arg13: memref<8x32xf32, #tpu.memory_space<vmem>>) attributes {dimension_semantics = [#tpu.dimension_semantics<parallel>, #tpu.dimension_semantics<parallel>], iteration_bounds = array<i64: 2, 1>, scalar_prefetch = 0 : i64, scratch_operands = 1 : i64, tpu.core_type = #tpu.core_type<tc>, window_params = [{transform_indices = @transform_0, window_bounds = array<i64: 1, 8, 32>}, {transform_indices = @transform_1, window_bounds = array<i64: 1, 8, 32>}, {transform_indices = @transform_2, window_bounds = array<i64: 1, 8, 32>}, {transform_indices = @transform_3, window_bounds = array<i64: 1, 1, 8>}, {pipeline_mode = #tpu.pipeline_mode<synchronous>, transform_indices = @transform_4, window_bounds = array<i64: 32, 32>}, {pipeline_mode = #tpu.pipeline_mode<synchronous>, transform_indices = @transform_5, window_bounds = array<i64: 1, 32>}, {transform_indices = @transform_6, window_bounds = array<i64: 1, 8, 32>}, {pipeline_mode = #tpu.pipeline_mode<synchronous>, transform_indices = @transform_7, window_bounds = array<i64: 1, 32>}, {pipeline_mode = #tpu.pipeline_mode<synchronous>, transform_indices = @transform_8, window_bounds = array<i64: 1, 32>}, {transform_indices = @transform_9, window_bounds = array<i64: 1, 8, 32>}, {transform_indices = @transform_10, window_bounds = array<i64: 1, 4, 8, 8>}]} {
    %c0 = arith.constant 0 : index
    %c0_0 = arith.constant 0 : index
    %c0_1 = arith.constant 0 : index
    %0 = vector.load %arg5[%c0, %c0_0, %c0_1] : memref<1x1x8xf32, #tpu.memory_space<vmem>>, vector<1x1x8xf32>
    %1 = vector.shape_cast %0 : vector<1x1x8xf32> to vector<1x8xf32>
    %2 = vector.shape_cast %1 : vector<1x8xf32> to vector<1x8xf32>
    %3 = vector.broadcast %2 : vector<1x8xf32> to vector<8x8xf32>
    %cst = arith.constant -1.000000e+09 : f32
    %4 = vector.broadcast %cst : f32 to vector<8x8xf32>
    %5 = arith.mulf %3, %4 : vector<8x8xf32>
    %c0_2 = arith.constant 0 : index
    %c0_3 = arith.constant 0 : index
    %c0_4 = arith.constant 0 : index
    %6 = vector.load %arg2[%c0_2, %c0_3, %c0_4] : memref<1x8x32xbf16, #tpu.memory_space<vmem>>, vector<1x8x8xbf16>
    %7 = vector.shape_cast %6 : vector<1x8x8xbf16> to vector<8x8xbf16>
    %c0_5 = arith.constant 0 : index
    %c0_6 = arith.constant 0 : index
    %c0_7 = arith.constant 0 : index
    %8 = vector.load %arg3[%c0_5, %c0_6, %c0_7] : memref<1x8x32xbf16, #tpu.memory_space<vmem>>, vector<1x8x8xbf16>
    %9 = vector.shape_cast %8 : vector<1x8x8xbf16> to vector<8x8xbf16>
    %c0_8 = arith.constant 0 : index
    %c0_9 = arith.constant 0 : index
    %c0_10 = arith.constant 0 : index
    %10 = vector.load %arg4[%c0_8, %c0_9, %c0_10] : memref<1x8x32xbf16, #tpu.memory_space<vmem>>, vector<1x8x8xbf16>
    %11 = vector.shape_cast %10 : vector<1x8x8xbf16> to vector<8x8xbf16>
    %cst_11 = arith.constant dense<0.000000e+00> : vector<8x8xf32>
    %12 = tpu.matmul %7, %9, %cst_11 {dimension_numbers = #tpu.dot_dimension_numbers<[1], [1], [0], [0], [0, 0, 1, 0], [], []>} : vector<8x8xbf16>, vector<8x8xbf16>, vector<8x8xf32> -> vector<8x8xf32>
    %cst_12 = arith.constant 0.353553385 : f32
    %13 = vector.broadcast %cst_12 : f32 to vector<8x8xf32>
    %14 = arith.mulf %12, %13 : vector<8x8xf32>
    %15 = arith.addf %14, %5 : vector<8x8xf32>
    %cst_13 = arith.constant dense<0xFF800000> : vector<8xf32>
    %16 = vector.multi_reduction <maximumf>, %15, %cst_13 [1] : vector<8x8xf32> to vector<8xf32>
    %17 = vector.shape_cast %16 : vector<8xf32> to vector<8x1xf32>
    %18 = vector.broadcast %17 : vector<8x1xf32> to vector<8x8xf32>
    %19 = arith.subf %15, %18 : vector<8x8xf32>
    %20 = math.exp %19 : vector<8x8xf32>
    %cst_14 = arith.constant dense<0.000000e+00> : vector<8xf32>
    %21 = vector.multi_reduction <add>, %20, %cst_14 [1] : vector<8x8xf32> to vector<8xf32>
    %22 = vector.shape_cast %21 : vector<8xf32> to vector<8x1xf32>
    %23 = tpu.reciprocal %22 {approx = true} : vector<8x1xf32> -> vector<8x1xf32>
    %24 = vector.broadcast %23 : vector<8x1xf32> to vector<8x8xf32>
    %25 = arith.mulf %20, %24 : vector<8x8xf32>
    %c0_15 = arith.constant 0 : index
    %c0_16 = arith.constant 0 : index
    %c0_17 = arith.constant 0 : index
    %c0_18 = arith.constant 0 : index
    %26 = vector.load %arg12[%c0_15, %c0_16, %c0_17, %c0_18] : memref<1x4x8x8xf32, #tpu.memory_space<vmem>>, vector<1x1x8x8xf32>
    %27 = vector.shape_cast %26 : vector<1x1x8x8xf32> to vector<8x8xf32>
    %28 = vector.shape_cast %25 : vector<8x8xf32> to vector<1x1x8x8xf32>
    tpu.vector_store %arg12[%c0_15, %c0_16, %c0_17, %c0_18], %28 {strides = array<i32>} : memref<1x4x8x8xf32, #tpu.memory_space<vmem>>, vector<1x1x8x8xf32>,
    %29 = arith.truncf %25 : vector<8x8xf32> to vector<8x8xbf16>
    %cst_19 = arith.constant dense<0.000000e+00> : vector<8x8xf32>
    %30 = tpu.matmul %29, %11, %cst_19 {dimension_numbers = #tpu.dot_dimension_numbers<[1], [0], [0], [1], [0, 0, 1, 1], [], []>} : vector<8x8xbf16>, vector<8x8xbf16>, vector<8x8xf32> -> vector<8x8xf32>
    %c0_20 = arith.constant 0 : index
    %c0_21 = arith.constant 0 : index
    %31 = vector.load %arg13[%c0_20, %c0_21] : memref<8x32xf32, #tpu.memory_space<vmem>>, vector<8x8xf32>
    tpu.vector_store %arg13[%c0_20, %c0_21], %30 {strides = array<i32>} : memref<8x32xf32, #tpu.memory_space<vmem>>, vector<8x8xf32>,
    %c0_22 = arith.constant 0 : index
    %c0_23 = arith.constant 0 : index
    %c8 = arith.constant 8 : index
    %32 = vector.load %arg2[%c0_22, %c0_23, %c8] : memref<1x8x32xbf16, #tpu.memory_space<vmem>>, vector<1x8x8xbf16>
    %33 = vector.shape_cast %32 : vector<1x8x8xbf16> to vector<8x8xbf16>
    %c0_24 = arith.constant 0 : index
    %c0_25 = arith.constant 0 : index
    %c8_26 = arith.constant 8 : index
    %34 = vector.load %arg3[%c0_24, %c0_25, %c8_26] : memref<1x8x32xbf16, #tpu.memory_space<vmem>>, vector<1x8x8xbf16>
    %35 = vector.shape_cast %34 : vector<1x8x8xbf16> to vector<8x8xbf16>
    %c0_27 = arith.constant 0 : index
    %c0_28 = arith.constant 0 : index
    %c8_29 = arith.constant 8 : index
    %36 = vector.load %arg4[%c0_27, %c0_28, %c8_29] : memref<1x8x32xbf16, #tpu.memory_space<vmem>>, vector<1x8x8xbf16>
    %37 = vector.shape_cast %36 : vector<1x8x8xbf16> to vector<8x8xbf16>
    %cst_30 = arith.constant dense<0.000000e+00> : vector<8x8xf32>
    %38 = tpu.matmul %33, %35, %cst_30 {dimension_numbers = #tpu.dot_dimension_numbers<[1], [1], [0], [0], [0, 0, 1, 0], [], []>} : vector<8x8xbf16>, vector<8x8xbf16>, vector<8x8xf32> -> vector<8x8xf32>
    %cst_31 = arith.constant 0.353553385 : f32
    %39 = vector.broadcast %cst_31 : f32 to vector<8x8xf32>
    %40 = arith.mulf %38, %39 : vector<8x8xf32>
    %41 = arith.addf %40, %5 : vector<8x8xf32>
    %cst_32 = arith.constant dense<0xFF800000> : vector<8xf32>
    %42 = vector.multi_reduction <maximumf>, %41, %cst_32 [1] : vector<8x8xf32> to vector<8xf32>
    %43 = vector.shape_cast %42 : vector<8xf32> to vector<8x1xf32>
    %44 = vector.broadcast %43 : vector<8x1xf32> to vector<8x8xf32>
    %45 = arith.subf %41, %44 : vector<8x8xf32>
    %46 = math.exp %45 : vector<8x8xf32>
    %cst_33 = arith.constant dense<0.000000e+00> : vector<8xf32>
    %47 = vector.multi_reduction <add>, %46, %cst_33 [1] : vector<8x8xf32> to vector<8xf32>
    %48 = vector.shape_cast %47 : vector<8xf32> to vector<8x1xf32>
    %49 = tpu.reciprocal %48 {approx = true} : vector<8x1xf32> -> vector<8x1xf32>
    %50 = vector.broadcast %49 : vector<8x1xf32> to vector<8x8xf32>
    %51 = arith.mulf %46, %50 : vector<8x8xf32>
    %c0_34 = arith.constant 0 : index
    %c1 = arith.constant 1 : index
    %c0_35 = arith.constant 0 : index
    %c0_36 = arith.constant 0 : index
    %52 = vector.load %arg12[%c0_34, %c1, %c0_35, %c0_36] : memref<1x4x8x8xf32, #tpu.memory_space<vmem>>, vector<1x1x8x8xf32>
    %53 = vector.shape_cast %52 : vector<1x1x8x8xf32> to vector<8x8xf32>
    %54 = vector.shape_cast %51 : vector<8x8xf32> to vector<1x1x8x8xf32>
    tpu.vector_store %arg12[%c0_34, %c1, %c0_35, %c0_36], %54 {strides = array<i32>} : memref<1x4x8x8xf32, #tpu.memory_space<vmem>>, vector<1x1x8x8xf32>,
    %55 = arith.truncf %51 : vector<8x8xf32> to vector<8x8xbf16>
    %cst_37 = arith.constant dense<0.000000e+00> : vector<8x8xf32>
    %56 = tpu.matmul %55, %37, %cst_37 {dimension_numbers = #tpu.dot_dimension_numbers<[1], [0], [0], [1], [0, 0, 1, 1], [], []>} : vector<8x8xbf16>, vector<8x8xbf16>, vector<8x8xf32> -> vector<8x8xf32>
    %c0_38 = arith.constant 0 : index
    %c8_39 = arith.constant 8 : index
    %57 = vector.load %arg13[%c0_38, %c8_39] : memref<8x32xf32, #tpu.memory_space<vmem>>, vector<8x8xf32>
    tpu.vector_store %arg13[%c0_38, %c8_39], %56 {strides = array<i32>} : memref<8x32xf32, #tpu.memory_space<vmem>>, vector<8x8xf32>,
    %c0_40 = arith.constant 0 : index
    %c0_41 = arith.constant 0 : index
    %c16 = arith.constant 16 : index
    %58 = vector.load %arg2[%c0_40, %c0_41, %c16] : memref<1x8x32xbf16, #tpu.memory_space<vmem>>, vector<1x8x8xbf16>
    %59 = vector.shape_cast %58 : vector<1x8x8xbf16> to vector<8x8xbf16>
    %c0_42 = arith.constant 0 : index
    %c0_43 = arith.constant 0 : index
    %c16_44 = arith.constant 16 : index
    %60 = vector.load %arg3[%c0_42, %c0_43, %c16_44] : memref<1x8x32xbf16, #tpu.memory_space<vmem>>, vector<1x8x8xbf16>
    %61 = vector.shape_cast %60 : vector<1x8x8xbf16> to vector<8x8xbf16>
    %c0_45 = arith.constant 0 : index
    %c0_46 = arith.constant 0 : index
    %c16_47 = arith.constant 16 : index
    %62 = vector.load %arg4[%c0_45, %c0_46, %c16_47] : memref<1x8x32xbf16, #tpu.memory_space<vmem>>, vector<1x8x8xbf16>
    %63 = vector.shape_cast %62 : vector<1x8x8xbf16> to vector<8x8xbf16>
    %cst_48 = arith.constant dense<0.000000e+00> : vector<8x8xf32>
    %64 = tpu.matmul %59, %61, %cst_48 {dimension_numbers = #tpu.dot_dimension_numbers<[1], [1], [0], [0], [0, 0, 1, 0], [], []>} : vector<8x8xbf16>, vector<8x8xbf16>, vector<8x8xf32> -> vector<8x8xf32>
    %cst_49 = arith.constant 0.353553385 : f32
    %65 = vector.broadcast %cst_49 : f32 to vector<8x8xf32>
    %66 = arith.mulf %64, %65 : vector<8x8xf32>
    %67 = arith.addf %66, %5 : vector<8x8xf32>
    %cst_50 = arith.constant dense<0xFF800000> : vector<8xf32>
    %68 = vector.multi_reduction <maximumf>, %67, %cst_50 [1] : vector<8x8xf32> to vector<8xf32>
    %69 = vector.shape_cast %68 : vector<8xf32> to vector<8x1xf32>
    %70 = vector.broadcast %69 : vector<8x1xf32> to vector<8x8xf32>
    %71 = arith.subf %67, %70 : vector<8x8xf32>
    %72 = math.exp %71 : vector<8x8xf32>
    %cst_51 = arith.constant dense<0.000000e+00> : vector<8xf32>
    %73 = vector.multi_reduction <add>, %72, %cst_51 [1] : vector<8x8xf32> to vector<8xf32>
    %74 = vector.shape_cast %73 : vector<8xf32> to vector<8x1xf32>
    %75 = tpu.reciprocal %74 {approx = true} : vector<8x1xf32> -> vector<8x1xf32>
    %76 = vector.broadcast %75 : vector<8x1xf32> to vector<8x8xf32>
    %77 = arith.mulf %72, %76 : vector<8x8xf32>
    %c0_52 = arith.constant 0 : index
    %c2 = arith.constant 2 : index
    %c0_53 = arith.constant 0 : index
    %c0_54 = arith.constant 0 : index
    %78 = vector.load %arg12[%c0_52, %c2, %c0_53, %c0_54] : memref<1x4x8x8xf32, #tpu.memory_space<vmem>>, vector<1x1x8x8xf32>
    %79 = vector.shape_cast %78 : vector<1x1x8x8xf32> to vector<8x8xf32>
    %80 = vector.shape_cast %77 : vector<8x8xf32> to vector<1x1x8x8xf32>
    tpu.vector_store %arg12[%c0_52, %c2, %c0_53, %c0_54], %80 {strides = array<i32>} : memref<1x4x8x8xf32, #tpu.memory_space<vmem>>, vector<1x1x8x8xf32>,
    %81 = arith.truncf %77 : vector<8x8xf32> to vector<8x8xbf16>
    %cst_55 = arith.constant dense<0.000000e+00> : vector<8x8xf32>
    %82 = tpu.matmul %81, %63, %cst_55 {dimension_numbers = #tpu.dot_dimension_numbers<[1], [0], [0], [1], [0, 0, 1, 1], [], []>} : vector<8x8xbf16>, vector<8x8xbf16>, vector<8x8xf32> -> vector<8x8xf32>
    %c0_56 = arith.constant 0 : index
    %c16_57 = arith.constant 16 : index
    %83 = vector.load %arg13[%c0_56, %c16_57] : memref<8x32xf32, #tpu.memory_space<vmem>>, vector<8x8xf32>
    tpu.vector_store %arg13[%c0_56, %c16_57], %82 {strides = array<i32>} : memref<8x32xf32, #tpu.memory_space<vmem>>, vector<8x8xf32>,
    %c0_58 = arith.constant 0 : index
    %c0_59 = arith.constant 0 : index
    %c24 = arith.constant 24 : index
    %84 = vector.load %arg2[%c0_58, %c0_59, %c24] : memref<1x8x32xbf16, #tpu.memory_space<vmem>>, vector<1x8x8xbf16>
    %85 = vector.shape_cast %84 : vector<1x8x8xbf16> to vector<8x8xbf16>
    %c0_60 = arith.constant 0 : index
    %c0_61 = arith.constant 0 : index
    %c24_62 = arith.constant 24 : index
    %86 = vector.load %arg3[%c0_60, %c0_61, %c24_62] : memref<1x8x32xbf16, #tpu.memory_space<vmem>>, vector<1x8x8xbf16>
    %87 = vector.shape_cast %86 : vector<1x8x8xbf16> to vector<8x8xbf16>
    %c0_63 = arith.constant 0 : index
    %c0_64 = arith.constant 0 : index
    %c24_65 = arith.constant 24 : index
    %88 = vector.load %arg4[%c0_63, %c0_64, %c24_65] : memref<1x8x32xbf16, #tpu.memory_space<vmem>>, vector<1x8x8xbf16>
    %89 = vector.shape_cast %88 : vector<1x8x8xbf16> to vector<8x8xbf16>
    %cst_66 = arith.constant dense<0.000000e+00> : vector<8x8xf32>
    %90 = tpu.matmul %85, %87, %cst_66 {dimension_numbers = #tpu.dot_dimension_numbers<[1], [1], [0], [0], [0, 0, 1, 0], [], []>} : vector<8x8xbf16>, vector<8x8xbf16>, vector<8x8xf32> -> vector<8x8xf32>
    %cst_67 = arith.constant 0.353553385 : f32
    %91 = vector.broadcast %cst_67 : f32 to vector<8x8xf32>
    %92 = arith.mulf %90, %91 : vector<8x8xf32>
    %93 = arith.addf %92, %5 : vector<8x8xf32>
    %cst_68 = arith.constant dense<0xFF800000> : vector<8xf32>
    %94 = vector.multi_reduction <maximumf>, %93, %cst_68 [1] : vector<8x8xf32> to vector<8xf32>
    %95 = vector.shape_cast %94 : vector<8xf32> to vector<8x1xf32>
    %96 = vector.broadcast %95 : vector<8x1xf32> to vector<8x8xf32>
    %97 = arith.subf %93, %96 : vector<8x8xf32>
    %98 = math.exp %97 : vector<8x8xf32>
    %cst_69 = arith.constant dense<0.000000e+00> : vector<8xf32>
    %99 = vector.multi_reduction <add>, %98, %cst_69 [1] : vector<8x8xf32> to vector<8xf32>
    %100 = vector.shape_cast %99 : vector<8xf32> to vector<8x1xf32>
    %101 = tpu.reciprocal %100 {approx = true} : vector<8x1xf32> -> vector<8x1xf32>
    %102 = vector.broadcast %101 : vector<8x1xf32> to vector<8x8xf32>
    %103 = arith.mulf %98, %102 : vector<8x8xf32>
    %c0_70 = arith.constant 0 : index
    %c3 = arith.constant 3 : index
    %c0_71 = arith.constant 0 : index
    %c0_72 = arith.constant 0 : index
    %104 = vector.load %arg12[%c0_70, %c3, %c0_71, %c0_72] : memref<1x4x8x8xf32, #tpu.memory_space<vmem>>, vector<1x1x8x8xf32>
    %105 = vector.shape_cast %104 : vector<1x1x8x8xf32> to vector<8x8xf32>
    %106 = vector.shape_cast %103 : vector<8x8xf32> to vector<1x1x8x8xf32>
    tpu.vector_store %arg12[%c0_70, %c3, %c0_71, %c0_72], %106 {strides = array<i32>} : memref<1x4x8x8xf32, #tpu.memory_space<vmem>>, vector<1x1x8x8xf32>,
    %107 = arith.truncf %103 : vector<8x8xf32> to vector<8x8xbf16>
    %cst_73 = arith.constant dense<0.000000e+00> : vector<8x8xf32>
    %108 = tpu.matmul %107, %89, %cst_73 {dimension_numbers = #tpu.dot_dimension_numbers<[1], [0], [0], [1], [0, 0, 1, 1], [], []>} : vector<8x8xbf16>, vector<8x8xbf16>, vector<8x8xf32> -> vector<8x8xf32>
    %c0_74 = arith.constant 0 : index
    %c24_75 = arith.constant 24 : index
    %109 = vector.load %arg13[%c0_74, %c24_75] : memref<8x32xf32, #tpu.memory_space<vmem>>, vector<8x8xf32>
    tpu.vector_store %arg13[%c0_74, %c24_75], %108 {strides = array<i32>} : memref<8x32xf32, #tpu.memory_space<vmem>>, vector<8x8xf32>,
    %c0_76 = arith.constant 0 : index
    %c0_77 = arith.constant 0 : index
    %110 = vector.load %arg13[%c0_76, %c0_77] : memref<8x32xf32, #tpu.memory_space<vmem>>, vector<8x32xf32>
    %111 = arith.truncf %110 : vector<8x32xf32> to vector<8x32xbf16>
    %c0_78 = arith.constant 0 : index
    %c0_79 = arith.constant 0 : index
    %112 = vector.load %arg6[%c0_78, %c0_79] : memref<32x32xbf16, #tpu.memory_space<vmem>>, vector<32x32xbf16>
    %cst_80 = arith.constant dense<0.000000e+00> : vector<8x32xf32>
    %113 = tpu.matmul %111, %112, %cst_80 {dimension_numbers = #tpu.dot_dimension_numbers<[1], [0], [0], [1], [0, 0, 1, 1], [], []>} : vector<8x32xbf16>, vector<32x32xbf16>, vector<8x32xf32> -> vector<8x32xf32>
    %c0_81 = arith.constant 0 : index
    %c0_82 = arith.constant 0 : index
    %114 = vector.load %arg7[%c0_81, %c0_82] : memref<1x32xf32, #tpu.memory_space<vmem>>, vector<1x32xf32>
    %115 = vector.broadcast %114 : vector<1x32xf32> to vector<8x32xf32>
    %116 = arith.addf %113, %115 : vector<8x32xf32>
    %c0_83 = arith.constant 0 : index
    %c0_84 = arith.constant 0 : index
    %c0_85 = arith.constant 0 : index
    %117 = vector.load %arg8[%c0_83, %c0_84, %c0_85] : memref<1x8x32xf32, #tpu.memory_space<vmem>>, vector<1x8x32xf32>
    %118 = vector.shape_cast %117 : vector<1x8x32xf32> to vector<8x32xf32>
    %119 = arith.addf %118, %116 : vector<8x32xf32>
    %cst_86 = arith.constant dense<0.000000e+00> : vector<8xf32>
    %120 = vector.multi_reduction <add>, %119, %cst_86 [1] : vector<8x32xf32> to vector<8xf32>
    %121 = vector.shape_cast %120 : vector<8xf32> to vector<8x1xf32>
    %cst_87 = arith.constant 3.200000e+01 : f32
    %122 = vector.broadcast %cst_87 : f32 to vector<8x1xf32>
    %123 = arith.divf %121, %122 : vector<8x1xf32>
    %124 = vector.broadcast %123 : vector<8x1xf32> to vector<8x32xf32>
    %125 = arith.subf %119, %124 : vector<8x32xf32>
    %126 = arith.mulf %125, %125 : vector<8x32xf32>
    %cst_88 = arith.constant dense<0.000000e+00> : vector<8xf32>
    %127 = vector.multi_reduction <add>, %126, %cst_88 [1] : vector<8x32xf32> to vector<8xf32>
    %128 = vector.shape_cast %127 : vector<8xf32> to vector<8x1xf32>
    %cst_89 = arith.constant 3.200000e+01 : f32
    %129 = vector.broadcast %cst_89 : f32 to vector<8x1xf32>
    %130 = arith.divf %128, %129 : vector<8x1xf32>
    %131 = vector.broadcast %123 : vector<8x1xf32> to vector<8x32xf32>
    %132 = arith.subf %119, %131 : vector<8x32xf32>
    %cst_90 = arith.constant 9.99999974E-6 : f32
    %133 = vector.broadcast %cst_90 : f32 to vector<8x1xf32>
    %134 = arith.addf %130, %133 : vector<8x1xf32>
    %135 = math.rsqrt %134 : vector<8x1xf32>
    %136 = vector.broadcast %135 : vector<8x1xf32> to vector<8x32xf32>
    %137 = arith.mulf %132, %136 : vector<8x32xf32>
    %c0_91 = arith.constant 0 : index
    %c0_92 = arith.constant 0 : index
    %138 = vector.load %arg9[%c0_91, %c0_92] : memref<1x32xf32, #tpu.memory_space<vmem>>, vector<1x32xf32>
    %139 = vector.broadcast %138 : vector<1x32xf32> to vector<8x32xf32>
    %140 = arith.mulf %137, %139 : vector<8x32xf32>
    %c0_93 = arith.constant 0 : index
    %c0_94 = arith.constant 0 : index
    %141 = vector.load %arg10[%c0_93, %c0_94] : memref<1x32xf32, #tpu.memory_space<vmem>>, vector<1x32xf32>
    %142 = vector.broadcast %141 : vector<1x32xf32> to vector<8x32xf32>
    %143 = arith.addf %140, %142 : vector<8x32xf32>
    %c0_95 = arith.constant 0 : index
    %c0_96 = arith.constant 0 : index
    %c0_97 = arith.constant 0 : index
    %144 = vector.load %arg11[%c0_95, %c0_96, %c0_97] : memref<1x8x32xf32, #tpu.memory_space<vmem>>, vector<1x8x32xf32>
    %145 = vector.shape_cast %144 : vector<1x8x32xf32> to vector<8x32xf32>
    %146 = vector.shape_cast %143 : vector<8x32xf32> to vector<1x8x32xf32>
    tpu.vector_store %arg11[%c0_95, %c0_96, %c0_97], %146 {strides = array<i32>} : memref<1x8x32xf32, #tpu.memory_space<vmem>>, vector<1x8x32xf32>,
    return
  }
  func.func @transform_0(%arg0: i32, %arg1: i32) -> (i32, i32, i32) {
    %c0_i32 = arith.constant 0 : i32
    %c0_i32_0 = arith.constant 0 : i32
    return %arg0, %arg1, %c0_i32 : i32, i32, i32
  }
  func.func @transform_1(%arg0: i32, %arg1: i32) -> (i32, i32, i32) {
    %c0_i32 = arith.constant 0 : i32
    %c0_i32_0 = arith.constant 0 : i32
    %c0_i32_1 = arith.constant 0 : i32
    return %arg0, %c0_i32, %c0_i32_0 : i32, i32, i32
  }
  func.func @transform_2(%arg0: i32, %arg1: i32) -> (i32, i32, i32) {
    %c0_i32 = arith.constant 0 : i32
    %c0_i32_0 = arith.constant 0 : i32
    %c0_i32_1 = arith.constant 0 : i32
    return %arg0, %c0_i32, %c0_i32_0 : i32, i32, i32
  }
  func.func @transform_3(%arg0: i32, %arg1: i32) -> (i32, i32, i32) {
    %c0_i32 = arith.constant 0 : i32
    %c0_i32_0 = arith.constant 0 : i32
    %c0_i32_1 = arith.constant 0 : i32
    return %arg0, %c0_i32, %c0_i32_0 : i32, i32, i32
  }
  func.func @transform_4(%arg0: i32, %arg1: i32) -> (i32, i32) {
    %c0_i32 = arith.constant 0 : i32
    %c0_i32_0 = arith.constant 0 : i32
    %c0_i32_1 = arith.constant 0 : i32
    return %c0_i32, %c0_i32_0 : i32, i32
  }
  func.func @transform_5(%arg0: i32, %arg1: i32) -> (i32, i32) {
    %c0_i32 = arith.constant 0 : i32
    %c0_i32_0 = arith.constant 0 : i32
    %c0_i32_1 = arith.constant 0 : i32
    return %c0_i32, %c0_i32_0 : i32, i32
  }
  func.func @transform_6(%arg0: i32, %arg1: i32) -> (i32, i32, i32) {
    %c0_i32 = arith.constant 0 : i32
    %c0_i32_0 = arith.constant 0 : i32
    return %arg0, %arg1, %c0_i32 : i32, i32, i32
  }
  func.func @transform_7(%arg0: i32, %arg1: i32) -> (i32, i32) {
    %c0_i32 = arith.constant 0 : i32
    %c0_i32_0 = arith.constant 0 : i32
    %c0_i32_1 = arith.constant 0 : i32
    return %c0_i32, %c0_i32_0 : i32, i32
  }
  func.func @transform_8(%arg0: i32, %arg1: i32) -> (i32, i32) {
    %c0_i32 = arith.constant 0 : i32
    %c0_i32_0 = arith.constant 0 : i32
    %c0_i32_1 = arith.constant 0 : i32
    return %c0_i32, %c0_i32_0 : i32, i32
  }
  func.func @transform_9(%arg0: i32, %arg1: i32) -> (i32, i32, i32) {
    %c0_i32 = arith.constant 0 : i32
    %c0_i32_0 = arith.constant 0 : i32
    return %arg0, %arg1, %c0_i32 : i32, i32, i32
  }
  func.func @transform_10(%arg0: i32, %arg1: i32) -> (i32, i32, i32, i32) {
    %c0_i32 = arith.constant 0 : i32
    %c0_i32_0 = arith.constant 0 : i32
    %c0_i32_1 = arith.constant 0 : i32
    return %arg0, %c0_i32, %arg1, %c0_i32_0 : i32, i32, i32, i32
  }
}

module attributes {stable_mosaic.version = 11 : i64} {
  func.func @_ffn_add_ln_kernel(%arg0: i32, %arg1: i32, %arg2: memref<16x32xf32, #tpu.memory_space<vmem>>, %arg3: memref<32x64xbf16, #tpu.memory_space<vmem>>, %arg4: memref<1x64xf32, #tpu.memory_space<vmem>>, %arg5: memref<64x32xbf16, #tpu.memory_space<vmem>>, %arg6: memref<1x32xf32, #tpu.memory_space<vmem>>, %arg7: memref<1x32xf32, #tpu.memory_space<vmem>>, %arg8: memref<1x32xf32, #tpu.memory_space<vmem>>, %arg9: memref<16x32xf32, #tpu.memory_space<vmem>>, %arg10: memref<16x32xf32, #tpu.memory_space<vmem>>) attributes {dimension_semantics = [#tpu.dimension_semantics<parallel>, #tpu.dimension_semantics<arbitrary>], iteration_bounds = array<i64: 1, 1>, scalar_prefetch = 0 : i64, scratch_operands = 1 : i64, tpu.core_type = #tpu.core_type<tc>, window_params = [{transform_indices = @transform_0, window_bounds = array<i64: 16, 32>}, {transform_indices = @transform_1, window_bounds = array<i64: 32, 64>}, {transform_indices = @transform_2, window_bounds = array<i64: 1, 64>}, {transform_indices = @transform_3, window_bounds = array<i64: 64, 32>}, {pipeline_mode = #tpu.pipeline_mode<synchronous>, transform_indices = @transform_4, window_bounds = array<i64: 1, 32>}, {pipeline_mode = #tpu.pipeline_mode<synchronous>, transform_indices = @transform_5, window_bounds = array<i64: 1, 32>}, {pipeline_mode = #tpu.pipeline_mode<synchronous>, transform_indices = @transform_6, window_bounds = array<i64: 1, 32>}, {transform_indices = @transform_7, window_bounds = array<i64: 16, 32>}]} {
    %c0_i32 = arith.constant 0 : i32
    %0 = arith.cmpi eq, %arg1, %c0_i32 : i32
    %1 = arith.extui %0 : i1 to i32
    %c0_i32_0 = arith.constant 0 : i32
    %2 = arith.cmpi ne, %1, %c0_i32_0 : i32
    scf.if %2 {
      %cst_16 = arith.constant 0.000000e+00 : f32
      %21 = vector.broadcast %cst_16 : f32 to vector<16x32xf32>
      %c0_17 = arith.constant 0 : index
      %c0_18 = arith.constant 0 : index
      %22 = vector.load %arg10[%c0_17, %c0_18] : memref<16x32xf32, #tpu.memory_space<vmem>>, vector<16x32xf32>
      tpu.vector_store %arg10[%c0_17, %c0_18], %21 {strides = array<i32>} : memref<16x32xf32, #tpu.memory_space<vmem>>, vector<16x32xf32>,
    } else {
    }
    %c0 = arith.constant 0 : index
    %c0_1 = arith.constant 0 : index
    %3 = vector.load %arg2[%c0, %c0_1] : memref<16x32xf32, #tpu.memory_space<vmem>>, vector<16x32xf32>
    %4 = arith.truncf %3 : vector<16x32xf32> to vector<16x32xbf16>
    %c0_2 = arith.constant 0 : index
    %c0_3 = arith.constant 0 : index
    %5 = vector.load %arg3[%c0_2, %c0_3] : memref<32x64xbf16, #tpu.memory_space<vmem>>, vector<32x64xbf16>
    %cst = arith.constant dense<0.000000e+00> : vector<16x64xf32>
    %6 = tpu.matmul %4, %5, %cst {dimension_numbers = #tpu.dot_dimension_numbers<[1], [0], [0], [1], [0, 0, 1, 1], [], []>} : vector<16x32xbf16>, vector<32x64xbf16>, vector<16x64xf32> -> vector<16x64xf32>
    %c0_4 = arith.constant 0 : index
    %c0_5 = arith.constant 0 : index
    %7 = vector.load %arg4[%c0_4, %c0_5] : memref<1x64xf32, #tpu.memory_space<vmem>>, vector<1x64xf32>
    %8 = vector.broadcast %7 : vector<1x64xf32> to vector<16x64xf32>
    %9 = arith.addf %6, %8 : vector<16x64xf32>
    %cst_6 = arith.constant 0.000000e+00 : f32
    %10 = vector.broadcast %cst_6 : f32 to vector<16x64xf32>
    %11 = arith.maximumf %9, %10 : vector<16x64xf32>
    %c0_7 = arith.constant 0 : index
    %c0_8 = arith.constant 0 : index
    %12 = vector.load %arg10[%c0_7, %c0_8] : memref<16x32xf32, #tpu.memory_space<vmem>>, vector<16x32xf32>
    %13 = arith.truncf %11 : vector<16x64xf32> to vector<16x64xbf16>
    %c0_9 = arith.constant 0 : index
    %c0_10 = arith.constant 0 : index
    %14 = vector.load %arg5[%c0_9, %c0_10] : memref<64x32xbf16, #tpu.memory_space<vmem>>, vector<64x32xbf16>
    %cst_11 = arith.constant dense<0.000000e+00> : vector<16x32xf32>
    %15 = tpu.matmul %13, %14, %cst_11 {dimension_numbers = #tpu.dot_dimension_numbers<[1], [0], [0], [1], [0, 0, 1, 1], [], []>} : vector<16x64xbf16>, vector<64x32xbf16>, vector<16x32xf32> -> vector<16x32xf32>
    %16 = arith.addf %12, %15 : vector<16x32xf32>
    %c0_12 = arith.constant 0 : index
    %c0_13 = arith.constant 0 : index
    %17 = vector.load %arg10[%c0_12, %c0_13] : memref<16x32xf32, #tpu.memory_space<vmem>>, vector<16x32xf32>
    tpu.vector_store %arg10[%c0_12, %c0_13], %16 {strides = array<i32>} : memref<16x32xf32, #tpu.memory_space<vmem>>, vector<16x32xf32>,
    %c0_i32_14 = arith.constant 0 : i32
    %18 = arith.cmpi eq, %arg1, %c0_i32_14 : i32
    %19 = arith.extui %18 : i1 to i32
    %c0_i32_15 = arith.constant 0 : i32
    %20 = arith.cmpi ne, %19, %c0_i32_15 : i32
    scf.if %20 {
      %c0_16 = arith.constant 0 : index
      %c0_17 = arith.constant 0 : index
      %21 = vector.load %arg10[%c0_16, %c0_17] : memref<16x32xf32, #tpu.memory_space<vmem>>, vector<16x32xf32>
      %22 = arith.addf %3, %21 : vector<16x32xf32>
      %c0_18 = arith.constant 0 : index
      %c0_19 = arith.constant 0 : index
      %23 = vector.load %arg6[%c0_18, %c0_19] : memref<1x32xf32, #tpu.memory_space<vmem>>, vector<1x32xf32>
      %24 = vector.broadcast %23 : vector<1x32xf32> to vector<16x32xf32>
      %25 = arith.addf %22, %24 : vector<16x32xf32>
      %cst_20 = arith.constant dense<0.000000e+00> : vector<16xf32>
      %26 = vector.multi_reduction <add>, %25, %cst_20 [1] : vector<16x32xf32> to vector<16xf32>
      %27 = vector.shape_cast %26 : vector<16xf32> to vector<16x1xf32>
      %cst_21 = arith.constant 3.200000e+01 : f32
      %28 = vector.broadcast %cst_21 : f32 to vector<16x1xf32>
      %29 = arith.divf %27, %28 : vector<16x1xf32>
      %30 = vector.broadcast %29 : vector<16x1xf32> to vector<16x32xf32>
      %31 = arith.subf %25, %30 : vector<16x32xf32>
      %32 = arith.mulf %31, %31 : vector<16x32xf32>
      %cst_22 = arith.constant dense<0.000000e+00> : vector<16xf32>
      %33 = vector.multi_reduction <add>, %32, %cst_22 [1] : vector<16x32xf32> to vector<16xf32>
      %34 = vector.shape_cast %33 : vector<16xf32> to vector<16x1xf32>
      %cst_23 = arith.constant 3.200000e+01 : f32
      %35 = vector.broadcast %cst_23 : f32 to vector<16x1xf32>
      %36 = arith.divf %34, %35 : vector<16x1xf32>
      %37 = vector.broadcast %29 : vector<16x1xf32> to vector<16x32xf32>
      %38 = arith.subf %25, %37 : vector<16x32xf32>
      %cst_24 = arith.constant 9.99999974E-6 : f32
      %39 = vector.broadcast %cst_24 : f32 to vector<16x1xf32>
      %40 = arith.addf %36, %39 : vector<16x1xf32>
      %41 = math.rsqrt %40 : vector<16x1xf32>
      %42 = vector.broadcast %41 : vector<16x1xf32> to vector<16x32xf32>
      %43 = arith.mulf %38, %42 : vector<16x32xf32>
      %c0_25 = arith.constant 0 : index
      %c0_26 = arith.constant 0 : index
      %44 = vector.load %arg7[%c0_25, %c0_26] : memref<1x32xf32, #tpu.memory_space<vmem>>, vector<1x32xf32>
      %45 = vector.broadcast %44 : vector<1x32xf32> to vector<16x32xf32>
      %46 = arith.mulf %43, %45 : vector<16x32xf32>
      %c0_27 = arith.constant 0 : index
      %c0_28 = arith.constant 0 : index
      %47 = vector.load %arg8[%c0_27, %c0_28] : memref<1x32xf32, #tpu.memory_space<vmem>>, vector<1x32xf32>
      %48 = vector.broadcast %47 : vector<1x32xf32> to vector<16x32xf32>
      %49 = arith.addf %46, %48 : vector<16x32xf32>
      %c0_29 = arith.constant 0 : index
      %c0_30 = arith.constant 0 : index
      %50 = vector.load %arg9[%c0_29, %c0_30] : memref<16x32xf32, #tpu.memory_space<vmem>>, vector<16x32xf32>
      tpu.vector_store %arg9[%c0_29, %c0_30], %49 {strides = array<i32>} : memref<16x32xf32, #tpu.memory_space<vmem>>, vector<16x32xf32>,
    } else {
    }
    return
  }
  func.func @transform_0(%arg0: i32, %arg1: i32) -> (i32, i32) {
    %c0_i32 = arith.constant 0 : i32
    %c0_i32_0 = arith.constant 0 : i32
    return %arg0, %c0_i32 : i32, i32
  }
  func.func @transform_1(%arg0: i32, %arg1: i32) -> (i32, i32) {
    %c0_i32 = arith.constant 0 : i32
    %c0_i32_0 = arith.constant 0 : i32
    return %c0_i32, %arg1 : i32, i32
  }
  func.func @transform_2(%arg0: i32, %arg1: i32) -> (i32, i32) {
    %c0_i32 = arith.constant 0 : i32
    %c0_i32_0 = arith.constant 0 : i32
    return %c0_i32, %arg1 : i32, i32
  }
  func.func @transform_3(%arg0: i32, %arg1: i32) -> (i32, i32) {
    %c0_i32 = arith.constant 0 : i32
    %c0_i32_0 = arith.constant 0 : i32
    return %arg1, %c0_i32 : i32, i32
  }
  func.func @transform_4(%arg0: i32, %arg1: i32) -> (i32, i32) {
    %c0_i32 = arith.constant 0 : i32
    %c0_i32_0 = arith.constant 0 : i32
    %c0_i32_1 = arith.constant 0 : i32
    return %c0_i32, %c0_i32_0 : i32, i32
  }
  func.func @transform_5(%arg0: i32, %arg1: i32) -> (i32, i32) {
    %c0_i32 = arith.constant 0 : i32
    %c0_i32_0 = arith.constant 0 : i32
    %c0_i32_1 = arith.constant 0 : i32
    return %c0_i32, %c0_i32_0 : i32, i32
  }
  func.func @transform_6(%arg0: i32, %arg1: i32) -> (i32, i32) {
    %c0_i32 = arith.constant 0 : i32
    %c0_i32_0 = arith.constant 0 : i32
    %c0_i32_1 = arith.constant 0 : i32
    return %c0_i32, %c0_i32_0 : i32, i32
  }
  func.func @transform_7(%arg0: i32, %arg1: i32) -> (i32, i32) {
    %c0_i32 = arith.constant 0 : i32
    %c0_i32_0 = arith.constant 0 : i32
    return %arg0, %c0_i32 : i32, i32
  }
}

module attributes {stable_mosaic.version = 11 : i64} {
  func.func @_linear_kernel(%arg0: i32, %arg1: i32, %arg2: i32, %arg3: memref<16x32xf32, #tpu.memory_space<vmem>>, %arg4: memref<32x64xbf16, #tpu.memory_space<vmem>>, %arg5: memref<1x64xf32, #tpu.memory_space<vmem>>, %arg6: memref<16x64xbf16, #tpu.memory_space<vmem>>, %arg7: memref<16x64xf32, #tpu.memory_space<vmem>>) attributes {dimension_semantics = [#tpu.dimension_semantics<parallel>, #tpu.dimension_semantics<parallel>, #tpu.dimension_semantics<arbitrary>], iteration_bounds = array<i64: 1, 1, 1>, scalar_prefetch = 0 : i64, scratch_operands = 1 : i64, tpu.core_type = #tpu.core_type<tc>, window_params = [{transform_indices = @transform_0, window_bounds = array<i64: 16, 32>}, {transform_indices = @transform_1, window_bounds = array<i64: 32, 64>}, {transform_indices = @transform_2, window_bounds = array<i64: 1, 64>}, {transform_indices = @transform_3, window_bounds = array<i64: 16, 64>}]} {
    %c0_i32 = arith.constant 0 : i32
    %0 = arith.cmpi eq, %arg2, %c0_i32 : i32
    %1 = arith.extui %0 : i1 to i32
    %c0_i32_0 = arith.constant 0 : i32
    %2 = arith.cmpi ne, %1, %c0_i32_0 : i32
    scf.if %2 {
      %cst_10 = arith.constant 0.000000e+00 : f32
      %13 = vector.broadcast %cst_10 : f32 to vector<16x64xf32>
      %c0_11 = arith.constant 0 : index
      %c0_12 = arith.constant 0 : index
      %14 = vector.load %arg7[%c0_11, %c0_12] : memref<16x64xf32, #tpu.memory_space<vmem>>, vector<16x64xf32>
      tpu.vector_store %arg7[%c0_11, %c0_12], %13 {strides = array<i32>} : memref<16x64xf32, #tpu.memory_space<vmem>>, vector<16x64xf32>,
    } else {
    }
    %c0 = arith.constant 0 : index
    %c0_1 = arith.constant 0 : index
    %3 = vector.load %arg7[%c0, %c0_1] : memref<16x64xf32, #tpu.memory_space<vmem>>, vector<16x64xf32>
    %c0_2 = arith.constant 0 : index
    %c0_3 = arith.constant 0 : index
    %4 = vector.load %arg3[%c0_2, %c0_3] : memref<16x32xf32, #tpu.memory_space<vmem>>, vector<16x32xf32>
    %5 = arith.truncf %4 : vector<16x32xf32> to vector<16x32xbf16>
    %c0_4 = arith.constant 0 : index
    %c0_5 = arith.constant 0 : index
    %6 = vector.load %arg4[%c0_4, %c0_5] : memref<32x64xbf16, #tpu.memory_space<vmem>>, vector<32x64xbf16>
    %cst = arith.constant dense<0.000000e+00> : vector<16x64xf32>
    %7 = tpu.matmul %5, %6, %cst {dimension_numbers = #tpu.dot_dimension_numbers<[1], [0], [0], [1], [0, 0, 1, 1], [], []>} : vector<16x32xbf16>, vector<32x64xbf16>, vector<16x64xf32> -> vector<16x64xf32>
    %8 = arith.addf %3, %7 : vector<16x64xf32>
    %c0_6 = arith.constant 0 : index
    %c0_7 = arith.constant 0 : index
    %9 = vector.load %arg7[%c0_6, %c0_7] : memref<16x64xf32, #tpu.memory_space<vmem>>, vector<16x64xf32>
    tpu.vector_store %arg7[%c0_6, %c0_7], %8 {strides = array<i32>} : memref<16x64xf32, #tpu.memory_space<vmem>>, vector<16x64xf32>,
    %c0_i32_8 = arith.constant 0 : i32
    %10 = arith.cmpi eq, %arg2, %c0_i32_8 : i32
    %11 = arith.extui %10 : i1 to i32
    %c0_i32_9 = arith.constant 0 : i32
    %12 = arith.cmpi ne, %11, %c0_i32_9 : i32
    scf.if %12 {
      %c0_10 = arith.constant 0 : index
      %c0_11 = arith.constant 0 : index
      %13 = vector.load %arg7[%c0_10, %c0_11] : memref<16x64xf32, #tpu.memory_space<vmem>>, vector<16x64xf32>
      %c0_12 = arith.constant 0 : index
      %c0_13 = arith.constant 0 : index
      %14 = vector.load %arg5[%c0_12, %c0_13] : memref<1x64xf32, #tpu.memory_space<vmem>>, vector<1x64xf32>
      %15 = vector.broadcast %14 : vector<1x64xf32> to vector<16x64xf32>
      %16 = arith.addf %13, %15 : vector<16x64xf32>
      %17 = arith.truncf %16 : vector<16x64xf32> to vector<16x64xbf16>
      %c0_14 = arith.constant 0 : index
      %c0_15 = arith.constant 0 : index
      %18 = vector.load %arg6[%c0_14, %c0_15] : memref<16x64xbf16, #tpu.memory_space<vmem>>, vector<16x64xbf16>
      tpu.vector_store %arg6[%c0_14, %c0_15], %17 {strides = array<i32>} : memref<16x64xbf16, #tpu.memory_space<vmem>>, vector<16x64xbf16>,
    } else {
    }
    return
  }
  func.func @transform_0(%arg0: i32, %arg1: i32, %arg2: i32) -> (i32, i32) {
    %c0_i32 = arith.constant 0 : i32
    return %arg0, %arg2 : i32, i32
  }
  func.func @transform_1(%arg0: i32, %arg1: i32, %arg2: i32) -> (i32, i32) {
    %c0_i32 = arith.constant 0 : i32
    return %arg2, %arg1 : i32, i32
  }
  func.func @transform_2(%arg0: i32, %arg1: i32, %arg2: i32) -> (i32, i32) {
    %c0_i32 = arith.constant 0 : i32
    %c0_i32_0 = arith.constant 0 : i32
    return %c0_i32, %arg1 : i32, i32
  }
  func.func @transform_3(%arg0: i32, %arg1: i32, %arg2: i32) -> (i32, i32) {
    %c0_i32 = arith.constant 0 : i32
    return %arg0, %arg1 : i32, i32
  }
}

module attributes {stable_mosaic.version = 11 : i64} {
  func.func @kernel(%arg0: i32, %arg1: i32, %arg2: memref<1x8x32xbf16, #tpu.memory_space<vmem>>, %arg3: memref<1x8x32xbf16, #tpu.memory_space<vmem>>, %arg4: memref<1x8x32xbf16, #tpu.memory_space<vmem>>, %arg5: memref<1x1x8xf32, #tpu.memory_space<vmem>>, %arg6: memref<32x32xbf16, #tpu.memory_space<vmem>>, %arg7: memref<1x32xf32, #tpu.memory_space<vmem>>, %arg8: memref<1x8x32xf32, #tpu.memory_space<vmem>>, %arg9: memref<1x32xf32, #tpu.memory_space<vmem>>, %arg10: memref<1x32xf32, #tpu.memory_space<vmem>>, %arg11: memref<1x8x32xf32, #tpu.memory_space<vmem>>, %arg12: memref<1x4x8x8xf32, #tpu.memory_space<vmem>>, %arg13: memref<8x32xf32, #tpu.memory_space<vmem>>) attributes {dimension_semantics = [#tpu.dimension_semantics<parallel>, #tpu.dimension_semantics<parallel>], iteration_bounds = array<i64: 2, 1>, scalar_prefetch = 0 : i64, scratch_operands = 1 : i64, tpu.core_type = #tpu.core_type<tc>, window_params = [{transform_indices = @transform_0, window_bounds = array<i64: 1, 8, 32>}, {transform_indices = @transform_1, window_bounds = array<i64: 1, 8, 32>}, {transform_indices = @transform_2, window_bounds = array<i64: 1, 8, 32>}, {transform_indices = @transform_3, window_bounds = array<i64: 1, 1, 8>}, {pipeline_mode = #tpu.pipeline_mode<synchronous>, transform_indices = @transform_4, window_bounds = array<i64: 32, 32>}, {pipeline_mode = #tpu.pipeline_mode<synchronous>, transform_indices = @transform_5, window_bounds = array<i64: 1, 32>}, {transform_indices = @transform_6, window_bounds = array<i64: 1, 8, 32>}, {pipeline_mode = #tpu.pipeline_mode<synchronous>, transform_indices = @transform_7, window_bounds = array<i64: 1, 32>}, {pipeline_mode = #tpu.pipeline_mode<synchronous>, transform_indices = @transform_8, window_bounds = array<i64: 1, 32>}, {transform_indices = @transform_9, window_bounds = array<i64: 1, 8, 32>}, {transform_indices = @transform_10, window_bounds = array<i64: 1, 4, 8, 8>}]} {
    %c0 = arith.constant 0 : index
    %c0_0 = arith.constant 0 : index
    %c0_1 = arith.constant 0 : index
    %0 = vector.load %arg5[%c0, %c0_0, %c0_1] : memref<1x1x8xf32, #tpu.memory_space<vmem>>, vector<1x1x8xf32>
    %1 = vector.shape_cast %0 : vector<1x1x8xf32> to vector<1x8xf32>
    %2 = vector.shape_cast %1 : vector<1x8xf32> to vector<1x8xf32>
    %3 = vector.broadcast %2 : vector<1x8xf32> to vector<8x8xf32>
    %4 = tpu.iota {dimensions = array<i32: 0>} : vector<8x8xi32>
    %c8_i32 = arith.constant 8 : i32
    %5 = arith.muli %arg1, %c8_i32 : i32
    %6 = vector.broadcast %5 : i32 to vector<8x8xi32>
    %7 = arith.addi %4, %6 : vector<8x8xi32>
    %8 = tpu.iota {dimensions = array<i32: 1>} : vector<8x8xi32>
    %9 = arith.cmpi sgt, %8, %7 : vector<8x8xi32>
    %10 = arith.extui %9 : vector<8x8xi1> to vector<8x8xi32>
    %11 = arith.sitofp %10 : vector<8x8xi32> to vector<8x8xf32>
    %12 = arith.maximumf %3, %11 : vector<8x8xf32>
    %cst = arith.constant -1.000000e+09 : f32
    %13 = vector.broadcast %cst : f32 to vector<8x8xf32>
    %14 = arith.mulf %12, %13 : vector<8x8xf32>
    %c0_2 = arith.constant 0 : index
    %c0_3 = arith.constant 0 : index
    %c0_4 = arith.constant 0 : index
    %15 = vector.load %arg2[%c0_2, %c0_3, %c0_4] : memref<1x8x32xbf16, #tpu.memory_space<vmem>>, vector<1x8x8xbf16>
    %16 = vector.shape_cast %15 : vector<1x8x8xbf16> to vector<8x8xbf16>
    %c0_5 = arith.constant 0 : index
    %c0_6 = arith.constant 0 : index
    %c0_7 = arith.constant 0 : index
    %17 = vector.load %arg3[%c0_5, %c0_6, %c0_7] : memref<1x8x32xbf16, #tpu.memory_space<vmem>>, vector<1x8x8xbf16>
    %18 = vector.shape_cast %17 : vector<1x8x8xbf16> to vector<8x8xbf16>
    %c0_8 = arith.constant 0 : index
    %c0_9 = arith.constant 0 : index
    %c0_10 = arith.constant 0 : index
    %19 = vector.load %arg4[%c0_8, %c0_9, %c0_10] : memref<1x8x32xbf16, #tpu.memory_space<vmem>>, vector<1x8x8xbf16>
    %20 = vector.shape_cast %19 : vector<1x8x8xbf16> to vector<8x8xbf16>
    %cst_11 = arith.constant dense<0.000000e+00> : vector<8x8xf32>
    %21 = tpu.matmul %16, %18, %cst_11 {dimension_numbers = #tpu.dot_dimension_numbers<[1], [1], [0], [0], [0, 0, 1, 0], [], []>} : vector<8x8xbf16>, vector<8x8xbf16>, vector<8x8xf32> -> vector<8x8xf32>
    %cst_12 = arith.constant 0.353553385 : f32
    %22 = vector.broadcast %cst_12 : f32 to vector<8x8xf32>
    %23 = arith.mulf %21, %22 : vector<8x8xf32>
    %24 = arith.addf %23, %14 : vector<8x8xf32>
    %cst_13 = arith.constant dense<0xFF800000> : vector<8xf32>
    %25 = vector.multi_reduction <maximumf>, %24, %cst_13 [1] : vector<8x8xf32> to vector<8xf32>
    %26 = vector.shape_cast %25 : vector<8xf32> to vector<8x1xf32>
    %27 = vector.broadcast %26 : vector<8x1xf32> to vector<8x8xf32>
    %28 = arith.subf %24, %27 : vector<8x8xf32>
    %29 = math.exp %28 : vector<8x8xf32>
    %cst_14 = arith.constant dense<0.000000e+00> : vector<8xf32>
    %30 = vector.multi_reduction <add>, %29, %cst_14 [1] : vector<8x8xf32> to vector<8xf32>
    %31 = vector.shape_cast %30 : vector<8xf32> to vector<8x1xf32>
    %32 = tpu.reciprocal %31 {approx = true} : vector<8x1xf32> -> vector<8x1xf32>
    %33 = vector.broadcast %32 : vector<8x1xf32> to vector<8x8xf32>
    %34 = arith.mulf %29, %33 : vector<8x8xf32>
    %c0_15 = arith.constant 0 : index
    %c0_16 = arith.constant 0 : index
    %c0_17 = arith.constant 0 : index
    %c0_18 = arith.constant 0 : index
    %35 = vector.load %arg12[%c0_15, %c0_16, %c0_17, %c0_18] : memref<1x4x8x8xf32, #tpu.memory_space<vmem>>, vector<1x1x8x8xf32>
    %36 = vector.shape_cast %35 : vector<1x1x8x8xf32> to vector<8x8xf32>
    %37 = vector.shape_cast %34 : vector<8x8xf32> to vector<1x1x8x8xf32>
    tpu.vector_store %arg12[%c0_15, %c0_16, %c0_17, %c0_18], %37 {strides = array<i32>} : memref<1x4x8x8xf32, #tpu.memory_space<vmem>>, vector<1x1x8x8xf32>,
    %38 = arith.truncf %34 : vector<8x8xf32> to vector<8x8xbf16>
    %cst_19 = arith.constant dense<0.000000e+00> : vector<8x8xf32>
    %39 = tpu.matmul %38, %20, %cst_19 {dimension_numbers = #tpu.dot_dimension_numbers<[1], [0], [0], [1], [0, 0, 1, 1], [], []>} : vector<8x8xbf16>, vector<8x8xbf16>, vector<8x8xf32> -> vector<8x8xf32>
    %c0_20 = arith.constant 0 : index
    %c0_21 = arith.constant 0 : index
    %40 = vector.load %arg13[%c0_20, %c0_21] : memref<8x32xf32, #tpu.memory_space<vmem>>, vector<8x8xf32>
    tpu.vector_store %arg13[%c0_20, %c0_21], %39 {strides = array<i32>} : memref<8x32xf32, #tpu.memory_space<vmem>>, vector<8x8xf32>,
    %c0_22 = arith.constant 0 : index
    %c0_23 = arith.constant 0 : index
    %c8 = arith.constant 8 : index
    %41 = vector.load %arg2[%c0_22, %c0_23, %c8] : memref<1x8x32xbf16, #tpu.memory_space<vmem>>, vector<1x8x8xbf16>
    %42 = vector.shape_cast %41 : vector<1x8x8xbf16> to vector<8x8xbf16>
    %c0_24 = arith.constant 0 : index
    %c0_25 = arith.constant 0 : index
    %c8_26 = arith.constant 8 : index
    %43 = vector.load %arg3[%c0_24, %c0_25, %c8_26] : memref<1x8x32xbf16, #tpu.memory_space<vmem>>, vector<1x8x8xbf16>
    %44 = vector.shape_cast %43 : vector<1x8x8xbf16> to vector<8x8xbf16>
    %c0_27 = arith.constant 0 : index
    %c0_28 = arith.constant 0 : index
    %c8_29 = arith.constant 8 : index
    %45 = vector.load %arg4[%c0_27, %c0_28, %c8_29] : memref<1x8x32xbf16, #tpu.memory_space<vmem>>, vector<1x8x8xbf16>
    %46 = vector.shape_cast %45 : vector<1x8x8xbf16> to vector<8x8xbf16>
    %cst_30 = arith.constant dense<0.000000e+00> : vector<8x8xf32>
    %47 = tpu.matmul %42, %44, %cst_30 {dimension_numbers = #tpu.dot_dimension_numbers<[1], [1], [0], [0], [0, 0, 1, 0], [], []>} : vector<8x8xbf16>, vector<8x8xbf16>, vector<8x8xf32> -> vector<8x8xf32>
    %cst_31 = arith.constant 0.353553385 : f32
    %48 = vector.broadcast %cst_31 : f32 to vector<8x8xf32>
    %49 = arith.mulf %47, %48 : vector<8x8xf32>
    %50 = arith.addf %49, %14 : vector<8x8xf32>
    %cst_32 = arith.constant dense<0xFF800000> : vector<8xf32>
    %51 = vector.multi_reduction <maximumf>, %50, %cst_32 [1] : vector<8x8xf32> to vector<8xf32>
    %52 = vector.shape_cast %51 : vector<8xf32> to vector<8x1xf32>
    %53 = vector.broadcast %52 : vector<8x1xf32> to vector<8x8xf32>
    %54 = arith.subf %50, %53 : vector<8x8xf32>
    %55 = math.exp %54 : vector<8x8xf32>
    %cst_33 = arith.constant dense<0.000000e+00> : vector<8xf32>
    %56 = vector.multi_reduction <add>, %55, %cst_33 [1] : vector<8x8xf32> to vector<8xf32>
    %57 = vector.shape_cast %56 : vector<8xf32> to vector<8x1xf32>
    %58 = tpu.reciprocal %57 {approx = true} : vector<8x1xf32> -> vector<8x1xf32>
    %59 = vector.broadcast %58 : vector<8x1xf32> to vector<8x8xf32>
    %60 = arith.mulf %55, %59 : vector<8x8xf32>
    %c0_34 = arith.constant 0 : index
    %c1 = arith.constant 1 : index
    %c0_35 = arith.constant 0 : index
    %c0_36 = arith.constant 0 : index
    %61 = vector.load %arg12[%c0_34, %c1, %c0_35, %c0_36] : memref<1x4x8x8xf32, #tpu.memory_space<vmem>>, vector<1x1x8x8xf32>
    %62 = vector.shape_cast %61 : vector<1x1x8x8xf32> to vector<8x8xf32>
    %63 = vector.shape_cast %60 : vector<8x8xf32> to vector<1x1x8x8xf32>
    tpu.vector_store %arg12[%c0_34, %c1, %c0_35, %c0_36], %63 {strides = array<i32>} : memref<1x4x8x8xf32, #tpu.memory_space<vmem>>, vector<1x1x8x8xf32>,
    %64 = arith.truncf %60 : vector<8x8xf32> to vector<8x8xbf16>
    %cst_37 = arith.constant dense<0.000000e+00> : vector<8x8xf32>
    %65 = tpu.matmul %64, %46, %cst_37 {dimension_numbers = #tpu.dot_dimension_numbers<[1], [0], [0], [1], [0, 0, 1, 1], [], []>} : vector<8x8xbf16>, vector<8x8xbf16>, vector<8x8xf32> -> vector<8x8xf32>
    %c0_38 = arith.constant 0 : index
    %c8_39 = arith.constant 8 : index
    %66 = vector.load %arg13[%c0_38, %c8_39] : memref<8x32xf32, #tpu.memory_space<vmem>>, vector<8x8xf32>
    tpu.vector_store %arg13[%c0_38, %c8_39], %65 {strides = array<i32>} : memref<8x32xf32, #tpu.memory_space<vmem>>, vector<8x8xf32>,
    %c0_40 = arith.constant 0 : index
    %c0_41 = arith.constant 0 : index
    %c16 = arith.constant 16 : index
    %67 = vector.load %arg2[%c0_40, %c0_41, %c16] : memref<1x8x32xbf16, #tpu.memory_space<vmem>>, vector<1x8x8xbf16>
    %68 = vector.shape_cast %67 : vector<1x8x8xbf16> to vector<8x8xbf16>
    %c0_42 = arith.constant 0 : index
    %c0_43 = arith.constant 0 : index
    %c16_44 = arith.constant 16 : index
    %69 = vector.load %arg3[%c0_42, %c0_43, %c16_44] : memref<1x8x32xbf16, #tpu.memory_space<vmem>>, vector<1x8x8xbf16>
    %70 = vector.shape_cast %69 : vector<1x8x8xbf16> to vector<8x8xbf16>
    %c0_45 = arith.constant 0 : index
    %c0_46 = arith.constant 0 : index
    %c16_47 = arith.constant 16 : index
    %71 = vector.load %arg4[%c0_45, %c0_46, %c16_47] : memref<1x8x32xbf16, #tpu.memory_space<vmem>>, vector<1x8x8xbf16>
    %72 = vector.shape_cast %71 : vector<1x8x8xbf16> to vector<8x8xbf16>
    %cst_48 = arith.constant dense<0.000000e+00> : vector<8x8xf32>
    %73 = tpu.matmul %68, %70, %cst_48 {dimension_numbers = #tpu.dot_dimension_numbers<[1], [1], [0], [0], [0, 0, 1, 0], [], []>} : vector<8x8xbf16>, vector<8x8xbf16>, vector<8x8xf32> -> vector<8x8xf32>
    %cst_49 = arith.constant 0.353553385 : f32
    %74 = vector.broadcast %cst_49 : f32 to vector<8x8xf32>
    %75 = arith.mulf %73, %74 : vector<8x8xf32>
    %76 = arith.addf %75, %14 : vector<8x8xf32>
    %cst_50 = arith.constant dense<0xFF800000> : vector<8xf32>
    %77 = vector.multi_reduction <maximumf>, %76, %cst_50 [1] : vector<8x8xf32> to vector<8xf32>
    %78 = vector.shape_cast %77 : vector<8xf32> to vector<8x1xf32>
    %79 = vector.broadcast %78 : vector<8x1xf32> to vector<8x8xf32>
    %80 = arith.subf %76, %79 : vector<8x8xf32>
    %81 = math.exp %80 : vector<8x8xf32>
    %cst_51 = arith.constant dense<0.000000e+00> : vector<8xf32>
    %82 = vector.multi_reduction <add>, %81, %cst_51 [1] : vector<8x8xf32> to vector<8xf32>
    %83 = vector.shape_cast %82 : vector<8xf32> to vector<8x1xf32>
    %84 = tpu.reciprocal %83 {approx = true} : vector<8x1xf32> -> vector<8x1xf32>
    %85 = vector.broadcast %84 : vector<8x1xf32> to vector<8x8xf32>
    %86 = arith.mulf %81, %85 : vector<8x8xf32>
    %c0_52 = arith.constant 0 : index
    %c2 = arith.constant 2 : index
    %c0_53 = arith.constant 0 : index
    %c0_54 = arith.constant 0 : index
    %87 = vector.load %arg12[%c0_52, %c2, %c0_53, %c0_54] : memref<1x4x8x8xf32, #tpu.memory_space<vmem>>, vector<1x1x8x8xf32>
    %88 = vector.shape_cast %87 : vector<1x1x8x8xf32> to vector<8x8xf32>
    %89 = vector.shape_cast %86 : vector<8x8xf32> to vector<1x1x8x8xf32>
    tpu.vector_store %arg12[%c0_52, %c2, %c0_53, %c0_54], %89 {strides = array<i32>} : memref<1x4x8x8xf32, #tpu.memory_space<vmem>>, vector<1x1x8x8xf32>,
    %90 = arith.truncf %86 : vector<8x8xf32> to vector<8x8xbf16>
    %cst_55 = arith.constant dense<0.000000e+00> : vector<8x8xf32>
    %91 = tpu.matmul %90, %72, %cst_55 {dimension_numbers = #tpu.dot_dimension_numbers<[1], [0], [0], [1], [0, 0, 1, 1], [], []>} : vector<8x8xbf16>, vector<8x8xbf16>, vector<8x8xf32> -> vector<8x8xf32>
    %c0_56 = arith.constant 0 : index
    %c16_57 = arith.constant 16 : index
    %92 = vector.load %arg13[%c0_56, %c16_57] : memref<8x32xf32, #tpu.memory_space<vmem>>, vector<8x8xf32>
    tpu.vector_store %arg13[%c0_56, %c16_57], %91 {strides = array<i32>} : memref<8x32xf32, #tpu.memory_space<vmem>>, vector<8x8xf32>,
    %c0_58 = arith.constant 0 : index
    %c0_59 = arith.constant 0 : index
    %c24 = arith.constant 24 : index
    %93 = vector.load %arg2[%c0_58, %c0_59, %c24] : memref<1x8x32xbf16, #tpu.memory_space<vmem>>, vector<1x8x8xbf16>
    %94 = vector.shape_cast %93 : vector<1x8x8xbf16> to vector<8x8xbf16>
    %c0_60 = arith.constant 0 : index
    %c0_61 = arith.constant 0 : index
    %c24_62 = arith.constant 24 : index
    %95 = vector.load %arg3[%c0_60, %c0_61, %c24_62] : memref<1x8x32xbf16, #tpu.memory_space<vmem>>, vector<1x8x8xbf16>
    %96 = vector.shape_cast %95 : vector<1x8x8xbf16> to vector<8x8xbf16>
    %c0_63 = arith.constant 0 : index
    %c0_64 = arith.constant 0 : index
    %c24_65 = arith.constant 24 : index
    %97 = vector.load %arg4[%c0_63, %c0_64, %c24_65] : memref<1x8x32xbf16, #tpu.memory_space<vmem>>, vector<1x8x8xbf16>
    %98 = vector.shape_cast %97 : vector<1x8x8xbf16> to vector<8x8xbf16>
    %cst_66 = arith.constant dense<0.000000e+00> : vector<8x8xf32>
    %99 = tpu.matmul %94, %96, %cst_66 {dimension_numbers = #tpu.dot_dimension_numbers<[1], [1], [0], [0], [0, 0, 1, 0], [], []>} : vector<8x8xbf16>, vector<8x8xbf16>, vector<8x8xf32> -> vector<8x8xf32>
    %cst_67 = arith.constant 0.353553385 : f32
    %100 = vector.broadcast %cst_67 : f32 to vector<8x8xf32>
    %101 = arith.mulf %99, %100 : vector<8x8xf32>
    %102 = arith.addf %101, %14 : vector<8x8xf32>
    %cst_68 = arith.constant dense<0xFF800000> : vector<8xf32>
    %103 = vector.multi_reduction <maximumf>, %102, %cst_68 [1] : vector<8x8xf32> to vector<8xf32>
    %104 = vector.shape_cast %103 : vector<8xf32> to vector<8x1xf32>
    %105 = vector.broadcast %104 : vector<8x1xf32> to vector<8x8xf32>
    %106 = arith.subf %102, %105 : vector<8x8xf32>
    %107 = math.exp %106 : vector<8x8xf32>
    %cst_69 = arith.constant dense<0.000000e+00> : vector<8xf32>
    %108 = vector.multi_reduction <add>, %107, %cst_69 [1] : vector<8x8xf32> to vector<8xf32>
    %109 = vector.shape_cast %108 : vector<8xf32> to vector<8x1xf32>
    %110 = tpu.reciprocal %109 {approx = true} : vector<8x1xf32> -> vector<8x1xf32>
    %111 = vector.broadcast %110 : vector<8x1xf32> to vector<8x8xf32>
    %112 = arith.mulf %107, %111 : vector<8x8xf32>
    %c0_70 = arith.constant 0 : index
    %c3 = arith.constant 3 : index
    %c0_71 = arith.constant 0 : index
    %c0_72 = arith.constant 0 : index
    %113 = vector.load %arg12[%c0_70, %c3, %c0_71, %c0_72] : memref<1x4x8x8xf32, #tpu.memory_space<vmem>>, vector<1x1x8x8xf32>
    %114 = vector.shape_cast %113 : vector<1x1x8x8xf32> to vector<8x8xf32>
    %115 = vector.shape_cast %112 : vector<8x8xf32> to vector<1x1x8x8xf32>
    tpu.vector_store %arg12[%c0_70, %c3, %c0_71, %c0_72], %115 {strides = array<i32>} : memref<1x4x8x8xf32, #tpu.memory_space<vmem>>, vector<1x1x8x8xf32>,
    %116 = arith.truncf %112 : vector<8x8xf32> to vector<8x8xbf16>
    %cst_73 = arith.constant dense<0.000000e+00> : vector<8x8xf32>
    %117 = tpu.matmul %116, %98, %cst_73 {dimension_numbers = #tpu.dot_dimension_numbers<[1], [0], [0], [1], [0, 0, 1, 1], [], []>} : vector<8x8xbf16>, vector<8x8xbf16>, vector<8x8xf32> -> vector<8x8xf32>
    %c0_74 = arith.constant 0 : index
    %c24_75 = arith.constant 24 : index
    %118 = vector.load %arg13[%c0_74, %c24_75] : memref<8x32xf32, #tpu.memory_space<vmem>>, vector<8x8xf32>
    tpu.vector_store %arg13[%c0_74, %c24_75], %117 {strides = array<i32>} : memref<8x32xf32, #tpu.memory_space<vmem>>, vector<8x8xf32>,
    %c0_76 = arith.constant 0 : index
    %c0_77 = arith.constant 0 : index
    %119 = vector.load %arg13[%c0_76, %c0_77] : memref<8x32xf32, #tpu.memory_space<vmem>>, vector<8x32xf32>
    %120 = arith.truncf %119 : vector<8x32xf32> to vector<8x32xbf16>
    %c0_78 = arith.constant 0 : index
    %c0_79 = arith.constant 0 : index
    %121 = vector.load %arg6[%c0_78, %c0_79] : memref<32x32xbf16, #tpu.memory_space<vmem>>, vector<32x32xbf16>
    %cst_80 = arith.constant dense<0.000000e+00> : vector<8x32xf32>
    %122 = tpu.matmul %120, %121, %cst_80 {dimension_numbers = #tpu.dot_dimension_numbers<[1], [0], [0], [1], [0, 0, 1, 1], [], []>} : vector<8x32xbf16>, vector<32x32xbf16>, vector<8x32xf32> -> vector<8x32xf32>
    %c0_81 = arith.constant 0 : index
    %c0_82 = arith.constant 0 : index
    %123 = vector.load %arg7[%c0_81, %c0_82] : memref<1x32xf32, #tpu.memory_space<vmem>>, vector<1x32xf32>
    %124 = vector.broadcast %123 : vector<1x32xf32> to vector<8x32xf32>
    %125 = arith.addf %122, %124 : vector<8x32xf32>
    %c0_83 = arith.constant 0 : index
    %c0_84 = arith.constant 0 : index
    %c0_85 = arith.constant 0 : index
    %126 = vector.load %arg8[%c0_83, %c0_84, %c0_85] : memref<1x8x32xf32, #tpu.memory_space<vmem>>, vector<1x8x32xf32>
    %127 = vector.shape_cast %126 : vector<1x8x32xf32> to vector<8x32xf32>
    %128 = arith.addf %127, %125 : vector<8x32xf32>
    %cst_86 = arith.constant dense<0.000000e+00> : vector<8xf32>
    %129 = vector.multi_reduction <add>, %128, %cst_86 [1] : vector<8x32xf32> to vector<8xf32>
    %130 = vector.shape_cast %129 : vector<8xf32> to vector<8x1xf32>
    %cst_87 = arith.constant 3.200000e+01 : f32
    %131 = vector.broadcast %cst_87 : f32 to vector<8x1xf32>
    %132 = arith.divf %130, %131 : vector<8x1xf32>
    %133 = vector.broadcast %132 : vector<8x1xf32> to vector<8x32xf32>
    %134 = arith.subf %128, %133 : vector<8x32xf32>
    %135 = arith.mulf %134, %134 : vector<8x32xf32>
    %cst_88 = arith.constant dense<0.000000e+00> : vector<8xf32>
    %136 = vector.multi_reduction <add>, %135, %cst_88 [1] : vector<8x32xf32> to vector<8xf32>
    %137 = vector.shape_cast %136 : vector<8xf32> to vector<8x1xf32>
    %cst_89 = arith.constant 3.200000e+01 : f32
    %138 = vector.broadcast %cst_89 : f32 to vector<8x1xf32>
    %139 = arith.divf %137, %138 : vector<8x1xf32>
    %140 = vector.broadcast %132 : vector<8x1xf32> to vector<8x32xf32>
    %141 = arith.subf %128, %140 : vector<8x32xf32>
    %cst_90 = arith.constant 9.99999974E-6 : f32
    %142 = vector.broadcast %cst_90 : f32 to vector<8x1xf32>
    %143 = arith.addf %139, %142 : vector<8x1xf32>
    %144 = math.rsqrt %143 : vector<8x1xf32>
    %145 = vector.broadcast %144 : vector<8x1xf32> to vector<8x32xf32>
    %146 = arith.mulf %141, %145 : vector<8x32xf32>
    %c0_91 = arith.constant 0 : index
    %c0_92 = arith.constant 0 : index
    %147 = vector.load %arg9[%c0_91, %c0_92] : memref<1x32xf32, #tpu.memory_space<vmem>>, vector<1x32xf32>
    %148 = vector.broadcast %147 : vector<1x32xf32> to vector<8x32xf32>
    %149 = arith.mulf %146, %148 : vector<8x32xf32>
    %c0_93 = arith.constant 0 : index
    %c0_94 = arith.constant 0 : index
    %150 = vector.load %arg10[%c0_93, %c0_94] : memref<1x32xf32, #tpu.memory_space<vmem>>, vector<1x32xf32>
    %151 = vector.broadcast %150 : vector<1x32xf32> to vector<8x32xf32>
    %152 = arith.addf %149, %151 : vector<8x32xf32>
    %c0_95 = arith.constant 0 : index
    %c0_96 = arith.constant 0 : index
    %c0_97 = arith.constant 0 : index
    %153 = vector.load %arg11[%c0_95, %c0_96, %c0_97] : memref<1x8x32xf32, #tpu.memory_space<vmem>>, vector<1x8x32xf32>
    %154 = vector.shape_cast %153 : vector<1x8x32xf32> to vector<8x32xf32>
    %155 = vector.shape_cast %152 : vector<8x32xf32> to vector<1x8x32xf32>
    tpu.vector_store %arg11[%c0_95, %c0_96, %c0_97], %155 {strides = array<i32>} : memref<1x8x32xf32, #tpu.memory_space<vmem>>, vector<1x8x32xf32>,
    return
  }
  func.func @transform_0(%arg0: i32, %arg1: i32) -> (i32, i32, i32) {
    %c0_i32 = arith.constant 0 : i32
    %c0_i32_0 = arith.constant 0 : i32
    return %arg0, %arg1, %c0_i32 : i32, i32, i32
  }
  func.func @transform_1(%arg0: i32, %arg1: i32) -> (i32, i32, i32) {
    %c0_i32 = arith.constant 0 : i32
    %c0_i32_0 = arith.constant 0 : i32
    %c0_i32_1 = arith.constant 0 : i32
    return %arg0, %c0_i32, %c0_i32_0 : i32, i32, i32
  }
  func.func @transform_2(%arg0: i32, %arg1: i32) -> (i32, i32, i32) {
    %c0_i32 = arith.constant 0 : i32
    %c0_i32_0 = arith.constant 0 : i32
    %c0_i32_1 = arith.constant 0 : i32
    return %arg0, %c0_i32, %c0_i32_0 : i32, i32, i32
  }
  func.func @transform_3(%arg0: i32, %arg1: i32) -> (i32, i32, i32) {
    %c0_i32 = arith.constant 0 : i32
    %c0_i32_0 = arith.constant 0 : i32
    %c0_i32_1 = arith.constant 0 : i32
    return %arg0, %c0_i32, %c0_i32_0 : i32, i32, i32
  }
  func.func @transform_4(%arg0: i32, %arg1: i32) -> (i32, i32) {
    %c0_i32 = arith.constant 0 : i32
    %c0_i32_0 = arith.constant 0 : i32
    %c0_i32_1 = arith.constant 0 : i32
    return %c0_i32, %c0_i32_0 : i32, i32
  }
  func.func @transform_5(%arg0: i32, %arg1: i32) -> (i32, i32) {
    %c0_i32 = arith.constant 0 : i32
    %c0_i32_0 = arith.constant 0 : i32
    %c0_i32_1 = arith.constant 0 : i32
    return %c0_i32, %c0_i32_0 : i32, i32
  }
  func.func @transform_6(%arg0: i32, %arg1: i32) -> (i32, i32, i32) {
    %c0_i32 = arith.constant 0 : i32
    %c0_i32_0 = arith.constant 0 : i32
    return %arg0, %arg1, %c0_i32 : i32, i32, i32
  }
  func.func @transform_7(%arg0: i32, %arg1: i32) -> (i32, i32) {
    %c0_i32 = arith.constant 0 : i32
    %c0_i32_0 = arith.constant 0 : i32
    %c0_i32_1 = arith.constant 0 : i32
    return %c0_i32, %c0_i32_0 : i32, i32
  }
  func.func @transform_8(%arg0: i32, %arg1: i32) -> (i32, i32) {
    %c0_i32 = arith.constant 0 : i32
    %c0_i32_0 = arith.constant 0 : i32
    %c0_i32_1 = arith.constant 0 : i32
    return %c0_i32, %c0_i32_0 : i32, i32
  }
  func.func @transform_9(%arg0: i32, %arg1: i32) -> (i32, i32, i32) {
    %c0_i32 = arith.constant 0 : i32
    %c0_i32_0 = arith.constant 0 : i32
    return %arg0, %arg1, %c0_i32 : i32, i32, i32
  }
  func.func @transform_10(%arg0: i32, %arg1: i32) -> (i32, i32, i32, i32) {
    %c0_i32 = arith.constant 0 : i32
    %c0_i32_0 = arith.constant 0 : i32
    %c0_i32_1 = arith.constant 0 : i32
    return %arg0, %c0_i32, %arg1, %c0_i32_0 : i32, i32, i32, i32
  }
}

module attributes {stable_mosaic.version = 11 : i64} {
  func.func @_linear_kernel(%arg0: i32, %arg1: i32, %arg2: i32, %arg3: memref<16x32xf32, #tpu.memory_space<vmem>>, %arg4: memref<32x32xbf16, #tpu.memory_space<vmem>>, %arg5: memref<1x32xf32, #tpu.memory_space<vmem>>, %arg6: memref<16x32xbf16, #tpu.memory_space<vmem>>, %arg7: memref<16x32xf32, #tpu.memory_space<vmem>>) attributes {dimension_semantics = [#tpu.dimension_semantics<parallel>, #tpu.dimension_semantics<parallel>, #tpu.dimension_semantics<arbitrary>], iteration_bounds = array<i64: 1, 1, 1>, scalar_prefetch = 0 : i64, scratch_operands = 1 : i64, tpu.core_type = #tpu.core_type<tc>, window_params = [{transform_indices = @transform_0, window_bounds = array<i64: 16, 32>}, {transform_indices = @transform_1, window_bounds = array<i64: 32, 32>}, {transform_indices = @transform_2, window_bounds = array<i64: 1, 32>}, {transform_indices = @transform_3, window_bounds = array<i64: 16, 32>}]} {
    %c0_i32 = arith.constant 0 : i32
    %0 = arith.cmpi eq, %arg2, %c0_i32 : i32
    %1 = arith.extui %0 : i1 to i32
    %c0_i32_0 = arith.constant 0 : i32
    %2 = arith.cmpi ne, %1, %c0_i32_0 : i32
    scf.if %2 {
      %cst_10 = arith.constant 0.000000e+00 : f32
      %13 = vector.broadcast %cst_10 : f32 to vector<16x32xf32>
      %c0_11 = arith.constant 0 : index
      %c0_12 = arith.constant 0 : index
      %14 = vector.load %arg7[%c0_11, %c0_12] : memref<16x32xf32, #tpu.memory_space<vmem>>, vector<16x32xf32>
      tpu.vector_store %arg7[%c0_11, %c0_12], %13 {strides = array<i32>} : memref<16x32xf32, #tpu.memory_space<vmem>>, vector<16x32xf32>,
    } else {
    }
    %c0 = arith.constant 0 : index
    %c0_1 = arith.constant 0 : index
    %3 = vector.load %arg7[%c0, %c0_1] : memref<16x32xf32, #tpu.memory_space<vmem>>, vector<16x32xf32>
    %c0_2 = arith.constant 0 : index
    %c0_3 = arith.constant 0 : index
    %4 = vector.load %arg3[%c0_2, %c0_3] : memref<16x32xf32, #tpu.memory_space<vmem>>, vector<16x32xf32>
    %5 = arith.truncf %4 : vector<16x32xf32> to vector<16x32xbf16>
    %c0_4 = arith.constant 0 : index
    %c0_5 = arith.constant 0 : index
    %6 = vector.load %arg4[%c0_4, %c0_5] : memref<32x32xbf16, #tpu.memory_space<vmem>>, vector<32x32xbf16>
    %cst = arith.constant dense<0.000000e+00> : vector<16x32xf32>
    %7 = tpu.matmul %5, %6, %cst {dimension_numbers = #tpu.dot_dimension_numbers<[1], [0], [0], [1], [0, 0, 1, 1], [], []>} : vector<16x32xbf16>, vector<32x32xbf16>, vector<16x32xf32> -> vector<16x32xf32>
    %8 = arith.addf %3, %7 : vector<16x32xf32>
    %c0_6 = arith.constant 0 : index
    %c0_7 = arith.constant 0 : index
    %9 = vector.load %arg7[%c0_6, %c0_7] : memref<16x32xf32, #tpu.memory_space<vmem>>, vector<16x32xf32>
    tpu.vector_store %arg7[%c0_6, %c0_7], %8 {strides = array<i32>} : memref<16x32xf32, #tpu.memory_space<vmem>>, vector<16x32xf32>,
    %c0_i32_8 = arith.constant 0 : i32
    %10 = arith.cmpi eq, %arg2, %c0_i32_8 : i32
    %11 = arith.extui %10 : i1 to i32
    %c0_i32_9 = arith.constant 0 : i32
    %12 = arith.cmpi ne, %11, %c0_i32_9 : i32
    scf.if %12 {
      %c0_10 = arith.constant 0 : index
      %c0_11 = arith.constant 0 : index
      %13 = vector.load %arg7[%c0_10, %c0_11] : memref<16x32xf32, #tpu.memory_space<vmem>>, vector<16x32xf32>
      %c0_12 = arith.constant 0 : index
      %c0_13 = arith.constant 0 : index
      %14 = vector.load %arg5[%c0_12, %c0_13] : memref<1x32xf32, #tpu.memory_space<vmem>>, vector<1x32xf32>
      %15 = vector.broadcast %14 : vector<1x32xf32> to vector<16x32xf32>
      %16 = arith.addf %13, %15 : vector<16x32xf32>
      %17 = arith.truncf %16 : vector<16x32xf32> to vector<16x32xbf16>
      %c0_14 = arith.constant 0 : index
      %c0_15 = arith.constant 0 : index
      %18 = vector.load %arg6[%c0_14, %c0_15] : memref<16x32xbf16, #tpu.memory_space<vmem>>, vector<16x32xbf16>
      tpu.vector_store %arg6[%c0_14, %c0_15], %17 {strides = array<i32>} : memref<16x32xbf16, #tpu.memory_space<vmem>>, vector<16x32xbf16>,
    } else {
    }
    return
  }
  func.func @transform_0(%arg0: i32, %arg1: i32, %arg2: i32) -> (i32, i32) {
    %c0_i32 = arith.constant 0 : i32
    return %arg0, %arg2 : i32, i32
  }
  func.func @transform_1(%arg0: i32, %arg1: i32, %arg2: i32) -> (i32, i32) {
    %c0_i32 = arith.constant 0 : i32
    return %arg2, %arg1 : i32, i32
  }
  func.func @transform_2(%arg0: i32, %arg1: i32, %arg2: i32) -> (i32, i32) {
    %c0_i32 = arith.constant 0 : i32
    %c0_i32_0 = arith.constant 0 : i32
    return %c0_i32, %arg1 : i32, i32
  }
  func.func @transform_3(%arg0: i32, %arg1: i32, %arg2: i32) -> (i32, i32) {
    %c0_i32 = arith.constant 0 : i32
    return %arg0, %arg1 : i32, i32
  }
}

module attributes {stable_mosaic.version = 11 : i64} {
  func.func @_linear_kernel(%arg0: i32, %arg1: i32, %arg2: i32, %arg3: memref<16x32xf32, #tpu.memory_space<vmem>>, %arg4: memref<32x64xbf16, #tpu.memory_space<vmem>>, %arg5: memref<1x64xf32, #tpu.memory_space<vmem>>, %arg6: memref<16x64xf32, #tpu.memory_space<vmem>>, %arg7: memref<16x64xf32, #tpu.memory_space<vmem>>) attributes {dimension_semantics = [#tpu.dimension_semantics<parallel>, #tpu.dimension_semantics<parallel>, #tpu.dimension_semantics<arbitrary>], iteration_bounds = array<i64: 1, 1, 1>, scalar_prefetch = 0 : i64, scratch_operands = 1 : i64, tpu.core_type = #tpu.core_type<tc>, window_params = [{transform_indices = @transform_0, window_bounds = array<i64: 16, 32>}, {transform_indices = @transform_1, window_bounds = array<i64: 32, 64>}, {transform_indices = @transform_2, window_bounds = array<i64: 1, 64>}, {transform_indices = @transform_3, window_bounds = array<i64: 16, 64>}]} {
    %c0_i32 = arith.constant 0 : i32
    %0 = arith.cmpi eq, %arg2, %c0_i32 : i32
    %1 = arith.extui %0 : i1 to i32
    %c0_i32_0 = arith.constant 0 : i32
    %2 = arith.cmpi ne, %1, %c0_i32_0 : i32
    scf.if %2 {
      %cst_10 = arith.constant 0.000000e+00 : f32
      %13 = vector.broadcast %cst_10 : f32 to vector<16x64xf32>
      %c0_11 = arith.constant 0 : index
      %c0_12 = arith.constant 0 : index
      %14 = vector.load %arg7[%c0_11, %c0_12] : memref<16x64xf32, #tpu.memory_space<vmem>>, vector<16x64xf32>
      tpu.vector_store %arg7[%c0_11, %c0_12], %13 {strides = array<i32>} : memref<16x64xf32, #tpu.memory_space<vmem>>, vector<16x64xf32>,
    } else {
    }
    %c0 = arith.constant 0 : index
    %c0_1 = arith.constant 0 : index
    %3 = vector.load %arg7[%c0, %c0_1] : memref<16x64xf32, #tpu.memory_space<vmem>>, vector<16x64xf32>
    %c0_2 = arith.constant 0 : index
    %c0_3 = arith.constant 0 : index
    %4 = vector.load %arg3[%c0_2, %c0_3] : memref<16x32xf32, #tpu.memory_space<vmem>>, vector<16x32xf32>
    %5 = arith.truncf %4 : vector<16x32xf32> to vector<16x32xbf16>
    %c0_4 = arith.constant 0 : index
    %c0_5 = arith.constant 0 : index
    %6 = vector.load %arg4[%c0_4, %c0_5] : memref<32x64xbf16, #tpu.memory_space<vmem>>, vector<32x64xbf16>
    %cst = arith.constant dense<0.000000e+00> : vector<16x64xf32>
    %7 = tpu.matmul %5, %6, %cst {dimension_numbers = #tpu.dot_dimension_numbers<[1], [0], [0], [1], [0, 0, 1, 1], [], []>} : vector<16x32xbf16>, vector<32x64xbf16>, vector<16x64xf32> -> vector<16x64xf32>
    %8 = arith.addf %3, %7 : vector<16x64xf32>
    %c0_6 = arith.constant 0 : index
    %c0_7 = arith.constant 0 : index
    %9 = vector.load %arg7[%c0_6, %c0_7] : memref<16x64xf32, #tpu.memory_space<vmem>>, vector<16x64xf32>
    tpu.vector_store %arg7[%c0_6, %c0_7], %8 {strides = array<i32>} : memref<16x64xf32, #tpu.memory_space<vmem>>, vector<16x64xf32>,
    %c0_i32_8 = arith.constant 0 : i32
    %10 = arith.cmpi eq, %arg2, %c0_i32_8 : i32
    %11 = arith.extui %10 : i1 to i32
    %c0_i32_9 = arith.constant 0 : i32
    %12 = arith.cmpi ne, %11, %c0_i32_9 : i32
    scf.if %12 {
      %c0_10 = arith.constant 0 : index
      %c0_11 = arith.constant 0 : index
      %13 = vector.load %arg7[%c0_10, %c0_11] : memref<16x64xf32, #tpu.memory_space<vmem>>, vector<16x64xf32>
      %c0_12 = arith.constant 0 : index
      %c0_13 = arith.constant 0 : index
      %14 = vector.load %arg5[%c0_12, %c0_13] : memref<1x64xf32, #tpu.memory_space<vmem>>, vector<1x64xf32>
      %15 = vector.broadcast %14 : vector<1x64xf32> to vector<16x64xf32>
      %16 = arith.addf %13, %15 : vector<16x64xf32>
      %c0_14 = arith.constant 0 : index
      %c0_15 = arith.constant 0 : index
      %17 = vector.load %arg6[%c0_14, %c0_15] : memref<16x64xf32, #tpu.memory_space<vmem>>, vector<16x64xf32>
      tpu.vector_store %arg6[%c0_14, %c0_15], %16 {strides = array<i32>} : memref<16x64xf32, #tpu.memory_space<vmem>>, vector<16x64xf32>,
    } else {
    }
    return
  }
  func.func @transform_0(%arg0: i32, %arg1: i32, %arg2: i32) -> (i32, i32) {
    %c0_i32 = arith.constant 0 : i32
    return %arg0, %arg2 : i32, i32
  }
  func.func @transform_1(%arg0: i32, %arg1: i32, %arg2: i32) -> (i32, i32) {
    %c0_i32 = arith.constant 0 : i32
    return %arg2, %arg1 : i32, i32
  }
  func.func @transform_2(%arg0: i32, %arg1: i32, %arg2: i32) -> (i32, i32) {
    %c0_i32 = arith.constant 0 : i32
    %c0_i32_0 = arith.constant 0 : i32
    return %c0_i32, %arg1 : i32, i32
  }
  func.func @transform_3(%arg0: i32, %arg1: i32, %arg2: i32) -> (i32, i32) {
    %c0_i32 = arith.constant 0 : i32
    return %arg0, %arg1 : i32, i32
  }
}

</mosaic_0001>

<bundles_post_ra>
// kernel: transformer_forward.19
= control target key start
LH: loop header
LB: loop body
LE: loop exit
PB: predicated region body
PF: predicated region fallthrough
CT: control target
= control target key end

     0   :  { %vm19_vm0 = vcmask 785408   ;;  %v145_v0 = vmov 0.0   ;;  %vm146_vm1 = vmmov 0   ;;  %vm43_vm2 = vcmask 261120   ;;  %s192_s1 = inlined_call_operand.vmem [shape: bf16[32,96], index: 1, kind: input, shape index: {}]   ;;  %s193_s0 = inlined_call_operand.vmem [shape: f32[16,32], index: 0, kind: input, shape index: {}]   ;;  %s194_s2 = inlined_call_operand.vmem [shape: f32[1,96], index: 2, kind: input, shape index: {}]   ;;  %s195_s3 = inlined_call_operand.vmem [shape: bf16[16,96], index: 3, kind: output, shape index: {}]  }
   0x1   :  { %133 = vmatprep.subr.bf16.mxu0 %v145_v0  ;;  %v143_v1 = vld [vmem:[%s192_s1 + $0x8] sm:$0xff]   ;;  %137 = vmatprep.mubr.msk.bf16.mxu0 %vm146_vm1, %v145_v0  ;;  %20 = vst.msk [vmem:[#allocation2] sm:$0xff] %vm19_vm0, %v145_v0  ;;  %21 = vst.msk [vmem:[#allocation2 + $0x8] sm:$0xff] %vm19_vm0, %v145_v0  ;;  %v144_v2 = vld [vmem:[%s192_s1] sm:$0xff]   ;;  %vm115_vm3 = vcmask 781312  }
   0x2   :  { %134 = vmatpush3.bf16.msra.mxu0 %v143_v1  ;;  %v24_v3 = vld [vmem:[%s193_s0] sm:$0xff]  ;;  %v25_v4 = vld [vmem:[%s193_s0 + $0x8] sm:$0xff] }
   0x3   :  { %135 = vmatprep.subr.bf16.mxu0 %v145_v0  ;;  %v26_v5 = vpack.c.bf16 %v25_v4, %v24_v3  ;;  %v125_v14 = vld [vmem:[%s194_s2] ss:$0 sm:$0xff] }
   0x6   :  { %136 = vmatpush3.bf16.msra.mxu0 %v144_v2 }
   0x8   :  { %v22_v6 = vld [vmem:[#allocation2] sm:$0xff]  ;;  %v23_v10 = vld [vmem:[#allocation2 + $0x8] sm:$0xff] }
   0x9   :  { %138 = vmatmul.mubr.msk.bf16.vlgmr.msra.gmra.mxu0 %vm43_vm2, %v26_v5 }
  0xc9   :  { %v81_v7 = vpop.f32.mrf.mxu0 }
  0xca   :  { %v88_v8 = vadd.f32 %v81_v7, %v22_v6 }
  0xcb   :  { %v139_v9 = vpop.f32.mrf.mxu0 }
  0xcc   :  { %91 = vst.msk [vmem:[#allocation2] sm:$0xff] %vm19_vm0, %v88_v8 }
  0xcd   :  { %v84_v11 = vpop.f32.mrf.mxu0 }
  0xce   :  { %v89_v12 = vadd.f32 %v84_v11, %v23_v10 }
  0xcf   :  { %v140_v13 = vpop.f32.mrf.mxu0 }
  0xd0   :  { %92 = vst.msk [vmem:[#allocation2 + $0x8] sm:$0xff] %vm19_vm0, %v89_v12 }
  0xd3   :  { %v96_v15 = vld [vmem:[#allocation2] sm:$0xff] }
  0xd4   :  { %v105_v16 = vadd.f32 %v125_v14, %v96_v15 }
  0xd6   :  { %v128_v17 = vpack.c.bf16 %v105_v16, %v105_v16 }
  0xd7   :  { %v97_v18 = vld [vmem:[#allocation2 + $0x8] sm:$0xff] }
  0xd8   :  { %116 = vst.msk [vmem:[%s195_s3] sm:$0xf] %vm115_vm3, %v128_v17  ;;  %v106_v19 = vadd.f32 %v125_v14, %v97_v18 }
  0xda   :  { %v129_v20 = vpack.c.bf16 %v106_v19, %v106_v19 }
  0xdc   :  { %117 = vst.msk [vmem:[%s195_s3 + $0x4] sm:$0xf] %vm115_vm3, %v129_v20 }

// kernel: transformer_forward.21
= control target key start
LH: loop header
LB: loop body
LE: loop exit
PB: predicated region body
PF: predicated region fallthrough
CT: control target
= control target key end

     0   :  { %vm31_vm0 = vcmask 261120   ;;  %v310_v0 = vmov 0.0   ;;  %vm311_vm1 = vmmov 0   ;;  %vm142_vm2 = vcmask 523264   ;;  %s405_s1 = inlined_call_operand.vmem [shape: bf16[32,64], index: 1, kind: input, shape index: {}]   ;;  %s406_s0 = inlined_call_operand.vmem [shape: f32[16,32], index: 0, kind: input, shape index: {}]   ;;  %s407_s3 = inlined_call_operand.vmem [shape: bf16[64,32], index: 3, kind: input, shape index: {}]   ;;  %s408_s2 = inlined_call_operand.vmem [shape: f32[1,64], index: 2, kind: input, shape index: {}]   ;;  %s409_s4 = inlined_call_operand.vmem [shape: f32[1,32], index: 4, kind: input, shape index: {}]   ;;  %s410_s5 = inlined_call_operand.vmem [shape: f32[1,32], index: 5, kind: input, shape index: {}]   ;;  %s411_s6 = inlined_call_operand.vmem [shape: f32[1,32], index: 6, kind: input, shape index: {}]   ;;  %s412_s7 = inlined_call_operand.vmem [shape: f32[16,32], index: 7, kind: output, shape index: {}]  }
   0x1   :  { %278 = vmatprep.subr.bf16.mxu0 %v310_v0  ;;  %v300_v1 = vld [vmem:[%s405_s1 + $0x8] sm:$0xff]   ;;  %282 = vmatprep.mubr.msk.bf16.mxu0 %vm311_vm1, %v310_v0  ;;  %32 = vst.msk [vmem:[#allocation2] sm:$0xff] %vm31_vm0, %v310_v0  ;;  %33 = vst.msk [vmem:[#allocation2 + $0x8] sm:$0xff] %vm31_vm0, %v310_v0  ;;  %v301_v2 = vld [vmem:[%s405_s1] sm:$0xff]  }
   0x2   :  { %286 = vmatprep.subr.bf16.mxu1 %v310_v0  ;;  %294 = vmatprep.mubr.msk.bf16.mxu1 %vm311_vm1, %v310_v0  ;;  %v34_v3 = vld [vmem:[%s406_s0] sm:$0xff]  ;;  %v35_v4 = vld [vmem:[%s406_s0 + $0x8] sm:$0xff]  ;;  %v302_v5 = vld [vmem:[%s407_s3 + $0x18] sm:$0xff]  }
   0x3   :  { %279 = vmatpush3.bf16.msra.mxu0 %v300_v1  ;;  %v36_v6 = vpack.c.bf16 %v35_v4, %v34_v3  ;;  %287 = vmatpush3.bf16.msra.mxu1 %v302_v5  ;;  %v303_v7 = vld [vmem:[%s407_s3 + $0x10] sm:$0xff]   ;;  %v304_v8 = vld [vmem:[%s407_s3 + $0x8] sm:$0xff]   ;;  %v305_v9 = vld [vmem:[%s407_s3] sm:$0xff]  }
   0x4   :  { %280 = vmatprep.subr.bf16.mxu0 %v310_v0  ;;  %288 = vmatprep.subr.bf16.mxu1 %v310_v0  ;;  %v258_v10 = vld [vmem:[%s408_s2] ss:$0 sm:$0xff] }
   0x5   :  { %v267_v29 = vld [vmem:[%s409_s4] ss:$0 sm:$0xff] }
   0x6   :  { %v268_v54 = vld [vmem:[%s410_s5] ss:$0 sm:$0xff] }
   0x7   :  { %281 = vmatpush3.bf16.msra.mxu0 %v301_v2  ;;  %289 = vmatpush3.bf16.msra.mxu1 %v303_v7  ;;  %v269_v56 = vld [vmem:[%s411_s6] ss:$0 sm:$0xff] }
   0x8   :  { %290 = vmatprep.subr.bf16.mxu1 %v310_v0  ;;  %v107_v20 = vld [vmem:[#allocation2] sm:$0xff]  ;;  %v108_v24 = vld [vmem:[#allocation2 + $0x8] sm:$0xff] }
   0xa   :  { %283 = vmatmul.mubr.msk.bf16.vlgmr.msra.gmra.mxu0 %vm31_vm0, %v36_v6 }
   0xb   :  { %291 = vmatpush3.bf16.msra.mxu1 %v304_v8 }
   0xc   :  { %292 = vmatprep.subr.bf16.mxu1 %v310_v0 }
   0xf   :  { %293 = vmatpush3.bf16.msra.mxu1 %v305_v9 }
  0xca   :  { %v98_v11 = vpop.f32.mrf.mxu0 }
  0xcb   :  { %v99_v13 = vadd.f32 %v258_v10, %v98_v11 }
  0xcc   :  { %v284_v12 = vpop.f32.mrf.mxu0 }
  0xcd   :  { %v105_v17 = vmax.f32 %v99_v13, 0.0 }
  0xce   :  { %v101_v14 = vpop.f32.mrf.mxu0 }
  0xcf   :  { %v102_v15 = vadd.f32 %v258_v10, %v101_v14 }
  0xd0   :  { %v285_v16 = vpop.f32.mrf.mxu0 }
  0xd1   :  { %v106_v18 = vmax.f32 %v102_v15, 0.0 }
  0xd3   :  { %v109_v19 = vpack.c.bf16 %v106_v18, %v105_v17 }
  0xd5   :  { %295 = vmatmul.mubr.msk.bf16.vlgmr.msra.gmra.mxu1 %vm142_vm2, %v109_v19 }
 0x195   :  { %v180_v21 = vpop.f32.mrf.mxu1 }
 0x196   :  { %v187_v22 = vadd.f32 %v180_v21, %v107_v20 }
 0x197   :  { %v296_v23 = vpop.f32.mrf.mxu1 }
 0x198   :  { %189 = vst.msk [vmem:[#allocation2] sm:$0xff] %vm31_vm0, %v187_v22 }
 0x199   :  { %v183_v25 = vpop.f32.mrf.mxu1 }
 0x19a   :  { %v188_v26 = vadd.f32 %v183_v25, %v108_v24 }
 0x19b   :  { %v297_v27 = vpop.f32.mrf.mxu1 }
 0x19c   :  { %190 = vst.msk [vmem:[#allocation2 + $0x8] sm:$0xff] %vm31_vm0, %v188_v26 }
 0x19f   :  { %v194_v28 = vld [vmem:[#allocation2] sm:$0xff] }
 0x1a0   :  { %v196_v30 = vadd.f32 %v194_v28, %v34_v3 }
 0x1a2   :  { %v205_v31 = vadd.f32 %v267_v29, %v196_v30 }
 0x1a3   :  { %v195_v32 = vld [vmem:[#allocation2 + $0x8] sm:$0xff] }
 0x1a4   :  { %v207_v33 = vsel %vm31_vm0, %v205_v31, 0.0  ;;  %v197_v34 = vadd.f32 %v195_v32, %v35_v4 }
 0x1a5   :  { %208 = vadd.xlane.f32.xlu0 %v207_v33 }
 0x1a6   :  { %v206_v35 = vadd.f32 %v267_v29, %v197_v34 }
 0x1a8   :  { %v210_v36 = vsel %vm31_vm0, %v206_v35, 0.0 }
 0x1a9   :  { %211 = vadd.xlane.f32.xlu0 %v210_v36 }
 0x22e   :  { %v209_v37 = vpop.xlane.xlu0 %208 }
 0x22f   :  { %v214_v38 = vmul.f32 0.03125, %v209_v37 }
 0x231   :  { %v216_v39 = vsub.f32 %v205_v31, %v214_v38 }
 0x232   :  { %v212_v40 = vpop.xlane.xlu0 %211 }
 0x233   :  { %v215_v41 = vmul.f32 0.03125, %v212_v40  ;;  %v218_v42 = vmul.f32 %v216_v39, %v216_v39 }
 0x235   :  { %v217_v43 = vsub.f32 %v206_v35, %v215_v41  ;;  %v220_v44 = vsel %vm31_vm0, %v218_v42, 0.0 }
 0x236   :  { %221 = vadd.xlane.f32.xlu1 %v220_v44 }
 0x237   :  { %v219_v45 = vmul.f32 %v217_v43, %v217_v43 }
 0x239   :  { %v223_v46 = vsel %vm31_vm0, %v219_v45, 0.0 }
 0x23a   :  { %224 = vadd.xlane.f32.xlu1 %v223_v46 }
 0x2bf   :  { %v222_v47 = vpop.xlane.xlu1 %221 }
 0x2c0   :  { %v226_v48 = vmul.f32 0.03125, %v222_v47 }
 0x2c2   :  { %v228_v49 = vadd.f32 1e-05, %v226_v48 }
 0x2c3   :  { %v225_v50 = vpop.xlane.xlu1 %224 }
 0x2c4   :  { %306 = vrsqrt.f32 %v228_v49  ;;  %v227_v51 = vmul.f32 0.03125, %v225_v50 }
 0x2c6   :  { %v229_v52 = vadd.f32 1e-05, %v227_v51 }
 0x2c8   :  { %308 = vrsqrt.f32 %v229_v52 }
 0x2d1   :  { %v307_v53 = vpop.eup %306 }
 0x2d2   :  { %v232_v55 = vmul.f32 %v307_v53, %v216_v39 }
 0x2d4   :  { %v241_v57 = vmul.f32 %v268_v54, %v232_v55 }
 0x2d5   :  { %v309_v58 = vpop.eup %308 }
 0x2d6   :  { %v250_v59 = vadd.f32 %v269_v56, %v241_v57  ;;  %v233_v60 = vmul.f32 %v309_v58, %v217_v43 }
 0x2d8   :  { %252 = vst.msk [vmem:[%s412_s7] sm:$0xff] %vm31_vm0, %v250_v59  ;;  %v242_v61 = vmul.f32 %v268_v54, %v233_v60 }
 0x2da   :  { %v251_v62 = vadd.f32 %v269_v56, %v242_v61 }
 0x2dc   :  { %253 = vst.msk [vmem:[%s412_s7 + $0x8] sm:$0xff] %vm31_vm0, %v251_v62 }

// kernel: transformer_forward.28
= control target key start
LH: loop header
LB: loop body
LE: loop exit
PB: predicated region body
PF: predicated region fallthrough
CT: control target
= control target key end

     0   :  { %vm19_vm0 = vcmask 523264   ;;  %v145_v0 = vmov 0.0   ;;  %vm146_vm1 = vmmov 0   ;;  %vm43_vm2 = vcmask 261120   ;;  %s192_s1 = inlined_call_operand.vmem [shape: bf16[32,64], index: 1, kind: input, shape index: {}]   ;;  %s193_s0 = inlined_call_operand.vmem [shape: f32[16,32], index: 0, kind: input, shape index: {}]   ;;  %s194_s2 = inlined_call_operand.vmem [shape: f32[1,64], index: 2, kind: input, shape index: {}]   ;;  %s195_s3 = inlined_call_operand.vmem [shape: bf16[16,64], index: 3, kind: output, shape index: {}]  }
   0x1   :  { %133 = vmatprep.subr.bf16.mxu0 %v145_v0  ;;  %v143_v1 = vld [vmem:[%s192_s1 + $0x8] sm:$0xff]   ;;  %137 = vmatprep.mubr.msk.bf16.mxu0 %vm146_vm1, %v145_v0  ;;  %20 = vst.msk [vmem:[#allocation2] sm:$0xff] %vm19_vm0, %v145_v0  ;;  %21 = vst.msk [vmem:[#allocation2 + $0x8] sm:$0xff] %vm19_vm0, %v145_v0  ;;  %v144_v2 = vld [vmem:[%s192_s1] sm:$0xff]   ;;  %vm115_vm3 = vcmask 519168  }
   0x2   :  { %134 = vmatpush3.bf16.msra.mxu0 %v143_v1  ;;  %v24_v3 = vld [vmem:[%s193_s0] sm:$0xff]  ;;  %v25_v4 = vld [vmem:[%s193_s0 + $0x8] sm:$0xff] }
   0x3   :  { %135 = vmatprep.subr.bf16.mxu0 %v145_v0  ;;  %v26_v5 = vpack.c.bf16 %v25_v4, %v24_v3  ;;  %v125_v14 = vld [vmem:[%s194_s2] ss:$0 sm:$0xff] }
   0x6   :  { %136 = vmatpush3.bf16.msra.mxu0 %v144_v2 }
   0x8   :  { %v22_v6 = vld [vmem:[#allocation2] sm:$0xff]  ;;  %v23_v10 = vld [vmem:[#allocation2 + $0x8] sm:$0xff] }
   0x9   :  { %138 = vmatmul.mubr.msk.bf16.vlgmr.msra.gmra.mxu0 %vm43_vm2, %v26_v5 }
  0xc9   :  { %v81_v7 = vpop.f32.mrf.mxu0 }
  0xca   :  { %v88_v8 = vadd.f32 %v81_v7, %v22_v6 }
  0xcb   :  { %v139_v9 = vpop.f32.mrf.mxu0 }
  0xcc   :  { %91 = vst.msk [vmem:[#allocation2] sm:$0xff] %vm19_vm0, %v88_v8 }
  0xcd   :  { %v84_v11 = vpop.f32.mrf.mxu0 }
  0xce   :  { %v89_v12 = vadd.f32 %v84_v11, %v23_v10 }
  0xcf   :  { %v140_v13 = vpop.f32.mrf.mxu0 }
  0xd0   :  { %92 = vst.msk [vmem:[#allocation2 + $0x8] sm:$0xff] %vm19_vm0, %v89_v12 }
  0xd3   :  { %v96_v15 = vld [vmem:[#allocation2] sm:$0xff] }
  0xd4   :  { %v105_v16 = vadd.f32 %v125_v14, %v96_v15 }
  0xd6   :  { %v128_v17 = vpack.c.bf16 %v105_v16, %v105_v16 }
  0xd7   :  { %v97_v18 = vld [vmem:[#allocation2 + $0x8] sm:$0xff] }
  0xd8   :  { %116 = vst.msk [vmem:[%s195_s3] sm:$0xf] %vm115_vm3, %v128_v17  ;;  %v106_v19 = vadd.f32 %v125_v14, %v97_v18 }
  0xda   :  { %v129_v20 = vpack.c.bf16 %v106_v19, %v106_v19 }
  0xdc   :  { %117 = vst.msk [vmem:[%s195_s3 + $0x4] sm:$0xf] %vm115_vm3, %v129_v20 }

// kernel: transformer_forward.20
= control target key start
LH: loop header
LB: loop body
LE: loop exit
PB: predicated region body
PF: predicated region fallthrough
CT: control target
= control target key end

     0   :  { %s1888_s0 = inlined_call_operand.vmem [shape: bf16[2,8,32], index: 0, kind: input, shape index: {}]   ;;  %s1889_s1 = inlined_call_operand.vmem [shape: bf16[2,8,32], index: 1, kind: input, shape index: {}]   ;;  %s1890_s2 = inlined_call_operand.vmem [shape: bf16[2,8,32], index: 2, kind: input, shape index: {}]   ;;  %s1891_s3 = inlined_call_operand.vmem [shape: f32[2,1,8], index: 3, kind: input, shape index: {}]   ;;  %s1892_s4 = inlined_call_operand.vmem [shape: bf16[32,32], index: 4, kind: input, shape index: {}]   ;;  %s1893_s5 = inlined_call_operand.vmem [shape: f32[1,32], index: 5, kind: input, shape index: {}]   ;;  %s1894_s6 = inlined_call_operand.vmem [shape: f32[2,8,32], index: 6, kind: input, shape index: {}]   ;;  %s1895_s7 = inlined_call_operand.vmem [shape: f32[1,32], index: 7, kind: input, shape index: {}]   ;;  %s1896_s8 = inlined_call_operand.vmem [shape: f32[1,32], index: 8, kind: input, shape index: {}]   ;;  %s1897_s9 = inlined_call_operand.vmem [shape: f32[2,8,32], index: 9, kind: output, shape index: {0}]   ;;  %s1898_s10 = inlined_call_operand.hbm [shape: f32[2,4,8,8], index: 10, kind: output, shape index: {1}]  }
   0x1   :  { %1902 = sst [smem:[#allocation6_spill]] %s1888_s0 }
   0x2   :  { %1903 = sst [smem:[#allocation7_spill]] %s1889_s1 }
   0x3   :  { %16 = vsyncpa [#allocation4], 0 }
   0x4   :  { %18 = vsyncpa [#allocation4 + $0x1], 0  ;;  %s1629_s13 = smov 0   ;;  %s1631_s14 = smov 0  }
   0x5   :  { %s1633_s15 = smov 0   ;;  %s1635_s16 = smov 0  }
   0x6   :  { %s1637_s17 = smov 0   ;;  %s1639_s18 = smov 0  }
   0x7 LB: > { %s1274_s19 = sadd.s32 4294967295, %s1562_s18   ;;  %s1275_s20 = sadd.s32 4294967294, %s1562_s18   ;;  %s1562_s18 = sphi %s1639_s18, %s24_s18   ;;  %s1558_s17 = sphi %s1637_s17, %s1915_s17   ;;  %s1554_s16 = sphi %s1635_s16, %s1914_s16   ;;  %s1550_s15 = sphi %s1633_s15, %s1913_s15   ;;  %s1546_s14 = sphi %s1631_s14, %s1912_s14   ;;  %s1542_s13 = sphi %s1629_s13, %s1911_s13  }
   0x8   : > { %s36_s21 = sadd.s32 1, %s1558_s17  ;;  %s291_s22 = sadd.s32 1, %s1550_s15 }
   0x9   : > { %p38_p0 = scmp.ge.s32.totalorder %s36_s21, 2  ;;  %p301_p1 = scmp.ne.s32.totalorder %s1550_s15, %s1546_s14 }
   0xa   : > { %p302_p2 = scmp.eq.s32.totalorder %s1274_s19, 1  ;;  %p307_p3 = scmp.ne.s32.totalorder %s1546_s14, %s1542_s13 }
   0xb   : > { %s1917_s21 = smov (%p38_p0, %s36_s21), 0  ;;  %p308_p5 = scmp.eq.s32.totalorder %s1275_s20, 1 }
   0xc   : > { %p1669_p4 = por %p302_p2, %p301_p1  ;;  %s286_s24 = ssub.s32 %s1558_s17, %s1917_s21 }
   0xd   : > { %p1278_p6 = scmp.ge.s32.totalorder %s1562_s18, 1  ;;  %p289_p7 = scmp.eq.s32.totalorder %s286_s24, 0 }
   0xe   : > { %p1676_p8 = por %p308_p5, %p307_p3  ;;  %p378_p9 = scmp.lt.s32.totalorder %s1562_s18, 3 }
   0xf   : > { %s1682_s26 = scalar_select %p289_p7, %s1550_s15, %s291_s22  }
  0x10   : > { %p379_p10 = pnand %p1278_p6, %p378_p9 }
  0x11   : > { %p443_p11 = scmp.lt.s32.totalorder (!%p379_p10), %s1554_s16, 1  ;;  %s1906_s1 = sld [smem:[#allocation7_spill]] (!%p379_p10) }
  0x12   : > { %382 = sbr.rel (%p379_p10) target bundleno = 1943 (0x797), region = 56  ;;  %s1907_s0 = sld [smem:[#allocation6_spill]] (!%p379_p10) }
  0x13   : > { %s1566_s30 = smov (!%p379_p10), 120   ;;  %s1567_s12 = smov (!%p379_p10), 112  }
  0x14   : > { %s1899_s19 = smov (!%p379_p10), 104  }
  0x17   : > { %v1564_v0 = vmov 0.0   ;;  %vm1565_vm0 = vmmov 0   ;;  %s1689_s27 = scalar_select %p443_p11, %s1554_s16, 1  ;;  %vm487_vm1 = vcmask 64512   ;;  %vm552_vm2 = vcmask 1043456  }
  0x18   : > { %1337 = vmatprep.subr.bf16.mxu0 %v1564_v0  ;;  %1339 = vmatprep.mubr.msk.bf16.mxu0 %vm1565_vm0, %v1564_v0  ;;  %vm727_vm3 = vcmask 130112   ;;  %vm859_vm4 = vcmask 195712   ;;  %vm991_vm5 = vcmask 261312   ;;  %vm1018_vm6 = vcmask 261120  }
  0x19   : > { %1343 = vmatprep.subr.bf16.mxu1 %v1564_v0  ;;  %1345 = vmatprep.mubr.msk.bf16.mxu1 %vm1565_vm0, %v1564_v0  ;;  %s1695_s28 = sshll.u32 %s1689_s27, 2  ;;  %s460_s29 = scalar_lea.vmem %s1891_s3, %s1689_s27 }
  0x1a   : > { %s1701_s11 = scalar_lea.vmem %s1906_s1, %s1695_s28  ;;  %s449_s20 = scalar_lea.vmem %s1907_s0, %s1695_s28  ;;  %v1285_v4 = vld [vmem:[%s460_s29] ss:$0 sm:$0xff] }
  0x1b   : > { %v485_v1 = vld [vmem:[%s1701_s11] sm:$0xf]  ;;  %v1717_v5 = vmul.f32 -1e+09, %v1285_v4  ;;  %s1733_s29 = scalar_lea.vmem %s1890_s2, %s1695_s28 }
  0x1c   : > { %v492_v2 = vsel %vm487_vm1, %v485_v1, 0  ;;  %v484_v3 = vld [vmem:[%s449_s20] sm:$0xf] }
  0x1d   : > { %1338 = vmatpush3.bf16.xpose.msra.mxu0 %v492_v2  ;;  %v1457_v13 = vld [vmem:[%s1701_s11] ss:$0 sps:$4 sm:$0xff]  }
  0x1e   : > { %1355 = vmatprep.subr.bf16.mxu0 %v1564_v0  ;;  %608 = vrot.lane.b32.xlu1 %v1457_v13, %s1566_s30  ;;  %v1458_v14 = vld [vmem:[%s449_s20] ss:$0 sps:$4 sm:$0xff]  }
  0x1f   : > { %v1460_v15 = vld [vmem:[%s449_s20] ss:$0 sps:$4 sm:$0xff]  }
  0x20   : > { %v1461_v16 = vld [vmem:[%s1701_s11] ss:$0 sps:$4 sm:$0xff]  }
  0x21   : > { %v1462_v17 = vld [vmem:[%s449_s20] ss:$0 sps:$4 sm:$0xff]   ;;  %s440_s20 = sand.u32 1, %s1546_s14  }
  0x22   : > { %603 = vrot.lane.b32.xlu1 %v1458_v14, %s1566_s30  ;;  %v486_v23 = vld [vmem:[%s1733_s29] sm:$0xf] }
  0x23   : > { %v554_v24 = vsel %vm552_vm2, %v486_v23, 0  ;;  %v1459_v25 = vld [vmem:[%s1701_s11] ss:$0 sps:$4 sm:$0xff]   ;;  %s1908_s11 = smov 104  }
  0x24   : > { %1340 = vmatmul.mubr.msk.bf16.vlgmr.msra.gmra.mxu0 %vm487_vm1, %v484_v3  ;;  %1344 = vmatpush3.bf16.msra.mxu1 %v554_v24  ;;  %v1464_v13 = vld [vmem:[%s1733_s29] ss:$0 sps:$4 sm:$0xff]  }
  0x25   : > { %1357 = vmatprep.mubr.msk.bf16.mxu0 %vm1565_vm0, %v1564_v0  ;;  %1349 = vmatprep.subr.bf16.mxu1 %v1564_v0 }
  0x26   : > { %735 = vrot.lane.b32.xlu1 %v1460_v15, %s1567_s12 }
  0x2a   : > { %872 = vrot.lane.b32.xlu1 %v1461_v16, %s1899_s19 }
  0x2e   : > { %867 = vrot.lane.b32.xlu1 %v1462_v17, %s1899_s19  ;;  %s1279_s19 = sshll.u32 %s440_s20, 5 }
  0x2f   : > { %s1744_s28 = scalar_lea.vmem [#allocation3], %s1279_s19  ;;  %s1317_s19 = sshll.u32 %s1554_s16, 9 }
  0x30   : > { %s1120_s22 = sshll.u32 %s1744_s28, 4  ;;  %s1572_s16 = smov [#allocation3]   ;;  %s1826_s22 = int_to_ptr.vmem [resolvable:$true] %s1120_s22 }
  0x90   : > { %v609_v28 = vpop.permute.xlu1 %608 }
  0x91   : > { %v614_v30 = vsel %vm487_vm1, %v609_v28, 0 }
  0x94   : > { %v604_v32 = vpop.permute.xlu1 %603 }
  0x98   : > { %v736_v34 = vpop.permute.xlu1 %735 }
  0x9c   : > { %v873_v36 = vpop.permute.xlu1 %872 }
  0x9d   : > { %v878_v37 = vsel %vm487_vm1, %v873_v36, 0 }
  0xa0   : > { %v868_v38 = vpop.permute.xlu1 %867 }
  0xe4   : > { %v528_v6 = vpop.f32.mrf.mxu0 }
  0xe5   : > { %v534_v7 = vmul.f32 0.35355338, %v528_v6 }
  0xe6   : > { %v1341_v8 = vpop.f32.mrf.mxu0 }
  0xe7   : > { %v535_v9 = vadd.f32 %v534_v7, %v1717_v5 }
  0xe8   : > { %v531_v10 = vpop.f32.mrf.mxu0 }
  0xe9   : > { %v536_v11 = vsel %vm487_vm1, %v535_v9, -inf }
  0xea   : > { %537 = vmax.xlane.f32.xlu0 %v536_v11  ;;  %v1342_v12 = vpop.f32.mrf.mxu0  ;;  %v1463_v11 = vld [vmem:[%s1733_s29] ss:$0 sps:$4 sm:$0xff]  }
 0x173   : > { %v538_v18 = vpop.xlane.xlu0 %537 }
 0x174   : > { %v539_v19 = vsub.f32 %v535_v9, %v538_v18  ;;  %v1465_v18 = vld [vmem:[%s1733_s29] ss:$0 sps:$4 sm:$0xff]  }
 0x176   : > { %v540_v20 = vmul.f32 1.442695, %v539_v19 }
 0x178   : > { %1468 = vpow2.f32 %v540_v20 }
 0x185   : > { %v1469_v21 = vpop.eup %1468 }
 0x186   : > { %v542_v22 = vsel %vm487_vm1, %v1469_v21, 0.0 }
 0x187   : > { %543 = vadd.xlane.f32.xlu0 %v542_v22 }
 0x19d   : > { %740 = vrot.lane.b32.xlu0 %v1459_v25, %s1567_s12 }
 0x210   : > { %v544_v26 = vpop.xlane.xlu0 %543 }
 0x211   : > { %1470 = vrcp.f32 %v544_v26 }
 0x214   : > { %v741_v33 = vpop.permute.xlu0 %740 }
 0x215   : > { %v746_v35 = vsel %vm487_vm1, %v741_v33, 0 }
 0x21e   : > { %v1471_v27 = vpop.eup %1470 }
 0x21f   : > { %v546_v29 = vmul.f32 %v1471_v27, %v1469_v21 }
 0x221   : > { %547 = vst.msk [vmem:[%s1744_s28] sm:$0xff] %vm487_vm1, %v546_v29  ;;  %v548_v31 = vpack.c.bf16 %v546_v29, %v546_v29 }
 0x223   : > { %1346 = vmatmul.mubr.msk.bf16.vlgmr.msra.gmra.mxu1 %vm487_vm1, %v548_v31 }
 0x224   : > { %1350 = vmatpush3.bf16.xpose.msra.mxu1 %v614_v30  ;;  %1351 = vmatprep.mubr.msk.bf16.mxu1 %vm1565_vm0, %v1564_v0 }
 0x225   : > { %1361 = vmatprep.subr.bf16.mxu1 %v1564_v0 }
 0x22b   : > { %1352 = vmatmul.mubr.msk.bf16.vlgmr.msra.gmra.mxu1 %vm487_vm1, %v604_v32 }
 0x22c   : > { %1362 = vmatpush3.bf16.xpose.msra.mxu1 %v746_v35  ;;  %1363 = vmatprep.mubr.msk.bf16.mxu1 %vm1565_vm0, %v1564_v0 }
 0x22d   : > { %1373 = vmatprep.subr.bf16.mxu1 %v1564_v0 }
 0x233   : > { %1364 = vmatmul.mubr.msk.bf16.vlgmr.msra.gmra.mxu1 %vm487_vm1, %v736_v34 }
 0x234   : > { %1374 = vmatpush3.bf16.xpose.msra.mxu1 %v878_v37  ;;  %1375 = vmatprep.mubr.msk.bf16.mxu1 %vm1565_vm0, %v1564_v0 }
 0x235   : > { %1385 = vmatprep.subr.bf16.mxu1 %v1564_v0 }
 0x23b   : > { %1376 = vmatmul.mubr.msk.bf16.vlgmr.msra.gmra.mxu1 %vm487_vm1, %v868_v38 }
 0x23c   : > { %1389 = vmatprep.mubr.msk.bf16.mxu1 %vm1565_vm0, %v1564_v0 }
 0x2e3   : > { %v590_v39 = vpop.f32.mrf.mxu1 }
 0x2e4   : > { %596 = vst.msk [vmem:[#allocation2] sm:$0xff] %vm487_vm1, %v590_v39 }
 0x2e5   : > { %v1347_v40 = vpop.f32.mrf.mxu1 }
 0x2e7   : > { %v593_v41 = vpop.f32.mrf.mxu1 }
 0x2e9   : > { %v1348_v42 = vpop.f32.mrf.mxu1 }
 0x2eb   : > { %v650_v43 = vpop.f32.mrf.mxu1 }
 0x2ec   : > { %v656_v44 = vmul.f32 0.35355338, %v650_v43 }
 0x2ed   : > { %v1353_v45 = vpop.f32.mrf.mxu1 }
 0x2ee   : > { %v657_v46 = vadd.f32 %v656_v44, %v1717_v5  ;;  %v1466_v45 = vld [vmem:[%s1892_s4 + $0x8] sm:$0xff]  }
 0x2ef   : > { %v653_v47 = vpop.f32.mrf.mxu1  ;;  %1386 = vmatpush3.bf16.msra.mxu1 %v1466_v45 }
 0x2f0   : > { %v658_v48 = vsel %vm487_vm1, %v657_v46, -inf  ;;  %1387 = vmatprep.subr.bf16.mxu1 %v1564_v0 }
 0x2f1   : > { %659 = vmax.xlane.f32.xlu1 %v658_v48  ;;  %v1354_v49 = vpop.f32.mrf.mxu1 }
 0x2f3   : > { %v782_v50 = vpop.f32.mrf.mxu1 }
 0x2f4   : > { %v788_v51 = vmul.f32 0.35355338, %v782_v50 }
 0x2f5   : > { %v1365_v52 = vpop.f32.mrf.mxu1 }
 0x2f6   : > { %v789_v53 = vadd.f32 %v788_v51, %v1717_v5 }
 0x2f7   : > { %v785_v54 = vpop.f32.mrf.mxu1 }
 0x2f8   : > { %v790_v55 = vsel %vm487_vm1, %v789_v53, -inf }
 0x2f9   : > { %791 = vmax.xlane.f32.xlu0 %v790_v55  ;;  %v1366_v56 = vpop.f32.mrf.mxu1  ;;  %v1306_v55 = vld [vmem:[%s1893_s5] ss:$0 sm:$0xff] }
 0x2fb   : > { %v914_v57 = vpop.f32.mrf.mxu1 }
 0x2fc   : > { %v920_v58 = vmul.f32 0.35355338, %v914_v57 }
 0x2fd   : > { %v1377_v59 = vpop.f32.mrf.mxu1 }
 0x2fe   : > { %v921_v60 = vadd.f32 %v920_v58, %v1717_v5 }
 0x2ff   : > { %v917_v61 = vpop.f32.mrf.mxu1 }
 0x300   : > { %v922_v62 = vsel %vm487_vm1, %v921_v60, -inf }
 0x301   : > { %923 = vmax.xlane.f32.xlu1 %v922_v62  ;;  %v1378_v63 = vpop.f32.mrf.mxu1 }
 0x37a   : > { %v660_v1 = vpop.xlane.xlu1 %659 }
 0x37b   : > { %v661_v2 = vsub.f32 %v657_v46, %v660_v1  ;;  %v1467_v46 = vld [vmem:[%s1892_s4] sm:$0xff]  }
 0x37c   : > { %1388 = vmatpush3.bf16.msra.mxu1 %v1467_v46 }
 0x37d   : > { %v662_v3 = vmul.f32 1.442695, %v661_v2 }
 0x37f   : > { %1472 = vpow2.f32 %v662_v3 }
 0x382   : > { %v792_v4 = vpop.xlane.xlu0 %791 }
 0x383   : > { %v793_v6 = vsub.f32 %v789_v53, %v792_v4 }
 0x385   : > { %v794_v7 = vmul.f32 1.442695, %v793_v6 }
 0x387   : > { %1474 = vpow2.f32 %v794_v7 }
 0x38a   : > { %v924_v12 = vpop.xlane.xlu1 %923 }
 0x38b   : > { %v925_v14 = vsub.f32 %v921_v60, %v924_v12 }
 0x38c   : > { %v1473_v8 = vpop.eup %1472 }
 0x38d   : > { %v664_v9 = vsel %vm487_vm1, %v1473_v8, 0.0  ;;  %v926_v15 = vmul.f32 1.442695, %v925_v14 }
 0x38e   : > { %665 = vadd.xlane.f32.xlu1 %v664_v9 }
 0x38f   : > { %1476 = vpow2.f32 %v926_v15 }
 0x394   : > { %v1475_v5 = vpop.eup %1474 }
 0x395   : > { %v796_v10 = vsel %vm487_vm1, %v1475_v5, 0.0 }
 0x396   : > { %797 = vadd.xlane.f32.xlu0 %v796_v10 }
 0x39c   : > { %v1477_v16 = vpop.eup %1476 }
 0x39d   : > { %v928_v17 = vsel %vm487_vm1, %v1477_v16, 0.0 }
 0x39f   : > { %807 = vrot.lane.b32.xlu1 %v1463_v11, %s1567_s12  ;;  %s1570_s12 = smov 16  }
 0x3ac   : > { %675 = vrot.lane.b32.xlu0 %v1464_v13, %s1566_s30  ;;  %s1901_s30 = smov 8  }
 0x3c3   : > { %929 = vadd.xlane.f32.xlu1 %v928_v17 }
 0x3d4   : > { %939 = vrot.lane.b32.xlu1 %v1465_v18, %s1908_s11  ;;  %s1571_s11 = smov 24  }
 0x417   : > { %v666_v19 = vpop.xlane.xlu1 %665 }
 0x418   : > { %1478 = vrcp.f32 %v666_v19 }
 0x41b   : > { %v808_v25 = vpop.permute.xlu1 %807 }
 0x41c   : > { %v813_v27 = vsel %vm552_vm2, %v808_v25, 0 }
 0x41f   : > { %v798_v20 = vpop.xlane.xlu0 %797 }
 0x420   : > { %1480 = vrcp.f32 %v798_v20 }
 0x423   : > { %v676_v21 = vpop.permute.xlu0 %675 }
 0x424   : > { %v681_v22 = vsel %vm552_vm2, %v676_v21, 0 }
 0x425   : > { %v1479_v23 = vpop.eup %1478  ;;  %1356 = vmatpush3.bf16.msra.mxu0 %v681_v22 }
 0x426   : > { %1367 = vmatprep.subr.bf16.mxu0 %v1564_v0  ;;  %v668_v24 = vmul.f32 %v1479_v23, %v1473_v8 }
 0x428   : > { %1291 = vst.msk [vmem:[%s1744_s28 + $0x8] sm:$0xff] %vm487_vm1, %v668_v24  ;;  %v671_v26 = vpack.c.bf16 %v668_v24, %v668_v24 }
 0x42a   : > { %1358 = vmatmul.mubr.msk.bf16.vlgmr.msra.gmra.mxu0 %vm487_vm1, %v671_v26 }
 0x42b   : > { %1368 = vmatpush3.bf16.msra.mxu0 %v813_v27  ;;  %1369 = vmatprep.mubr.msk.bf16.mxu0 %vm1565_vm0, %v1564_v0 }
 0x42c   : > { %1379 = vmatprep.subr.bf16.mxu0 %v1564_v0 }
 0x42d   : > { %v1481_v28 = vpop.eup %1480 }
 0x42e   : > { %v800_v29 = vmul.f32 %v1481_v28, %v1475_v5 }
 0x430   : > { %1297 = vst.msk [vmem:[%s1744_s28 + $0x10] sm:$0xff] %vm487_vm1, %v800_v29  ;;  %v803_v30 = vpack.c.bf16 %v800_v29, %v800_v29 }
 0x432   : > { %1370 = vmatmul.mubr.msk.bf16.vlgmr.msra.gmra.mxu0 %vm487_vm1, %v803_v30 }
 0x433   : > { %1381 = vmatprep.mubr.msk.bf16.mxu0 %vm1565_vm0, %v1564_v0 }
 0x44c   : > { %v930_v31 = vpop.xlane.xlu1 %929 }
 0x44d   : > { %1482 = vrcp.f32 %v930_v31 }
 0x450   : > { %v940_v32 = vpop.permute.xlu1 %939 }
 0x451   : > { %v945_v33 = vsel %vm552_vm2, %v940_v32, 0 }
 0x452   : > { %1380 = vmatpush3.bf16.msra.mxu0 %v945_v33 }
 0x45a   : > { %v1483_v34 = vpop.eup %1482 }
 0x45b   : > { %v932_v35 = vmul.f32 %v1483_v34, %v1477_v16 }
 0x45d   : > { %1303 = vst.msk [vmem:[%s1744_s28 + $0x18] sm:$0xff] %vm487_vm1, %v932_v35  ;;  %v935_v36 = vpack.c.bf16 %v932_v35, %v932_v35  ;;  %s1490_s28 = sshll.u32 %s1572_s16, 4  ;;  %s1491_s28 = int_to_ptr.vmem [resolvable:$false] %s1490_s28 }
 0x45e   : > { %s1492_s0 = scalar_lea.vmem %s1491_s28, 1024  ;;  %p1493_p1 = scmp.lt.s32.totalorder %s1826_s22, %s1491_s28 }
 0x45f   : > { %1382 = vmatmul.mubr.msk.bf16.vlgmr.msra.gmra.mxu0 %vm487_vm1, %v935_v36 }
 0x4ea   : > { %v717_v37 = vpop.f32.mrf.mxu0 }
 0x4eb   : > { %724 = vrot.lane.b32.xlu0 %v717_v37, %s1901_s30  ;;  %s1486_s30 = scalar_lea.vmem %s1826_s22, 512 }
 0x4ec   : > { %v1359_v38 = vpop.f32.mrf.mxu0  ;;  %p1487_p12 = scmp.ne.s32.totalorder %s1826_s22, %s1486_s30  ;;  %p1494_p2 = scmp.lt.s32.totalorder %s1492_s0, %s1486_s30 }
 0x4ee   : > { %v720_v39 = vpop.f32.mrf.mxu0  ;;  %p1488_p13 = pnand %p1487_p12, %p1669_p4  ;;  %p1495_p3 = por %p1494_p2, %p1493_p1 }
 0x4f0   : > { %v1360_v40 = vpop.f32.mrf.mxu0  ;;  %p1489_p0 = pneg %p1488_p13 }
 0x4f2   : > { %v849_v41 = vpop.f32.mrf.mxu0  ;;  %p1496_p5 = pnand %p1495_p3, %p1489_p0 }
 0x4f3   : > { %856 = vrot.lane.b32.xlu1 %v849_v41, %s1570_s12  ;;  %s1900_s12 = sshll.u32 %s1689_s27, 3 }
 0x4f4   : > { %v1371_v42 = vpop.f32.mrf.mxu0  ;;  %s467_s24 = scalar_lea.vmem %s1894_s6, %s1900_s12  ;;  %s1830_s12 = scalar_lea.sflag [#allocation4], %s440_s20 }
 0x4f5   : > { %v1062_v57 = vld [vmem:[%s467_s24] sm:$0xff] }
 0x4f6   : > { %v852_v43 = vpop.f32.mrf.mxu0 }
 0x4f8   : > { %v1372_v44 = vpop.f32.mrf.mxu0 }
 0x51f   : > { %v981_v47 = vpop.f32.mrf.mxu0 }
 0x520   : > { %988 = vrot.lane.b32.xlu0 %v981_v47, %s1571_s11  ;;  %s1824_s11 = scalar_lea.hbm %s1898_s10, %s1317_s19 }
 0x521   : > { %v1383_v48 = vpop.f32.mrf.mxu0 }
 0x523   : > { %v984_v49 = vpop.f32.mrf.mxu0 }
 0x525   : > { %v1384_v50 = vpop.f32.mrf.mxu0 }
 0x55d   : > { %v725_v51 = vpop.permute.xlu0 %724 }
 0x55e   : > { %728 = vst.msk [vmem:[#allocation2] sm:$0xff] %vm727_vm3, %v725_v51 }
 0x565   : > { %v857_v52 = vpop.permute.xlu1 %856 }
 0x566   : > { %860 = vst.msk [vmem:[#allocation2] sm:$0xff] %vm859_vm4, %v857_v52 }
 0x592   : > { %v989_v53 = vpop.permute.xlu0 %988 }
 0x593   : > { %992 = vst.msk [vmem:[#allocation2] sm:$0xff] %vm991_vm5, %v989_v53 }
 0x59a   : > { %v993_v54 = vld [vmem:[#allocation2] sm:$0xff] }
 0x59b   : > { %v994_v0 = vpack.c.bf16 %v993_v54, %v993_v54 }
 0x59d   : > { %1390 = vmatmul.mubr.msk.bf16.vlgmr.msra.gmra.mxu1 %vm1018_vm6, %v994_v0 }
 0x65d   : > { %v1056_v56 = vpop.f32.mrf.mxu1 }
 0x65e   : > { %v1057_v58 = vadd.f32 %v1306_v55, %v1056_v56 }
 0x65f   : > { %v1391_v59 = vpop.f32.mrf.mxu1 }
 0x660   : > { %v1063_v60 = vadd.f32 %v1062_v57, %v1057_v58 }
 0x661   : > { %v1059_v61 = vpop.f32.mrf.mxu1 }
 0x662   : > { %v1064_v62 = vsel %vm1018_vm6, %v1063_v60, 0.0 }
 0x663   : > { %1065 = vadd.xlane.f32.xlu1 %v1064_v62  ;;  %v1392_v63 = vpop.f32.mrf.mxu1 }
 0x6ec   : > { %v1066_v1 = vpop.xlane.xlu1 %1065 }
 0x6ed   : > { %v1068_v2 = vmul.f32 0.03125, %v1066_v1 }
 0x6ef   : > { %v1069_v3 = vsub.f32 %v1063_v60, %v1068_v2 }
 0x6f1   : > { %v1070_v4 = vmul.f32 %v1069_v3, %v1069_v3 }
 0x6f3   : > { %v1071_v6 = vsel %vm1018_vm6, %v1070_v4, 0.0 }
 0x6f4   : > { %1072 = vadd.xlane.f32.xlu0 %v1071_v6 }
 0x6f5   : > { %1499 = shalt.err (!%p1496_p5)
}
 0x6f6   : > { %s1500_s20 = scalar_lea.hbm %s1824_s11, 512  ;;  %s1504_s29 = scalar_lea.hbm %s1898_s10, 1024 }
 0x6f7   : > { %p1501_p6 = scmp.ne.s32.totalorder %s1824_s11, %s1500_s20  ;;  %p1505_p10 = scmp.lt.s32.totalorder %s1824_s11, %s1898_s10 }
 0x6f8   : > { %p1506_p11 = scmp.lt.s32.totalorder %s1504_s29, %s1500_s20 }
 0x6f9   : > { %p1502_p7 = pnand %p1501_p6, %p1669_p4 }
 0x6fa   : > { %p1507_p12 = por %p1506_p11, %p1505_p10 }
 0x6fb   : > { %p1503_p9 = pneg %p1502_p7 }
 0x6fd   : > { %p1508_p13 = pnand %p1507_p12, %p1503_p9 }
 0x6ff   : > { %1511 = shalt.err (!%p1508_p13)
}
 0x700   : > { %s1573_s0 = smov 128   ;;  %s1909_s30 = smov 8   ;;  %v1310_v10 = vld [vmem:[%s1895_s7] ss:$0 sm:$0xff] }
 0x701   : > { %1393 = dma.vmem_to_hbm [thread:$0]  (%p1669_p4), %s1826_s22, 512, %s1824_s11, %s1830_s12, %s1573_s0, %s1573_s0, %s1909_s30  }
 0x702   : > { %v1311_v12 = vld [vmem:[%s1896_s8] ss:$0 sm:$0xff]  ;;  %s1910_s23 = sshll.u32 %s1689_s27, 3 }
 0x703   : > { %s474_s12 = scalar_lea.vmem %s1897_s9, %s1910_s23 }
 0x77d   : > { %v1073_v7 = vpop.xlane.xlu0 %1072 }
 0x77e   : > { %v1074_v8 = vmul.f32 0.03125, %v1073_v7 }
 0x780   : > { %v1075_v9 = vadd.f32 1e-05, %v1074_v8 }
 0x782   : > { %1484 = vrsqrt.f32 %v1075_v9 }
 0x78f   : > { %v1485_v5 = vpop.eup %1484 }
 0x790   : > { %v1077_v11 = vmul.f32 %v1485_v5, %v1069_v3 }
 0x792   : > { %v1085_v13 = vmul.f32 %v1310_v10, %v1077_v11 }
 0x794   : > { %v1093_v14 = vadd.f32 %v1311_v12, %v1085_v13 }
 0x796   : > { %1094 = vst.msk [vmem:[%s474_s12] sm:$0xff] %vm1018_vm6, %v1093_v14 }
 0x797 PF: > { %p1399_p4 = scmp.ge.s32.totalorder %s1562_s18, 2  ;;  %s1145_s22 = sand.u32 1, %s1542_s13  }
 0x798   : > { %s1146_s11 = scalar_lea.sflag [#allocation4], %s1145_s22 }
 0x799   : > { %p1396_p0 = pnand %p1399_p4, %p1676_p8 }
 0x79b   : > { %p1397_p1 = pneg %p1396_p0 }
 0x79d   : > { %1537 = dma.done.wait (%p1397_p1), %s1146_s11, 512  }
 0x79e   : > { %1539 = vsyncadd (%p1397_p1), %s1146_s11, 4294966784  ;;  %s24_s18 = sadd.s32 1, %s1562_s18   ;;  %s1911_s13 = smov %s1546_s14 }
 0x79f   : > { %p21_p2 = scmp.ge.s32.totalorder %s24_s18, 4   ;;  %s1912_s14 = smov %s1550_s15 }
 0x7a0   : > { %s1913_s15 = smov %s1682_s26  ;;  %s1914_s16 = smov %s1558_s17 }
 0x7a1   : > { %s1915_s17 = smov %s1917_s21  ;;  %23 = sbr.rel (!%p21_p2) target bundleno = 7 (0x7), region = 118 }
 0x7a6   :  { %1151 = vsyncpa [#allocation4], 1 }
 0x7a7   :  { %1153 = vsyncpa [#allocation4 + $0x1], 1 }

// kernel: transformer_forward.27
= control target key start
LH: loop header
LB: loop body
LE: loop exit
PB: predicated region body
PF: predicated region fallthrough
CT: control target
= control target key end

     0   :  { %vm19_vm0 = vcmask 261120   ;;  %v144_v0 = vmov 0.0   ;;  %vm145_vm1 = vmmov 0   ;;  %vm114_vm2 = vcmask 257024   ;;  %s192_s1 = inlined_call_operand.vmem [shape: bf16[32,32], index: 1, kind: input, shape index: {}]   ;;  %s193_s0 = inlined_call_operand.vmem [shape: f32[16,32], index: 0, kind: input, shape index: {}]   ;;  %s194_s2 = inlined_call_operand.vmem [shape: f32[1,32], index: 2, kind: input, shape index: {}]   ;;  %s195_s3 = inlined_call_operand.vmem [shape: bf16[16,32], index: 3, kind: output, shape index: {}]  }
   0x1   :  { %132 = vmatprep.subr.bf16.mxu0 %v144_v0  ;;  %v142_v1 = vld [vmem:[%s192_s1 + $0x8] sm:$0xff]   ;;  %136 = vmatprep.mubr.msk.bf16.mxu0 %vm145_vm1, %v144_v0  ;;  %20 = vst.msk [vmem:[#allocation2] sm:$0xff] %vm19_vm0, %v144_v0  ;;  %21 = vst.msk [vmem:[#allocation2 + $0x8] sm:$0xff] %vm19_vm0, %v144_v0  ;;  %v143_v2 = vld [vmem:[%s192_s1] sm:$0xff]  }
   0x2   :  { %133 = vmatpush3.bf16.msra.mxu0 %v142_v1  ;;  %v24_v3 = vld [vmem:[%s193_s0] sm:$0xff]  ;;  %v25_v4 = vld [vmem:[%s193_s0 + $0x8] sm:$0xff] }
   0x3   :  { %134 = vmatprep.subr.bf16.mxu0 %v144_v0  ;;  %v26_v5 = vpack.c.bf16 %v25_v4, %v24_v3  ;;  %v124_v14 = vld [vmem:[%s194_s2] ss:$0 sm:$0xff] }
   0x6   :  { %135 = vmatpush3.bf16.msra.mxu0 %v143_v2 }
   0x8   :  { %v22_v6 = vld [vmem:[#allocation2] sm:$0xff]  ;;  %v23_v10 = vld [vmem:[#allocation2 + $0x8] sm:$0xff] }
   0x9   :  { %137 = vmatmul.mubr.msk.bf16.vlgmr.msra.gmra.mxu0 %vm19_vm0, %v26_v5 }
  0xc9   :  { %v81_v7 = vpop.f32.mrf.mxu0 }
  0xca   :  { %v88_v8 = vadd.f32 %v81_v7, %v22_v6 }
  0xcb   :  { %v138_v9 = vpop.f32.mrf.mxu0 }
  0xcc   :  { %90 = vst.msk [vmem:[#allocation2] sm:$0xff] %vm19_vm0, %v88_v8 }
  0xcd   :  { %v84_v11 = vpop.f32.mrf.mxu0 }
  0xce   :  { %v89_v12 = vadd.f32 %v84_v11, %v23_v10 }
  0xcf   :  { %v139_v13 = vpop.f32.mrf.mxu0 }
  0xd0   :  { %91 = vst.msk [vmem:[#allocation2 + $0x8] sm:$0xff] %vm19_vm0, %v89_v12 }
  0xd3   :  { %v95_v15 = vld [vmem:[#allocation2] sm:$0xff] }
  0xd4   :  { %v104_v16 = vadd.f32 %v124_v14, %v95_v15 }
  0xd6   :  { %v127_v17 = vpack.c.bf16 %v104_v16, %v104_v16 }
  0xd7   :  { %v96_v18 = vld [vmem:[#allocation2 + $0x8] sm:$0xff] }
  0xd8   :  { %115 = vst.msk [vmem:[%s195_s3] sm:$0xf] %vm114_vm2, %v127_v17  ;;  %v105_v19 = vadd.f32 %v124_v14, %v96_v18 }
  0xda   :  { %v128_v20 = vpack.c.bf16 %v105_v19, %v105_v19 }
  0xdc   :  { %116 = vst.msk [vmem:[%s195_s3 + $0x4] sm:$0xf] %vm114_vm2, %v128_v20 }

// kernel: transformer_forward.26
= control target key start
LH: loop header
LB: loop body
LE: loop exit
PB: predicated region body
PF: predicated region fallthrough
CT: control target
= control target key end

     0   :  { %s1907_s0 = inlined_call_operand.vmem [shape: bf16[2,8,32], index: 0, kind: input, shape index: {}]   ;;  %s1908_s1 = inlined_call_operand.vmem [shape: bf16[2,8,32], index: 1, kind: input, shape index: {}]   ;;  %s1909_s2 = inlined_call_operand.vmem [shape: bf16[2,8,32], index: 2, kind: input, shape index: {}]   ;;  %s1910_s3 = inlined_call_operand.vmem [shape: f32[2,1,8], index: 3, kind: input, shape index: {}]   ;;  %s1911_s4 = inlined_call_operand.vmem [shape: bf16[32,32], index: 4, kind: input, shape index: {}]   ;;  %s1912_s5 = inlined_call_operand.vmem [shape: f32[1,32], index: 5, kind: input, shape index: {}]   ;;  %s1913_s6 = inlined_call_operand.vmem [shape: f32[2,8,32], index: 6, kind: input, shape index: {}]   ;;  %s1914_s7 = inlined_call_operand.vmem [shape: f32[1,32], index: 7, kind: input, shape index: {}]   ;;  %s1915_s8 = inlined_call_operand.vmem [shape: f32[1,32], index: 8, kind: input, shape index: {}]   ;;  %s1916_s9 = inlined_call_operand.vmem [shape: f32[2,8,32], index: 9, kind: output, shape index: {0}]   ;;  %s1917_s10 = inlined_call_operand.hbm [shape: f32[2,4,8,8], index: 10, kind: output, shape index: {1}]  }
   0x1   :  { %1921 = sst [smem:[#allocation6_spill]] %s1907_s0 }
   0x2   :  { %1922 = sst [smem:[#allocation7_spill]] %s1908_s1 }
   0x3   :  { %16 = vsyncpa [#allocation4], 0 }
   0x4   :  { %18 = vsyncpa [#allocation4 + $0x1], 0  ;;  %s1641_s13 = smov 0   ;;  %s1643_s14 = smov 0  }
   0x5   :  { %s1645_s15 = smov 0   ;;  %s1647_s16 = smov 0  }
   0x6   :  { %s1649_s17 = smov 0   ;;  %s1651_s18 = smov 0  }
   0x7 LB: > { %s1285_s19 = sadd.s32 4294967295, %s1574_s18   ;;  %s1286_s20 = sadd.s32 4294967294, %s1574_s18   ;;  %s1574_s18 = sphi %s1651_s18, %s24_s18   ;;  %s1570_s17 = sphi %s1649_s17, %s1934_s17   ;;  %s1566_s16 = sphi %s1647_s16, %s1933_s16   ;;  %s1562_s15 = sphi %s1645_s15, %s1932_s15   ;;  %s1558_s14 = sphi %s1643_s14, %s1931_s14   ;;  %s1554_s13 = sphi %s1641_s13, %s1930_s13  }
   0x8   : > { %s36_s21 = sadd.s32 1, %s1570_s17  ;;  %s291_s22 = sadd.s32 1, %s1562_s15 }
   0x9   : > { %p38_p0 = scmp.ge.s32.totalorder %s36_s21, 2  ;;  %p301_p1 = scmp.ne.s32.totalorder %s1562_s15, %s1558_s14 }
   0xa   : > { %p302_p2 = scmp.eq.s32.totalorder %s1285_s19, 1  ;;  %p307_p3 = scmp.ne.s32.totalorder %s1558_s14, %s1554_s13 }
   0xb   : > { %s1936_s21 = smov (%p38_p0, %s36_s21), 0  ;;  %p308_p5 = scmp.eq.s32.totalorder %s1286_s20, 1 }
   0xc   : > { %p1681_p4 = por %p302_p2, %p301_p1  ;;  %s286_s24 = ssub.s32 %s1570_s17, %s1936_s21 }
   0xd   : > { %p1289_p6 = scmp.ge.s32.totalorder %s1574_s18, 1  ;;  %p289_p7 = scmp.eq.s32.totalorder %s286_s24, 0 }
   0xe   : > { %p1688_p8 = por %p308_p5, %p307_p3  ;;  %p378_p9 = scmp.lt.s32.totalorder %s1574_s18, 3 }
   0xf   : > { %s1694_s26 = scalar_select %p289_p7, %s1562_s15, %s291_s22  }
  0x10   : > { %p379_p10 = pnand %p1289_p6, %p378_p9 }
  0x11   : > { %p443_p11 = scmp.lt.s32.totalorder (!%p379_p10), %s1566_s16, 1  ;;  %s1925_s1 = sld [smem:[#allocation7_spill]] (!%p379_p10) }
  0x12   : > { %382 = sbr.rel (%p379_p10) target bundleno = 1943 (0x797), region = 56  ;;  %s1926_s0 = sld [smem:[#allocation6_spill]] (!%p379_p10) }
  0x13   : > { %s1578_s30 = smov (!%p379_p10), 120   ;;  %s1579_s12 = smov (!%p379_p10), 112  }
  0x14   : > { %s1918_s19 = smov (!%p379_p10), 104  }
  0x17   : > { %v1576_v0 = vmov 0.0   ;;  %vm1577_vm0 = vmmov 0   ;;  %s1701_s27 = scalar_select %p443_p11, %s1566_s16, 1  ;;  %vm498_vm1 = vcmask 64512   ;;  %v483_v4 = vlaneseq }
  0x18   : > { %1349 = vmatprep.subr.bf16.mxu0 %v1576_v0  ;;  %1351 = vmatprep.mubr.msk.bf16.mxu0 %vm1577_vm0, %v1576_v0  ;;  %vm563_vm3 = vcmask 1043456   ;;  %vm738_vm4 = vcmask 130112   ;;  %vm870_vm5 = vcmask 195712   ;;  %vm1002_vm6 = vcmask 261312  }
  0x19   : > { %1355 = vmatprep.subr.bf16.mxu1 %v1576_v0  ;;  %1357 = vmatprep.mubr.msk.bf16.mxu1 %vm1577_vm0, %v1576_v0  ;;  %s1707_s28 = sshll.u32 %s1701_s27, 2  ;;  %v484_v5 = vshrl.u32 %v483_v4, 7  ;;  %v489_v6 = vand.u32 127, %v483_v4  ;;  %s460_s29 = scalar_lea.vmem %s1910_s3, %s1701_s27  ;;  %vm1029_vm7 = vcmask 261120  }
  0x1a   : > { %s1713_s11 = scalar_lea.vmem %s1925_s1, %s1707_s28  ;;  %s1720_s20 = scalar_lea.vmem %s1926_s0, %s1707_s28  ;;  %v1296_v7 = vld [vmem:[%s460_s29] ss:$0 sm:$0xff] }
  0x1b   : > { %v496_v1 = vld [vmem:[%s1713_s11] sm:$0xf]  ;;  %vm490_vm2 = vcmp.gt.s32.totalorder %v489_v6, %v484_v5  ;;  %s1752_s29 = scalar_lea.vmem %s1909_s2, %s1707_s28 }
  0x1c   : > { %v503_v2 = vsel %vm498_vm1, %v496_v1, 0  ;;  %v495_v3 = vld [vmem:[%s1720_s20] sm:$0xf]  ;;  %v1297_v8 = vsel %vm490_vm2, 1.0, %v1576_v0 }
  0x1d   : > { %1350 = vmatpush3.bf16.xpose.msra.mxu0 %v503_v2  ;;  %v493_v9 = vmax.f32 %v1296_v7, %v1297_v8  ;;  %v1469_v18 = vld [vmem:[%s1713_s11] ss:$0 sps:$4 sm:$0xff]  }
  0x1e   : > { %1367 = vmatprep.subr.bf16.mxu0 %v1576_v0  ;;  %619 = vrot.lane.b32.xlu1 %v1469_v18, %s1578_s30  ;;  %v1470_v19 = vld [vmem:[%s1720_s20] ss:$0 sps:$4 sm:$0xff]  }
  0x1f   : > { %v1733_v10 = vmul.f32 -1e+09, %v493_v9  ;;  %v1472_v20 = vld [vmem:[%s1720_s20] ss:$0 sps:$4 sm:$0xff]  }
  0x20   : > { %v1473_v21 = vld [vmem:[%s1713_s11] ss:$0 sps:$4 sm:$0xff]  }
  0x21   : > { %v1474_v22 = vld [vmem:[%s1720_s20] ss:$0 sps:$4 sm:$0xff]   ;;  %s440_s20 = sand.u32 1, %s1558_s14  }
  0x22   : > { %614 = vrot.lane.b32.xlu1 %v1470_v19, %s1578_s30  ;;  %v497_v28 = vld [vmem:[%s1752_s29] sm:$0xf] }
  0x23   : > { %v565_v29 = vsel %vm563_vm3, %v497_v28, 0  ;;  %v1471_v30 = vld [vmem:[%s1713_s11] ss:$0 sps:$4 sm:$0xff]   ;;  %s1927_s11 = smov 104  }
  0x24   : > { %1352 = vmatmul.mubr.msk.bf16.vlgmr.msra.gmra.mxu0 %vm498_vm1, %v495_v3  ;;  %1356 = vmatpush3.bf16.msra.mxu1 %v565_v29  ;;  %v1476_v18 = vld [vmem:[%s1752_s29] ss:$0 sps:$4 sm:$0xff]  }
  0x25   : > { %1369 = vmatprep.mubr.msk.bf16.mxu0 %vm1577_vm0, %v1576_v0  ;;  %1361 = vmatprep.subr.bf16.mxu1 %v1576_v0 }
  0x26   : > { %746 = vrot.lane.b32.xlu1 %v1472_v20, %s1579_s12 }
  0x2a   : > { %883 = vrot.lane.b32.xlu1 %v1473_v21, %s1918_s19 }
  0x2e   : > { %878 = vrot.lane.b32.xlu1 %v1474_v22, %s1918_s19  ;;  %s1290_s19 = sshll.u32 %s440_s20, 5 }
  0x2f   : > { %s1763_s28 = scalar_lea.vmem [#allocation3], %s1290_s19  ;;  %s1329_s19 = sshll.u32 %s1566_s16, 9 }
  0x30   : > { %s1131_s22 = sshll.u32 %s1763_s28, 4  ;;  %s1584_s16 = smov [#allocation3]   ;;  %s1845_s22 = int_to_ptr.vmem [resolvable:$true] %s1131_s22 }
  0x90   : > { %v620_v33 = vpop.permute.xlu1 %619 }
  0x91   : > { %v625_v35 = vsel %vm498_vm1, %v620_v33, 0 }
  0x94   : > { %v615_v37 = vpop.permute.xlu1 %614 }
  0x98   : > { %v747_v39 = vpop.permute.xlu1 %746 }
  0x9c   : > { %v884_v41 = vpop.permute.xlu1 %883 }
  0x9d   : > { %v889_v42 = vsel %vm498_vm1, %v884_v41, 0 }
  0xa0   : > { %v879_v43 = vpop.permute.xlu1 %878 }
  0xe4   : > { %v539_v11 = vpop.f32.mrf.mxu0 }
  0xe5   : > { %v545_v12 = vmul.f32 0.35355338, %v539_v11 }
  0xe6   : > { %v1353_v13 = vpop.f32.mrf.mxu0 }
  0xe7   : > { %v546_v14 = vadd.f32 %v545_v12, %v1733_v10 }
  0xe8   : > { %v542_v15 = vpop.f32.mrf.mxu0 }
  0xe9   : > { %v547_v16 = vsel %vm498_vm1, %v546_v14, -inf }
  0xea   : > { %548 = vmax.xlane.f32.xlu0 %v547_v16  ;;  %v1354_v17 = vpop.f32.mrf.mxu0  ;;  %v1475_v16 = vld [vmem:[%s1752_s29] ss:$0 sps:$4 sm:$0xff]  }
 0x173   : > { %v549_v23 = vpop.xlane.xlu0 %548 }
 0x174   : > { %v550_v24 = vsub.f32 %v546_v14, %v549_v23  ;;  %v1477_v23 = vld [vmem:[%s1752_s29] ss:$0 sps:$4 sm:$0xff]  }
 0x176   : > { %v551_v25 = vmul.f32 1.442695, %v550_v24 }
 0x178   : > { %1480 = vpow2.f32 %v551_v25 }
 0x185   : > { %v1481_v26 = vpop.eup %1480 }
 0x186   : > { %v553_v27 = vsel %vm498_vm1, %v1481_v26, 0.0 }
 0x187   : > { %554 = vadd.xlane.f32.xlu0 %v553_v27 }
 0x19d   : > { %751 = vrot.lane.b32.xlu0 %v1471_v30, %s1579_s12 }
 0x210   : > { %v555_v31 = vpop.xlane.xlu0 %554 }
 0x211   : > { %1482 = vrcp.f32 %v555_v31 }
 0x214   : > { %v752_v38 = vpop.permute.xlu0 %751 }
 0x215   : > { %v757_v40 = vsel %vm498_vm1, %v752_v38, 0 }
 0x21e   : > { %v1483_v32 = vpop.eup %1482 }
 0x21f   : > { %v557_v34 = vmul.f32 %v1483_v32, %v1481_v26 }
 0x221   : > { %558 = vst.msk [vmem:[%s1763_s28] sm:$0xff] %vm498_vm1, %v557_v34  ;;  %v559_v36 = vpack.c.bf16 %v557_v34, %v557_v34 }
 0x223   : > { %1358 = vmatmul.mubr.msk.bf16.vlgmr.msra.gmra.mxu1 %vm498_vm1, %v559_v36 }
 0x224   : > { %1362 = vmatpush3.bf16.xpose.msra.mxu1 %v625_v35  ;;  %1363 = vmatprep.mubr.msk.bf16.mxu1 %vm1577_vm0, %v1576_v0 }
 0x225   : > { %1373 = vmatprep.subr.bf16.mxu1 %v1576_v0 }
 0x22b   : > { %1364 = vmatmul.mubr.msk.bf16.vlgmr.msra.gmra.mxu1 %vm498_vm1, %v615_v37 }
 0x22c   : > { %1374 = vmatpush3.bf16.xpose.msra.mxu1 %v757_v40  ;;  %1375 = vmatprep.mubr.msk.bf16.mxu1 %vm1577_vm0, %v1576_v0 }
 0x22d   : > { %1385 = vmatprep.subr.bf16.mxu1 %v1576_v0 }
 0x233   : > { %1376 = vmatmul.mubr.msk.bf16.vlgmr.msra.gmra.mxu1 %vm498_vm1, %v747_v39 }
 0x234   : > { %1386 = vmatpush3.bf16.xpose.msra.mxu1 %v889_v42  ;;  %1387 = vmatprep.mubr.msk.bf16.mxu1 %vm1577_vm0, %v1576_v0 }
 0x235   : > { %1397 = vmatprep.subr.bf16.mxu1 %v1576_v0 }
 0x23b   : > { %1388 = vmatmul.mubr.msk.bf16.vlgmr.msra.gmra.mxu1 %vm498_vm1, %v879_v43 }
 0x23c   : > { %1401 = vmatprep.mubr.msk.bf16.mxu1 %vm1577_vm0, %v1576_v0 }
 0x2e3   : > { %v601_v44 = vpop.f32.mrf.mxu1 }
 0x2e4   : > { %607 = vst.msk [vmem:[#allocation2] sm:$0xff] %vm498_vm1, %v601_v44 }
 0x2e5   : > { %v1359_v45 = vpop.f32.mrf.mxu1 }
 0x2e7   : > { %v604_v46 = vpop.f32.mrf.mxu1 }
 0x2e9   : > { %v1360_v47 = vpop.f32.mrf.mxu1 }
 0x2eb   : > { %v661_v48 = vpop.f32.mrf.mxu1 }
 0x2ec   : > { %v667_v49 = vmul.f32 0.35355338, %v661_v48 }
 0x2ed   : > { %v1365_v50 = vpop.f32.mrf.mxu1 }
 0x2ee   : > { %v668_v51 = vadd.f32 %v667_v49, %v1733_v10  ;;  %v1478_v50 = vld [vmem:[%s1911_s4 + $0x8] sm:$0xff]  }
 0x2ef   : > { %v664_v52 = vpop.f32.mrf.mxu1  ;;  %1398 = vmatpush3.bf16.msra.mxu1 %v1478_v50 }
 0x2f0   : > { %v669_v53 = vsel %vm498_vm1, %v668_v51, -inf  ;;  %1399 = vmatprep.subr.bf16.mxu1 %v1576_v0 }
 0x2f1   : > { %670 = vmax.xlane.f32.xlu1 %v669_v53  ;;  %v1366_v54 = vpop.f32.mrf.mxu1 }
 0x2f3   : > { %v793_v55 = vpop.f32.mrf.mxu1 }
 0x2f4   : > { %v799_v56 = vmul.f32 0.35355338, %v793_v55 }
 0x2f5   : > { %v1377_v57 = vpop.f32.mrf.mxu1 }
 0x2f6   : > { %v800_v58 = vadd.f32 %v799_v56, %v1733_v10 }
 0x2f7   : > { %v796_v59 = vpop.f32.mrf.mxu1 }
 0x2f8   : > { %v801_v60 = vsel %vm498_vm1, %v800_v58, -inf }
 0x2f9   : > { %802 = vmax.xlane.f32.xlu0 %v801_v60  ;;  %v1378_v61 = vpop.f32.mrf.mxu1  ;;  %v1318_v60 = vld [vmem:[%s1912_s5] ss:$0 sm:$0xff] }
 0x2fb   : > { %v925_v62 = vpop.f32.mrf.mxu1 }
 0x2fc   : > { %v931_v63 = vmul.f32 0.35355338, %v925_v62 }
 0x2fd   : > { %v1389_v1 = vpop.f32.mrf.mxu1 }
 0x2fe   : > { %v932_v2 = vadd.f32 %v931_v63, %v1733_v10 }
 0x2ff   : > { %v928_v3 = vpop.f32.mrf.mxu1 }
 0x300   : > { %v933_v4 = vsel %vm498_vm1, %v932_v2, -inf }
 0x301   : > { %934 = vmax.xlane.f32.xlu1 %v933_v4  ;;  %v1390_v5 = vpop.f32.mrf.mxu1 }
 0x37a   : > { %v671_v6 = vpop.xlane.xlu1 %670 }
 0x37b   : > { %v672_v7 = vsub.f32 %v668_v51, %v671_v6  ;;  %v1479_v51 = vld [vmem:[%s1911_s4] sm:$0xff]  }
 0x37c   : > { %1400 = vmatpush3.bf16.msra.mxu1 %v1479_v51 }
 0x37d   : > { %v673_v8 = vmul.f32 1.442695, %v672_v7 }
 0x37f   : > { %1484 = vpow2.f32 %v673_v8 }
 0x382   : > { %v803_v9 = vpop.xlane.xlu0 %802 }
 0x383   : > { %v804_v11 = vsub.f32 %v800_v58, %v803_v9 }
 0x385   : > { %v805_v12 = vmul.f32 1.442695, %v804_v11 }
 0x387   : > { %1486 = vpow2.f32 %v805_v12 }
 0x38a   : > { %v935_v17 = vpop.xlane.xlu1 %934 }
 0x38b   : > { %v936_v19 = vsub.f32 %v932_v2, %v935_v17 }
 0x38c   : > { %v1485_v13 = vpop.eup %1484 }
 0x38d   : > { %v675_v14 = vsel %vm498_vm1, %v1485_v13, 0.0  ;;  %v937_v20 = vmul.f32 1.442695, %v936_v19 }
 0x38e   : > { %676 = vadd.xlane.f32.xlu1 %v675_v14 }
 0x38f   : > { %1488 = vpow2.f32 %v937_v20 }
 0x394   : > { %v1487_v10 = vpop.eup %1486 }
 0x395   : > { %v807_v15 = vsel %vm498_vm1, %v1487_v10, 0.0 }
 0x396   : > { %808 = vadd.xlane.f32.xlu0 %v807_v15 }
 0x39c   : > { %v1489_v21 = vpop.eup %1488 }
 0x39d   : > { %v939_v22 = vsel %vm498_vm1, %v1489_v21, 0.0 }
 0x39f   : > { %818 = vrot.lane.b32.xlu1 %v1475_v16, %s1579_s12  ;;  %s1582_s12 = smov 16  }
 0x3ac   : > { %686 = vrot.lane.b32.xlu0 %v1476_v18, %s1578_s30  ;;  %s1920_s30 = smov 8  }
 0x3c3   : > { %940 = vadd.xlane.f32.xlu1 %v939_v22 }
 0x3d4   : > { %950 = vrot.lane.b32.xlu1 %v1477_v23, %s1927_s11  ;;  %s1583_s11 = smov 24  }
 0x417   : > { %v677_v24 = vpop.xlane.xlu1 %676 }
 0x418   : > { %1490 = vrcp.f32 %v677_v24 }
 0x41b   : > { %v819_v30 = vpop.permute.xlu1 %818 }
 0x41c   : > { %v824_v32 = vsel %vm563_vm3, %v819_v30, 0 }
 0x41f   : > { %v809_v25 = vpop.xlane.xlu0 %808 }
 0x420   : > { %1492 = vrcp.f32 %v809_v25 }
 0x423   : > { %v687_v26 = vpop.permute.xlu0 %686 }
 0x424   : > { %v692_v27 = vsel %vm563_vm3, %v687_v26, 0 }
 0x425   : > { %v1491_v28 = vpop.eup %1490  ;;  %1368 = vmatpush3.bf16.msra.mxu0 %v692_v27 }
 0x426   : > { %1379 = vmatprep.subr.bf16.mxu0 %v1576_v0  ;;  %v679_v29 = vmul.f32 %v1491_v28, %v1485_v13 }
 0x428   : > { %1303 = vst.msk [vmem:[%s1763_s28 + $0x8] sm:$0xff] %vm498_vm1, %v679_v29  ;;  %v682_v31 = vpack.c.bf16 %v679_v29, %v679_v29 }
 0x42a   : > { %1370 = vmatmul.mubr.msk.bf16.vlgmr.msra.gmra.mxu0 %vm498_vm1, %v682_v31 }
 0x42b   : > { %1380 = vmatpush3.bf16.msra.mxu0 %v824_v32  ;;  %1381 = vmatprep.mubr.msk.bf16.mxu0 %vm1577_vm0, %v1576_v0 }
 0x42c   : > { %1391 = vmatprep.subr.bf16.mxu0 %v1576_v0 }
 0x42d   : > { %v1493_v33 = vpop.eup %1492 }
 0x42e   : > { %v811_v34 = vmul.f32 %v1493_v33, %v1487_v10 }
 0x430   : > { %1309 = vst.msk [vmem:[%s1763_s28 + $0x10] sm:$0xff] %vm498_vm1, %v811_v34  ;;  %v814_v35 = vpack.c.bf16 %v811_v34, %v811_v34 }
 0x432   : > { %1382 = vmatmul.mubr.msk.bf16.vlgmr.msra.gmra.mxu0 %vm498_vm1, %v814_v35 }
 0x433   : > { %1393 = vmatprep.mubr.msk.bf16.mxu0 %vm1577_vm0, %v1576_v0 }
 0x44c   : > { %v941_v36 = vpop.xlane.xlu1 %940 }
 0x44d   : > { %1494 = vrcp.f32 %v941_v36 }
 0x450   : > { %v951_v37 = vpop.permute.xlu1 %950 }
 0x451   : > { %v956_v38 = vsel %vm563_vm3, %v951_v37, 0 }
 0x452   : > { %1392 = vmatpush3.bf16.msra.mxu0 %v956_v38 }
 0x45a   : > { %v1495_v39 = vpop.eup %1494 }
 0x45b   : > { %v943_v40 = vmul.f32 %v1495_v39, %v1489_v21 }
 0x45d   : > { %1315 = vst.msk [vmem:[%s1763_s28 + $0x18] sm:$0xff] %vm498_vm1, %v943_v40  ;;  %v946_v41 = vpack.c.bf16 %v943_v40, %v943_v40  ;;  %s1502_s28 = sshll.u32 %s1584_s16, 4  ;;  %s1503_s28 = int_to_ptr.vmem [resolvable:$false] %s1502_s28 }
 0x45e   : > { %s1504_s0 = scalar_lea.vmem %s1503_s28, 1024  ;;  %p1505_p1 = scmp.lt.s32.totalorder %s1845_s22, %s1503_s28 }
 0x45f   : > { %1394 = vmatmul.mubr.msk.bf16.vlgmr.msra.gmra.mxu0 %vm498_vm1, %v946_v41 }
 0x4ea   : > { %v728_v42 = vpop.f32.mrf.mxu0 }
 0x4eb   : > { %735 = vrot.lane.b32.xlu0 %v728_v42, %s1920_s30  ;;  %s1498_s30 = scalar_lea.vmem %s1845_s22, 512 }
 0x4ec   : > { %v1371_v43 = vpop.f32.mrf.mxu0  ;;  %p1499_p12 = scmp.ne.s32.totalorder %s1845_s22, %s1498_s30  ;;  %p1506_p2 = scmp.lt.s32.totalorder %s1504_s0, %s1498_s30 }
 0x4ee   : > { %v731_v44 = vpop.f32.mrf.mxu0  ;;  %p1500_p13 = pnand %p1499_p12, %p1681_p4  ;;  %p1507_p3 = por %p1506_p2, %p1505_p1 }
 0x4f0   : > { %v1372_v45 = vpop.f32.mrf.mxu0  ;;  %p1501_p0 = pneg %p1500_p13 }
 0x4f2   : > { %v860_v46 = vpop.f32.mrf.mxu0  ;;  %p1508_p5 = pnand %p1507_p3, %p1501_p0 }
 0x4f3   : > { %867 = vrot.lane.b32.xlu1 %v860_v46, %s1582_s12  ;;  %s1919_s12 = sshll.u32 %s1701_s27, 3 }
 0x4f4   : > { %v1383_v47 = vpop.f32.mrf.mxu0  ;;  %s467_s24 = scalar_lea.vmem %s1913_s6, %s1919_s12  ;;  %s1849_s12 = scalar_lea.sflag [#allocation4], %s440_s20 }
 0x4f5   : > { %v1073_v62 = vld [vmem:[%s467_s24] sm:$0xff] }
 0x4f6   : > { %v863_v48 = vpop.f32.mrf.mxu0 }
 0x4f8   : > { %v1384_v49 = vpop.f32.mrf.mxu0 }
 0x51f   : > { %v992_v52 = vpop.f32.mrf.mxu0 }
 0x520   : > { %999 = vrot.lane.b32.xlu0 %v992_v52, %s1583_s11  ;;  %s1843_s11 = scalar_lea.hbm %s1917_s10, %s1329_s19 }
 0x521   : > { %v1395_v53 = vpop.f32.mrf.mxu0 }
 0x523   : > { %v995_v54 = vpop.f32.mrf.mxu0 }
 0x525   : > { %v1396_v55 = vpop.f32.mrf.mxu0 }
 0x55d   : > { %v736_v56 = vpop.permute.xlu0 %735 }
 0x55e   : > { %739 = vst.msk [vmem:[#allocation2] sm:$0xff] %vm738_vm4, %v736_v56 }
 0x565   : > { %v868_v57 = vpop.permute.xlu1 %867 }
 0x566   : > { %871 = vst.msk [vmem:[#allocation2] sm:$0xff] %vm870_vm5, %v868_v57 }
 0x592   : > { %v1000_v58 = vpop.permute.xlu0 %999 }
 0x593   : > { %1003 = vst.msk [vmem:[#allocation2] sm:$0xff] %vm1002_vm6, %v1000_v58 }
 0x59a   : > { %v1004_v59 = vld [vmem:[#allocation2] sm:$0xff] }
 0x59b   : > { %v1005_v0 = vpack.c.bf16 %v1004_v59, %v1004_v59 }
 0x59d   : > { %1402 = vmatmul.mubr.msk.bf16.vlgmr.msra.gmra.mxu1 %vm1029_vm7, %v1005_v0 }
 0x65d   : > { %v1067_v61 = vpop.f32.mrf.mxu1 }
 0x65e   : > { %v1068_v63 = vadd.f32 %v1318_v60, %v1067_v61 }
 0x65f   : > { %v1403_v1 = vpop.f32.mrf.mxu1 }
 0x660   : > { %v1074_v2 = vadd.f32 %v1073_v62, %v1068_v63 }
 0x661   : > { %v1070_v3 = vpop.f32.mrf.mxu1 }
 0x662   : > { %v1075_v4 = vsel %vm1029_vm7, %v1074_v2, 0.0 }
 0x663   : > { %1076 = vadd.xlane.f32.xlu1 %v1075_v4  ;;  %v1404_v5 = vpop.f32.mrf.mxu1 }
 0x6ec   : > { %v1077_v6 = vpop.xlane.xlu1 %1076 }
 0x6ed   : > { %v1079_v7 = vmul.f32 0.03125, %v1077_v6 }
 0x6ef   : > { %v1080_v8 = vsub.f32 %v1074_v2, %v1079_v7 }
 0x6f1   : > { %v1081_v9 = vmul.f32 %v1080_v8, %v1080_v8 }
 0x6f3   : > { %v1082_v11 = vsel %vm1029_vm7, %v1081_v9, 0.0 }
 0x6f4   : > { %1083 = vadd.xlane.f32.xlu0 %v1082_v11 }
 0x6f5   : > { %1511 = shalt.err (!%p1508_p5)
}
 0x6f6   : > { %s1512_s20 = scalar_lea.hbm %s1843_s11, 512  ;;  %s1516_s29 = scalar_lea.hbm %s1917_s10, 1024 }
 0x6f7   : > { %p1513_p6 = scmp.ne.s32.totalorder %s1843_s11, %s1512_s20  ;;  %p1517_p10 = scmp.lt.s32.totalorder %s1843_s11, %s1917_s10 }
 0x6f8   : > { %p1518_p11 = scmp.lt.s32.totalorder %s1516_s29, %s1512_s20 }
 0x6f9   : > { %p1514_p7 = pnand %p1513_p6, %p1681_p4 }
 0x6fa   : > { %p1519_p12 = por %p1518_p11, %p1517_p10 }
 0x6fb   : > { %p1515_p9 = pneg %p1514_p7 }
 0x6fd   : > { %p1520_p13 = pnand %p1519_p12, %p1515_p9 }
 0x6ff   : > { %1523 = shalt.err (!%p1520_p13)
}
 0x700   : > { %s1585_s0 = smov 128   ;;  %s1928_s30 = smov 8   ;;  %v1322_v15 = vld [vmem:[%s1914_s7] ss:$0 sm:$0xff] }
 0x701   : > { %1405 = dma.vmem_to_hbm [thread:$0]  (%p1681_p4), %s1845_s22, 512, %s1843_s11, %s1849_s12, %s1585_s0, %s1585_s0, %s1928_s30  }
 0x702   : > { %v1323_v17 = vld [vmem:[%s1915_s8] ss:$0 sm:$0xff]  ;;  %s1929_s23 = sshll.u32 %s1701_s27, 3 }
 0x703   : > { %s474_s12 = scalar_lea.vmem %s1916_s9, %s1929_s23 }
 0x77d   : > { %v1084_v12 = vpop.xlane.xlu0 %1083 }
 0x77e   : > { %v1085_v13 = vmul.f32 0.03125, %v1084_v12 }
 0x780   : > { %v1086_v14 = vadd.f32 1e-05, %v1085_v13 }
 0x782   : > { %1496 = vrsqrt.f32 %v1086_v14 }
 0x78f   : > { %v1497_v10 = vpop.eup %1496 }
 0x790   : > { %v1088_v16 = vmul.f32 %v1497_v10, %v1080_v8 }
 0x792   : > { %v1096_v18 = vmul.f32 %v1322_v15, %v1088_v16 }
 0x794   : > { %v1104_v19 = vadd.f32 %v1323_v17, %v1096_v18 }
 0x796   : > { %1105 = vst.msk [vmem:[%s474_s12] sm:$0xff] %vm1029_vm7, %v1104_v19 }
 0x797 PF: > { %p1411_p4 = scmp.ge.s32.totalorder %s1574_s18, 2  ;;  %s1156_s22 = sand.u32 1, %s1554_s13  }
 0x798   : > { %s1157_s11 = scalar_lea.sflag [#allocation4], %s1156_s22 }
 0x799   : > { %p1408_p0 = pnand %p1411_p4, %p1688_p8 }
 0x79b   : > { %p1409_p1 = pneg %p1408_p0 }
 0x79d   : > { %1549 = dma.done.wait (%p1409_p1), %s1157_s11, 512  }
 0x79e   : > { %1551 = vsyncadd (%p1409_p1), %s1157_s11, 4294966784  ;;  %s24_s18 = sadd.s32 1, %s1574_s18   ;;  %s1930_s13 = smov %s1558_s14 }
 0x79f   : > { %p21_p2 = scmp.ge.s32.totalorder %s24_s18, 4   ;;  %s1931_s14 = smov %s1562_s15 }
 0x7a0   : > { %s1932_s15 = smov %s1694_s26  ;;  %s1933_s16 = smov %s1570_s17 }
 0x7a1   : > { %s1934_s17 = smov %s1936_s21  ;;  %23 = sbr.rel (!%p21_p2) target bundleno = 7 (0x7), region = 118 }
 0x7a6   :  { %1162 = vsyncpa [#allocation4], 1 }
 0x7a7   :  { %1164 = vsyncpa [#allocation4 + $0x1], 1 }

// kernel: transformer_forward.37
= control target key start
LH: loop header
LB: loop body
LE: loop exit
PB: predicated region body
PF: predicated region fallthrough
CT: control target
= control target key end

     0   :  { %v170_v1 = vmov 0.0   ;;  %vm171_vm0 = vmmov 0   ;;  %vm20_vm1 = vcmask 523264   ;;  %s219_s0 = inlined_call_operand.vmem [shape: f32[16,32], index: 0, kind: input, shape index: {}]   ;;  %s220_s1 = inlined_call_operand.vmem [shape: bf16[32,64], index: 1, kind: input, shape index: {}]   ;;  %s221_s2 = inlined_call_operand.vmem [shape: f32[1,64], index: 2, kind: input, shape index: {}]   ;;  %s222_s3 = inlined_call_operand.hbm [shape: f32[16,64], index: 3, kind: output, shape index: {}]  }
   0x1   :  { %v146_v0 = vld [vmem:[%s220_s1 + $0x8] sm:$0xff]   ;;  %133 = vmatprep.subr.bf16.mxu0 %v170_v1  ;;  %v147_v2 = vld [vmem:[%s220_s1] sm:$0xff]   ;;  %137 = vmatprep.mubr.msk.bf16.mxu0 %vm171_vm0, %v170_v1 }
   0x2   :  { %134 = vmatpush3.bf16.msra.mxu0 %v146_v0  ;;  %v25_v3 = vld [vmem:[%s219_s0] sm:$0xff]  ;;  %v26_v4 = vld [vmem:[%s219_s0 + $0x8] sm:$0xff] }
   0x3   :  { %8 = vsyncpa [#allocation4], 0  ;;  %135 = vmatprep.subr.bf16.mxu0 %v170_v1  ;;  %21 = vst.msk [vmem:[#allocation2] sm:$0xff] %vm20_vm1, %v170_v1  ;;  %v27_v5 = vpack.c.bf16 %v26_v4, %v25_v3  ;;  %vm44_vm2 = vcmask 261120   ;;  %v129_v14 = vld [vmem:[%s221_s2] ss:$0 sm:$0xff] }
   0x4   :  { %22 = vst.msk [vmem:[#allocation2 + $0x8] sm:$0xff] %vm20_vm1, %v170_v1  ;;  %s172_s20 = smov [#allocation3]  }
   0x5   :  { %s115_s21 = sshll.u32 %s172_s20, 4  ;;  %s116_s21 = int_to_ptr.vmem [resolvable:$true] %s115_s21 }
   0x6   :  { %136 = vmatpush3.bf16.msra.mxu0 %v147_v2  ;;  %s148_s22 = scalar_lea.vmem %s116_s21, 256  ;;  %p153_p1 = scmp.lt.s32.totalorder %s116_s21, %s116_s21 }
   0x7   :  { %p149_p0 = scmp.ne.s32.totalorder %s116_s21, %s148_s22  ;;  %p154_p2 = scmp.lt.s32.totalorder %s148_s22, %s148_s22 }
   0x9   :  { %138 = vmatmul.mubr.msk.bf16.vlgmr.msra.gmra.mxu0 %vm44_vm2, %v27_v5  ;;  %p155_p3 = por %p154_p2, %p153_p1 }
   0xa   :  { %v23_v6 = vld [vmem:[#allocation2] sm:$0xff] }
   0xb   :  { %v24_v10 = vld [vmem:[#allocation2 + $0x8] sm:$0xff]  ;;  %p156_p4 = pnand %p155_p3, %p149_p0 }
  0xc9   :  { %v82_v7 = vpop.f32.mrf.mxu0 }
  0xca   :  { %v89_v8 = vadd.f32 %v82_v7, %v23_v6 }
  0xcb   :  { %v139_v9 = vpop.f32.mrf.mxu0 }
  0xcc   :  { %92 = vst.msk [vmem:[#allocation2] sm:$0xff] %vm20_vm1, %v89_v8 }
  0xcd   :  { %v85_v11 = vpop.f32.mrf.mxu0 }
  0xce   :  { %v90_v12 = vadd.f32 %v85_v11, %v24_v10 }
  0xcf   :  { %v140_v13 = vpop.f32.mrf.mxu0 }
  0xd0   :  { %93 = vst.msk [vmem:[#allocation2 + $0x8] sm:$0xff] %vm20_vm1, %v90_v12 }
  0xd3   :  { %v97_v15 = vld [vmem:[#allocation2] sm:$0xff] }
  0xd4   :  { %v106_v16 = vadd.f32 %v129_v14, %v97_v15 }
  0xd6   :  { %108 = vst.msk [vmem:[#allocation3] sm:$0xff] %vm20_vm1, %v106_v16 }
  0xd7   :  { %v98_v17 = vld [vmem:[#allocation2 + $0x8] sm:$0xff] }
  0xd8   :  { %v107_v18 = vadd.f32 %v129_v14, %v98_v17 }
  0xda   :  { %109 = vst.msk [vmem:[#allocation3 + $0x8] sm:$0xff] %vm20_vm1, %v107_v18 }
  0xdb   :  { %159 = shalt.err (!%p156_p4)
}
  0xdc   :  { %s173_s23 = smov 128   ;;  %s174_s2 = smov 8  }
  0xdd   :  { %121 = dma.vmem_to_hbm [thread:$0]  %s116_s21, 256, %s222_s3, [#allocation4], %s173_s23, %s173_s23, %s174_s2  }
  0xde   :  { %168 = dma.done.wait [#allocation4], 256  }
  0xdf   :  { %169 = vsyncadd [#allocation4], 4294967040 }
  0xe0   :  { %125 = vsyncpa [#allocation4], 1 }

</bundles_post_ra>
